<compile_context>
chip_gen: v6e
topology: v6e:2x2x1
jax: 0.10.0
libtpu: 0.0.40
codegen_flags: <defaults>
</compile_context>

<pallas_src>
import functools

import numpy as np
import jax
import jax.numpy as jnp
from jax import lax
from jax.experimental import pallas as pl
from jax.experimental.pallas import tpu as pltpu

LEAKY_SLOPE = 0.01   # TODO(synk): MLP activation undefined in reference; LeakyReLU assumed.
LN_EPS = 1e-5        # torch.nn.LayerNorm default
NOUT = 8             # narrow output slab: [u_new, v_new0, v_new1, 0, 0, 0, 0, 0]


def _round_up(a, b):
    return ((a + b - 1) // b) * b


# ----------------------------- Pallas kernel ------------------------------ #
def _fused_head_kernel(x_ref, u_ref, v_ref, w1_ref, b1_ref, w2_ref, b2_ref,
                       out_ref, *, eps, t):
    # LayerNorm statistics in f32 (gamma/beta already folded into W1/b1).
    x = x_ref[...]                                     # (tn, S) f32
    mu = jnp.mean(x, axis=1, keepdims=True)
    xc = x - mu
    var = jnp.mean(xc * xc, axis=1, keepdims=True)
    xn = xc * lax.rsqrt(var + eps)

    # Fused two-head MLP: one wide first matmul (bf16 operands, f32 accumulate),
    # LeakyReLU, block-diagonal second matmul into an 8-lane output slab.
    h = jnp.dot(xn.astype(jnp.bfloat16), w1_ref[...],
                preferred_element_type=jnp.float32) + b1_ref[...]
    h = jnp.where(h > 0, h, LEAKY_SLOPE * h)
    o = jnp.dot(h.astype(jnp.bfloat16), w2_ref[...],
                preferred_element_type=jnp.float32) + b2_ref[...]

    # Fused residual adds: col 0 += u[:, -1], cols 1:3 += v[:, -1, :].
    u_last = u_ref[:, t - 1:t]                         # (tn, 1)
    v_last = v_ref[:, 2 * (t - 1):2 * t]               # (tn, 2)
    res = jnp.concatenate(
        [u_last, v_last, jnp.zeros((o.shape[0], NOUT - 3), o.dtype)], axis=1)
    out_ref[...] = o + res                             # (tn, NOUT) f32


# --------------------------- host-side packing ----------------------------- #
def pack_head_params(raw):
    """One-time packing: fold LN affine into W1/b1, pad hidden to 256, pack W2
    block-diagonally into an 8-lane output, cast matmul operands to bf16."""
    S = raw['Wu1'].shape[0]
    Hu = raw['Wu1'].shape[1]
    Hv = raw['Wv1'].shape[1]
    Htot = Hu + Hv
    Hp = _round_up(Htot, 128)                          # 192 -> 256 (MXU-aligned K)

    gamma = raw['gamma'].astype(jnp.float32)
    beta = raw['beta'].astype(jnp.float32)
    W1 = jnp.concatenate([raw['Wu1'], raw['Wv1']], axis=1).astype(jnp.float32)
    b1 = jnp.concatenate([raw['bu1'], raw['bv1']]).astype(jnp.float32)

    # Fold LN affine (in f32, before the bf16 cast):
    #   (x̂*γ + β) @ W1 + b1  ==  x̂ @ (diag(γ) W1) + (β @ W1 + b1)
    W1f = gamma[:, None] * W1
    b1f = beta @ W1 + b1

    W1p = jnp.zeros((S, Hp), jnp.float32).at[:, :Htot].set(W1f)
    b1p = jnp.zeros((1, Hp), jnp.float32).at[0, :Htot].set(b1f)

    # Block-diagonal second layer into NOUT=8 lanes:
    #   col 0      <- out_scalar (u head)
    #   cols 1..2  <- out_rot    (v head)
    W2 = jnp.zeros((Hp, NOUT), jnp.float32)
    W2 = W2.at[:Hu, 0:1].set(raw['Wu2'])
    W2 = W2.at[Hu:Htot, 1:3].set(raw['Wv2'])
    b2 = jnp.zeros((1, NOUT), jnp.float32)
    b2 = b2.at[0, 0].set(raw['bu2'][0]).at[0, 1:3].set(raw['bv2'])

    return {
        'W1': W1p.astype(jnp.bfloat16), 'b1': b1p,       # bias stays f32 (f32 acc)
        'W2': W2.astype(jnp.bfloat16), 'b2': b2,
        'S': S, 'Hp': Hp,
    }


# ------------------------------ fused wrapper ------------------------------ #
def fused_output_heads(x, u, v, p, *, tile_n=512):
    """LayerNorm + out_scalar + out_rot + residual adds, fused.
    Returns (u_new (N,), v_new (N, 2))."""
    N, S = x.shape
    assert S == p['S']
    T = u.shape[1]
    v2 = v.reshape(N, 2 * T)                           # contiguous view, no compute
    Hp = p['Hp']

    # One big tile for small N (no per-step overhead); long parallel grid for
    # large N (shards across both v7x TensorCores).
    tn = min(tile_n, _round_up(N, 8))
    Np = _round_up(N, tn)
    if Np != N:
        pad = ((0, Np - N), (0, 0))
        x = jnp.pad(x, pad)                            # padded rows discarded below
        u = jnp.pad(u, pad)
        v2 = jnp.pad(v2, pad)

    row = lambda w: pl.BlockSpec((tn, w), lambda i: (i, 0))
    const = lambda shp: pl.BlockSpec(shp, lambda i: (0, 0))

    out = pl.pallas_call(
        functools.partial(_fused_head_kernel, eps=LN_EPS, t=T),
        out_shape=jax.ShapeDtypeStruct((Np, NOUT), jnp.float32),
        grid=(Np // tn,),
        in_specs=[row(S), row(T), row(2 * T),
                  const((S, Hp)), const((1, Hp)),
                  const((Hp, NOUT)), const((1, NOUT))],
        out_specs=row(NOUT),
        compiler_params=pltpu.CompilerParams(
            dimension_semantics=("parallel",)),
    )(x, u, v2, p['W1'], p['b1'], p['W2'], p['b2'])
    return out[:N, 0], out[:N, 1:3]


# ------------------------------ model forward ------------------------------ #
def invariant_transformer_smoke_forward(u, v, boundary_norm, is_boundary,
                                        is_inflow, y_force, pos, edge_index,
                                        x_latent, head_params, *, tile_n=512):
    # Geometric preprocessing from the spec's no_grad block.
    pos_c = lax.stop_gradient(pos - pos.mean(axis=0))
    row, col = edge_index
    edge_vec = pos_c[row] - pos_c[col]
    distance = jnp.sqrt(jnp.sum(edge_vec * edge_vec, axis=1))
    _ = distance
    # TODO(synk): besel_linspace, Node_embedding_inv_smoke and the InvBlock
    # message-passing stack are not defined in the reference source; `distance`
    # would feed them, and x_latent stands in for the post-block latent `x`.

    u_new, v_new = fused_output_heads(x_latent, u, v, head_params, tile_n=tile_n)
    return u_new, v_new


# --------------------------- pure-JAX reference ---------------------------- #
def _ref_forward(u, v, x, raw):
    mu = x.mean(axis=1, keepdims=True)
    var = ((x - mu) ** 2).mean(axis=1, keepdims=True)
    xn = (x - mu) / jnp.sqrt(var + LN_EPS)
    xn = xn * raw['gamma'][None, :] + raw['beta'][None, :]

    def mlp(W1, b1, W2, b2):
        h = xn @ W1 + b1
        h = jnp.where(h > 0, h, LEAKY_SLOPE * h)
        return h @ W2 + b2

    u_ = mlp(raw['Wu1'], raw['bu1'], raw['Wu2'], raw['bu2'])
    v_ = mlp(raw['Wv1'], raw['bv1'], raw['Wv2'], raw['bv2'])
    return u[:, -1] + u_.reshape(-1), v_ + v[:, -1, :]


# ----------------------------------- main ----------------------------------- #
if __name__ == "__main__":
    n_scalars, r_dim, T = 32, 16, 4
    H = 3 * n_scalars
    N, E = 1000, 4096       # 1000 nodes -> 2 parallel 512-row grid steps (24 padded rows)

    key = jax.random.PRNGKey(0)
    ks = jax.random.split(key, 17)
    u = jax.random.normal(ks[0], (N, T), jnp.float32)
    v = jax.random.normal(ks[1], (N, T, 2), jnp.float32)
    pos = jax.random.normal(ks[2], (N, 2), jnp.float32)
    boundary_norm = jax.random.normal(ks[3], (N, 2), jnp.float32)
    is_boundary = jax.random.uniform(ks[4], (N,)) > 0.8
    is_inflow = jax.random.uniform(ks[5], (N,)) > 0.9
    y_force = jax.random.normal(ks[6], (N,), jnp.float32)
    edge_index = jax.random.randint(ks[7], (2, E), 0, N)
    # Stand-in for the (undefined) node_embedding + InvBlock stack output.
    x_latent = jax.random.normal(ks[8], (N, n_scalars), jnp.float32)

    def lin(k, fan_in, shape):
        return jax.random.uniform(k, shape, jnp.float32, -1.0, 1.0) / np.sqrt(fan_in)

    raw = {
        'gamma': jnp.ones((n_scalars,), jnp.float32),
        'beta': jnp.zeros((n_scalars,), jnp.float32),
        'Wu1': lin(ks[9], n_scalars, (n_scalars, H)),
        'bu1': lin(ks[10], n_scalars, (H,)),
        'Wu2': lin(ks[11], H, (H, 1)),
        'bu2': lin(ks[12], H, (1,)),
        'Wv1': lin(ks[13], n_scalars, (n_scalars, H)),
        'bv1': lin(ks[14], n_scalars, (H,)),
        'Wv2': lin(ks[15], H, (H, 2)),
        'bv2': lin(ks[16], H, (2,)),
    }
    head_params = pack_head_params(raw)   # hoisted: folded/packed/bf16 once, reused per call

    u_new, v_new = invariant_transformer_smoke_forward(
        u, v, boundary_norm, is_boundary, is_inflow, y_force, pos, edge_index,
        x_latent, head_params)
    jax.block_until_ready((u_new, v_new))

    u_ref, v_ref = _ref_forward(u, v, x_latent, raw)
    assert jnp.allclose(u_new, u_ref, atol=2e-2, rtol=2e-2), "u mismatch"
    assert jnp.allclose(v_new, v_ref, atol=2e-2, rtol=2e-2), "v mismatch"
    print("KERNEL_OK")
</pallas_src>

<mosaic_0001>
module attributes {stable_mosaic.version = 11 : i64} {
  func.func @_fused_head_kernel(%arg0: i32, %arg1: memref<512x32xf32, #tpu.memory_space<vmem>>, %arg2: memref<512x4xf32, #tpu.memory_space<vmem>>, %arg3: memref<512x8xf32, #tpu.memory_space<vmem>>, %arg4: memref<32x256xbf16, #tpu.memory_space<vmem>>, %arg5: memref<1x256xf32, #tpu.memory_space<vmem>>, %arg6: memref<256x8xbf16, #tpu.memory_space<vmem>>, %arg7: memref<1x8xf32, #tpu.memory_space<vmem>>, %arg8: memref<512x8xf32, #tpu.memory_space<vmem>>) attributes {dimension_semantics = [#tpu.dimension_semantics<parallel>], iteration_bounds = array<i64: 2>, scalar_prefetch = 0 : i64, scratch_operands = 0 : i64, tpu.core_type = #tpu.core_type<tc>, window_params = [{transform_indices = @transform_0, window_bounds = array<i64: 512, 32>}, {transform_indices = @transform_1, window_bounds = array<i64: 512, 4>}, {transform_indices = @transform_2, window_bounds = array<i64: 512, 8>}, {pipeline_mode = #tpu.pipeline_mode<synchronous>, transform_indices = @transform_3, window_bounds = array<i64: 32, 256>}, {pipeline_mode = #tpu.pipeline_mode<synchronous>, transform_indices = @transform_4, window_bounds = array<i64: 1, 256>}, {pipeline_mode = #tpu.pipeline_mode<synchronous>, transform_indices = @transform_5, window_bounds = array<i64: 256, 8>}, {pipeline_mode = #tpu.pipeline_mode<synchronous>, transform_indices = @transform_6, window_bounds = array<i64: 1, 8>}, {transform_indices = @transform_7, window_bounds = array<i64: 512, 8>}]} {
    %c0 = arith.constant 0 : index
    %c0_0 = arith.constant 0 : index
    %0 = vector.load %arg1[%c0, %c0_0] : memref<512x32xf32, #tpu.memory_space<vmem>>, vector<512x32xf32>
    %cst = arith.constant dense<0.000000e+00> : vector<512xf32>
    %1 = vector.multi_reduction <add>, %0, %cst [1] : vector<512x32xf32> to vector<512xf32>
    %2 = vector.shape_cast %1 : vector<512xf32> to vector<512x1xf32>
    %cst_1 = arith.constant 3.200000e+01 : f32
    %3 = vector.broadcast %cst_1 : f32 to vector<512x1xf32>
    %4 = arith.divf %2, %3 : vector<512x1xf32>
    %5 = vector.broadcast %4 : vector<512x1xf32> to vector<512x32xf32>
    %6 = arith.subf %0, %5 : vector<512x32xf32>
    %7 = arith.mulf %6, %6 : vector<512x32xf32>
    %cst_2 = arith.constant dense<0.000000e+00> : vector<512xf32>
    %8 = vector.multi_reduction <add>, %7, %cst_2 [1] : vector<512x32xf32> to vector<512xf32>
    %9 = vector.shape_cast %8 : vector<512xf32> to vector<512x1xf32>
    %cst_3 = arith.constant 3.200000e+01 : f32
    %10 = vector.broadcast %cst_3 : f32 to vector<512x1xf32>
    %11 = arith.divf %9, %10 : vector<512x1xf32>
    %cst_4 = arith.constant 9.99999974E-6 : f32
    %12 = vector.broadcast %cst_4 : f32 to vector<512x1xf32>
    %13 = arith.addf %11, %12 : vector<512x1xf32>
    %14 = math.rsqrt %13 : vector<512x1xf32>
    %15 = vector.broadcast %14 : vector<512x1xf32> to vector<512x32xf32>
    %16 = arith.mulf %6, %15 : vector<512x32xf32>
    %17 = arith.truncf %16 : vector<512x32xf32> to vector<512x32xbf16>
    %c0_5 = arith.constant 0 : index
    %c0_6 = arith.constant 0 : index
    %18 = vector.load %arg4[%c0_5, %c0_6] : memref<32x256xbf16, #tpu.memory_space<vmem>>, vector<32x256xbf16>
    %cst_7 = arith.constant dense<0.000000e+00> : vector<512x256xf32>
    %19 = tpu.matmul %17, %18, %cst_7 {dimension_numbers = #tpu.dot_dimension_numbers<[1], [0], [0], [1], [0, 0, 1, 1], [], []>} : vector<512x32xbf16>, vector<32x256xbf16>, vector<512x256xf32> -> vector<512x256xf32>
    %c0_8 = arith.constant 0 : index
    %c0_9 = arith.constant 0 : index
    %20 = vector.load %arg5[%c0_8, %c0_9] : memref<1x256xf32, #tpu.memory_space<vmem>>, vector<1x256xf32>
    %21 = vector.broadcast %20 : vector<1x256xf32> to vector<512x256xf32>
    %22 = arith.addf %19, %21 : vector<512x256xf32>
    %cst_10 = arith.constant 0.000000e+00 : f32
    %23 = vector.broadcast %cst_10 : f32 to vector<512x256xf32>
    %24 = arith.cmpf ogt, %22, %23 : vector<512x256xf32>
    %cst_11 = arith.constant 0.00999999977 : f32
    %25 = vector.broadcast %cst_11 : f32 to vector<512x256xf32>
    %26 = arith.mulf %25, %22 : vector<512x256xf32>
    %27 = arith.select %24, %22, %26 : vector<512x256xi1>, vector<512x256xf32>
    %28 = arith.truncf %27 : vector<512x256xf32> to vector<512x256xbf16>
    %c0_12 = arith.constant 0 : index
    %c0_13 = arith.constant 0 : index
    %29 = vector.load %arg6[%c0_12, %c0_13] : memref<256x8xbf16, #tpu.memory_space<vmem>>, vector<256x8xbf16>
    %cst_14 = arith.constant dense<0.000000e+00> : vector<512x8xf32>
    %30 = tpu.matmul %28, %29, %cst_14 {dimension_numbers = #tpu.dot_dimension_numbers<[1], [0], [0], [1], [0, 0, 1, 1], [], []>} : vector<512x256xbf16>, vector<256x8xbf16>, vector<512x8xf32> -> vector<512x8xf32>
    %c0_15 = arith.constant 0 : index
    %c0_16 = arith.constant 0 : index
    %31 = vector.load %arg7[%c0_15, %c0_16] : memref<1x8xf32, #tpu.memory_space<vmem>>, vector<1x8xf32>
    %32 = vector.broadcast %31 : vector<1x8xf32> to vector<512x8xf32>
    %33 = arith.addf %30, %32 : vector<512x8xf32>
    %c0_17 = arith.constant 0 : index
    %c3 = arith.constant 3 : index
    %34 = vector.load %arg2[%c0_17, %c3] : memref<512x4xf32, #tpu.memory_space<vmem>>, vector<512x1xf32>
    %c0_18 = arith.constant 0 : index
    %c6 = arith.constant 6 : index
    %35 = vector.load %arg3[%c0_18, %c6] : memref<512x8xf32, #tpu.memory_space<vmem>>, vector<512x2xf32>
    %cst_19 = arith.constant 0.000000e+00 : f32
    %36 = vector.broadcast %cst_19 : f32 to vector<512x5xf32>
    %37 = tpu.concatenate %34, %35, %36 in 1 : vector<512x1xf32>, vector<512x2xf32>, vector<512x5xf32> -> vector<512x8xf32>
    %38 = arith.addf %33, %37 : vector<512x8xf32>
    %c0_20 = arith.constant 0 : index
    %c0_21 = arith.constant 0 : index
    %39 = vector.load %arg8[%c0_20, %c0_21] : memref<512x8xf32, #tpu.memory_space<vmem>>, vector<512x8xf32>
    tpu.vector_store %arg8[%c0_20, %c0_21], %38 {strides = array<i32>} : memref<512x8xf32, #tpu.memory_space<vmem>>, vector<512x8xf32>,
    return
  }
  func.func @transform_0(%arg0: i32) -> (i32, i32) {
    %c0_i32 = arith.constant 0 : i32
    %c0_i32_0 = arith.constant 0 : i32
    return %arg0, %c0_i32 : i32, i32
  }
  func.func @transform_1(%arg0: i32) -> (i32, i32) {
    %c0_i32 = arith.constant 0 : i32
    %c0_i32_0 = arith.constant 0 : i32
    return %arg0, %c0_i32 : i32, i32
  }
  func.func @transform_2(%arg0: i32) -> (i32, i32) {
    %c0_i32 = arith.constant 0 : i32
    %c0_i32_0 = arith.constant 0 : i32
    return %arg0, %c0_i32 : i32, i32
  }
  func.func @transform_3(%arg0: i32) -> (i32, i32) {
    %c0_i32 = arith.constant 0 : i32
    %c0_i32_0 = arith.constant 0 : i32
    %c0_i32_1 = arith.constant 0 : i32
    return %c0_i32, %c0_i32_0 : i32, i32
  }
  func.func @transform_4(%arg0: i32) -> (i32, i32) {
    %c0_i32 = arith.constant 0 : i32
    %c0_i32_0 = arith.constant 0 : i32
    %c0_i32_1 = arith.constant 0 : i32
    return %c0_i32, %c0_i32_0 : i32, i32
  }
  func.func @transform_5(%arg0: i32) -> (i32, i32) {
    %c0_i32 = arith.constant 0 : i32
    %c0_i32_0 = arith.constant 0 : i32
    %c0_i32_1 = arith.constant 0 : i32
    return %c0_i32, %c0_i32_0 : i32, i32
  }
  func.func @transform_6(%arg0: i32) -> (i32, i32) {
    %c0_i32 = arith.constant 0 : i32
    %c0_i32_0 = arith.constant 0 : i32
    %c0_i32_1 = arith.constant 0 : i32
    return %c0_i32, %c0_i32_0 : i32, i32
  }
  func.func @transform_7(%arg0: i32) -> (i32, i32) {
    %c0_i32 = arith.constant 0 : i32
    %c0_i32_0 = arith.constant 0 : i32
    return %arg0, %c0_i32 : i32, i32
  }
}

</mosaic_0001>

<bundles_post_ra>
// kernel: tpu_custom_call.1
= control target key start
LH: loop header
LB: loop body
LE: loop exit
PB: predicated region body
PF: predicated region fallthrough
CT: control target
= control target key end

     0   :  { %s3906_s24 = smov 0   ;;  %s5967_s0 = inlined_call_operand.vmem [shape: f32[1024,32], index: 0, kind: input, shape index: {}]   ;;  %s5968_s1 = inlined_call_operand.vmem [shape: f32[1024,4], index: 1, kind: input, shape index: {}]   ;;  %s5969_s2 = inlined_call_operand.vmem [shape: f32[1024,8], index: 2, kind: input, shape index: {}]   ;;  %s5970_s3 = inlined_call_operand.vmem [shape: bf16[32,256], index: 3, kind: input, shape index: {}]   ;;  %s5971_s4 = inlined_call_operand.vmem [shape: f32[1,256], index: 4, kind: input, shape index: {}]   ;;  %s5972_s5 = inlined_call_operand.vmem [shape: bf16[256,8], index: 5, kind: input, shape index: {}]   ;;  %s5973_s6 = inlined_call_operand.vmem [shape: f32[1,8], index: 6, kind: input, shape index: {}]   ;;  %s5974_s7 = inlined_call_operand.vmem [shape: f32[1024,8], index: 7, kind: output, shape index: {}]  }
   0x1 LB: > { %s3593_s25 = sadd.s32 4294967295, %s3861_s24   ;;  %p3597_p0 = scmp.ge.s32.totalorder %s3861_s24, 1  ;;  %s3861_s24 = sphi %s3906_s24, %s17_s24  }
   0x2   : > { %p260_p1 = scmp.lt.s32.totalorder %s3861_s24, 3 }
   0x4   : > { %p261_p2 = pnand %p3597_p0, %p260_p1 }
   0x6   : > { %264 = sbr.rel (%p261_p2) target bundleno = 1192 (0x4a8), region = 48 }
   0xb   : > { %s3598_s26 = sshll.u32 %s3593_s25, 6  ;;  %vm391_vm0 = vcmask 261120   ;;  %s3864_s12 = smov 125  }
   0xc   : > { %p303_p3 = scmp.lt.s32.totalorder %s3598_s26, 127  ;;  %s3865_s16 = smov 123  }
   0xe   : > { %s6072_s26 = smov (!%p303_p3, %s3598_s26), 127 }
   0xf   : > { %s3914_s27 = sshll.u32 %s6072_s26, 3 }
  0x10   : > { %s3920_s30 = scalar_lea.vmem %s5967_s0, %s3914_s27  ;;  %s4891_s11 = scalar_lea.vmem %s5968_s1, %s3914_s27 }
  0x11   : > { %v3923_v0 = vld [vmem:[%s3920_s30] sm:$0xff]  ;;  %v3926_v1 = vld [vmem:[%s3920_s30 + $0x8] sm:$0xff]  ;;  %v3929_v2 = vld [vmem:[%s3920_s30 + $0x10] sm:$0xff]  ;;  %s5108_s15 = scalar_lea.vmem %s5969_s2, %s3914_s27  ;;  %s5511_s21 = scalar_lea.vmem %s5974_s7, %s3914_s27 }
  0x12   : > { %v392_v3 = vsel %vm391_vm0, %v3923_v0, 0.0  ;;  %v398_v4 = vsel %vm391_vm0, %v3929_v2, 0.0  ;;  %v3936_v5 = vld [vmem:[%s3920_s30 + $0x18] sm:$0xff]  ;;  %v395_v6 = vsel %vm391_vm0, %v3926_v1, 0.0  ;;  %v3943_v8 = vld [vmem:[%s3920_s30 + $0x20] sm:$0xff]  ;;  %v3946_v9 = vld [vmem:[%s3920_s30 + $0x28] sm:$0xff] }
  0x13   : > { %393 = vadd.xlane.f32.xlu0 %v392_v3  ;;  %399 = vadd.xlane.f32.xlu1 %v398_v4  ;;  %v401_v7 = vsel %vm391_vm0, %v3936_v5, 0.0  ;;  %v3949_v10 = vld [vmem:[%s3920_s30 + $0x30] sm:$0xff]  ;;  %v3952_v11 = vld [vmem:[%s3920_s30 + $0x38] sm:$0xff]  ;;  %v404_v12 = vsel %vm391_vm0, %v3943_v8, 0.0  ;;  %v407_v13 = vsel %vm391_vm0, %v3946_v9, 0.0  ;;  %v3963_v16 = vld [vmem:[%s3920_s30 + $0x40] sm:$0xff] }
  0x14   : > { %v410_v14 = vsel %vm391_vm0, %v3949_v10, 0.0  ;;  %v413_v15 = vsel %vm391_vm0, %v3952_v11, 0.0  ;;  %v3966_v17 = vld [vmem:[%s3920_s30 + $0x48] sm:$0xff]  ;;  %v416_v18 = vsel %vm391_vm0, %v3963_v16, 0.0  ;;  %v3973_v20 = vld [vmem:[%s3920_s30 + $0x50] sm:$0xff]  ;;  %v3976_v21 = vld [vmem:[%s3920_s30 + $0x58] sm:$0xff] }
  0x15   : > { %v419_v19 = vsel %vm391_vm0, %v3966_v17, 0.0  ;;  %v422_v22 = vsel %vm391_vm0, %v3973_v20, 0.0  ;;  %v425_v23 = vsel %vm391_vm0, %v3976_v21, 0.0  ;;  %v3983_v24 = vld [vmem:[%s3920_s30 + $0x60] sm:$0xff]  ;;  %v3986_v25 = vld [vmem:[%s3920_s30 + $0x68] sm:$0xff]  ;;  %v3993_v28 = vld [vmem:[%s3920_s30 + $0x70] sm:$0xff] }
  0x16   : > { %v428_v26 = vsel %vm391_vm0, %v3983_v24, 0.0  ;;  %v431_v27 = vsel %vm391_vm0, %v3986_v25, 0.0  ;;  %v3996_v29 = vld [vmem:[%s3920_s30 + $0x78] sm:$0xff]  ;;  %v434_v30 = vsel %vm391_vm0, %v3993_v28, 0.0  ;;  %v4003_v32 = vld [vmem:[%s3920_s30 + $0x80] sm:$0xff]  ;;  %v4006_v33 = vld [vmem:[%s3920_s30 + $0x88] sm:$0xff] }
  0x17   : > { %396 = vadd.xlane.f32.xlu0 %v395_v6  ;;  %402 = vadd.xlane.f32.xlu1 %v401_v7  ;;  %v437_v31 = vsel %vm391_vm0, %v3996_v29, 0.0  ;;  %v440_v34 = vsel %vm391_vm0, %v4003_v32, 0.0  ;;  %v443_v35 = vsel %vm391_vm0, %v4006_v33, 0.0  ;;  %v4013_v36 = vld [vmem:[%s3920_s30 + $0x90] sm:$0xff]  ;;  %v4016_v37 = vld [vmem:[%s3920_s30 + $0x98] sm:$0xff]  ;;  %v4031_v51 = vld [vmem:[%s3920_s30 + $0xa0] sm:$0xff] }
  0x18   : > { %v446_v38 = vsel %vm391_vm0, %v4013_v36, 0.0  ;;  %v449_v39 = vsel %vm391_vm0, %v4016_v37, 0.0  ;;  %v452_v54 = vsel %vm391_vm0, %v4031_v51, 0.0  ;;  %v4047_v59 = vld [vmem:[%s3920_s30 + $0xa8] sm:$0xff]  ;;  %v4057_v3 = vld [vmem:[%s3920_s30 + $0xb0] sm:$0xff] }
  0x19   : > { %v455_v63 = vsel %vm391_vm0, %v4047_v59, 0.0  ;;  %v458_v6 = vsel %vm391_vm0, %v4057_v3, 0.0 }
  0x1b   : > { %405 = vadd.xlane.f32.xlu0 %v404_v12  ;;  %408 = vadd.xlane.f32.xlu1 %v407_v13 }
  0x1f   : > { %411 = vadd.xlane.f32.xlu0 %v410_v14  ;;  %414 = vadd.xlane.f32.xlu1 %v413_v15 }
  0x23   : > { %417 = vadd.xlane.f32.xlu0 %v416_v18  ;;  %420 = vadd.xlane.f32.xlu1 %v419_v19 }
  0x27   : > { %423 = vadd.xlane.f32.xlu0 %v422_v22  ;;  %426 = vadd.xlane.f32.xlu1 %v425_v23 }
  0x2b   : > { %429 = vadd.xlane.f32.xlu0 %v428_v26  ;;  %432 = vadd.xlane.f32.xlu1 %v431_v27  ;;  %v4081_v26 = vld [vmem:[%s3920_s30 + $0xc0] sm:$0xff] }
  0x2f   : > { %435 = vadd.xlane.f32.xlu0 %v434_v30  ;;  %438 = vadd.xlane.f32.xlu1 %v437_v31  ;;  %v464_v30 = vsel %vm391_vm0, %v4081_v26, 0.0 }
  0x33   : > { %441 = vadd.xlane.f32.xlu0 %v440_v34  ;;  %444 = vadd.xlane.f32.xlu1 %v443_v35 }
  0x37   : > { %447 = vadd.xlane.f32.xlu0 %v446_v38  ;;  %450 = vadd.xlane.f32.xlu1 %v449_v39 }
  0x9c   : > { %v394_v40 = vpop.xlane.xlu0 %393  ;;  %v400_v41 = vpop.xlane.xlu1 %399 }
  0x9d   : > { %v585_v42 = vmul.f32 0.03125, %v394_v40  ;;  %v587_v43 = vmul.f32 0.03125, %v400_v41 }
  0x9f   : > { %v4023_v44 = vsub.f32 %v3923_v0, %v585_v42  ;;  %v4026_v48 = vsub.f32 %v3929_v2, %v587_v43 }
  0xa0   : > { %v397_v45 = vpop.xlane.xlu0 %396  ;;  %v403_v46 = vpop.xlane.xlu1 %402 }
  0xa1   : > { %v586_v47 = vmul.f32 0.03125, %v397_v45  ;;  %v713_v49 = vmul.f32 %v4023_v44, %v4023_v44  ;;  %v588_v50 = vmul.f32 0.03125, %v403_v46  ;;  %v715_v58 = vmul.f32 %v4026_v48, %v4026_v48  ;;  %v4103_v45 = vld [vmem:[%s3920_s30 + $0xd0] sm:$0xff] }
  0xa3   : > { %v4034_v52 = vsub.f32 %v3926_v1, %v586_v47  ;;  %v777_v53 = vsel %vm391_vm0, %v713_v49, 0.0  ;;  %v4040_v56 = vsub.f32 %v3936_v5, %v588_v50  ;;  %v783_v0 = vsel %vm391_vm0, %v715_v58, 0.0  ;;  %v3706_v58 = vld [vmem:[%s5970_s3 + $0x10] ss:$8 sps:$4 sm:$0xff]  }
  0xa4   : > { %778 = vadd.xlane.f32.xlu0 %v777_v53  ;;  %v406_v55 = vpop.xlane.xlu0 %405  ;;  %v409_v61 = vpop.xlane.xlu1 %408  ;;  %v470_v47 = vsel %vm391_vm0, %v4103_v45, 0.0 }
  0xa5   : > { %v714_v57 = vmul.f32 %v4034_v52, %v4034_v52  ;;  %v589_v60 = vmul.f32 0.03125, %v406_v55  ;;  %v590_v2 = vmul.f32 0.03125, %v409_v61  ;;  %v716_v4 = vmul.f32 %v4040_v56, %v4040_v56 }
  0xa7   : > { %v780_v62 = vsel %vm391_vm0, %v714_v57, 0.0  ;;  %v4054_v1 = vsub.f32 %v3943_v8, %v589_v60  ;;  %v4064_v7 = vsub.f32 %v3946_v9, %v590_v2  ;;  %v786_v12 = vsel %vm391_vm0, %v716_v4, 0.0  ;;  %v4068_v8 = vld [vmem:[%s3920_s30 + $0xb8] sm:$0xff]  ;;  %v3707_v4 = vld [vmem:[%s5970_s3 + $0x4] ss:$8 sps:$4 sm:$0xff]  }
  0xa8   : > { %453 = vadd.xlane.f32.xlu0 %v452_v54  ;;  %781 = vadd.xlane.f32.xlu1 %v780_v62  ;;  %v412_v5 = vpop.xlane.xlu0 %411  ;;  %v415_v15 = vpop.xlane.xlu1 %414  ;;  %v461_v18 = vsel %vm391_vm0, %v4068_v8, 0.0  ;;  %v3704_v57 = vld [vmem:[%s5970_s3 + $0x14] ss:$8 sps:$4 sm:$0xff]  }
  0xa9   : > { %v717_v13 = vmul.f32 %v4054_v1, %v4054_v1  ;;  %v591_v14 = vmul.f32 0.03125, %v412_v5  ;;  %v592_v22 = vmul.f32 0.03125, %v415_v15  ;;  %v718_v23 = vmul.f32 %v4064_v7, %v4064_v7  ;;  %1401 = vmatprep.subr.bf16.mxu0 %v3704_v57  ;;  %v3709_v5 = vld [vmem:[%s5970_s3] ss:$8 sps:$4 sm:$0xff]  }
  0xaa   : > { %1402 = vmatpush1.bf16.msra.mxu0 %v3706_v58 }
  0xab   : > { %v789_v19 = vsel %vm391_vm0, %v717_v13, 0.0  ;;  %v4076_v9 = vsub.f32 %v3949_v10, %v591_v14  ;;  %v4086_v31 = vsub.f32 %v3952_v11, %v592_v22  ;;  %v792_v34 = vsel %vm391_vm0, %v718_v23, 0.0  ;;  %v4090_v10 = vld [vmem:[%s3920_s30 + $0xc8] sm:$0xff]  ;;  %1403 = vmatprep.subr.bf16.mxu0 %v3707_v4 }
  0xac   : > { %784 = vadd.xlane.f32.xlu0 %v783_v0  ;;  %456 = vadd.xlane.f32.xlu1 %v455_v63  ;;  %v418_v27 = vpop.xlane.xlu0 %417  ;;  %v421_v39 = vpop.xlane.xlu1 %420  ;;  %v467_v40 = vsel %vm391_vm0, %v4090_v10, 0.0  ;;  %v4131_v0 = vld [vmem:[%s3920_s30 + $0xe0] sm:$0xff]  ;;  %v4146_v13 = vld [vmem:[%s3920_s30 + $0xe8] sm:$0xff] }
  0xad   : > { %v719_v35 = vmul.f32 %v4076_v9, %v4076_v9  ;;  %v593_v38 = vmul.f32 0.03125, %v418_v27  ;;  %v594_v42 = vmul.f32 0.03125, %v421_v39  ;;  %v720_v43 = vmul.f32 %v4086_v31, %v4086_v31 }
  0xae   : > { %1404 = vmatpush1.bf16.msra.mxu0 %v3709_v5 }
  0xaf   : > { %v795_v41 = vsel %vm391_vm0, %v719_v35, 0.0  ;;  %v4098_v11 = vsub.f32 %v3963_v16, %v593_v38  ;;  %v4108_v49 = vsub.f32 %v3966_v17, %v594_v42  ;;  %v798_v50 = vsel %vm391_vm0, %v720_v43, 0.0  ;;  %v4112_v16 = vld [vmem:[%s3920_s30 + $0xd8] sm:$0xff] }
  0xb0   : > { %459 = vadd.xlane.f32.xlu0 %v458_v6  ;;  %787 = vadd.xlane.f32.xlu1 %v786_v12  ;;  %v424_v46 = vpop.xlane.xlu0 %423  ;;  %v427_v55 = vpop.xlane.xlu1 %426  ;;  %v473_v17 = vsel %vm391_vm0, %v4112_v16, 0.0 }
  0xb1   : > { %v721_v53 = vmul.f32 %v4098_v11, %v4098_v11  ;;  %v595_v54 = vmul.f32 0.03125, %v424_v46  ;;  %v596_v62 = vmul.f32 0.03125, %v427_v55  ;;  %v722_v63 = vmul.f32 %v4108_v49, %v4108_v49 }
  0xb3   : > { %v801_v60 = vsel %vm391_vm0, %v721_v53, 0.0  ;;  %v4126_v61 = vsub.f32 %v3973_v20, %v595_v54  ;;  %v476_v20 = vsel %vm391_vm0, %v4131_v0, 0.0  ;;  %v4142_v6 = vsub.f32 %v3976_v21, %v596_v62  ;;  %v4184_v54 = vld [vmem:[%s3920_s30 + $0x100] sm:$0xff] }
  0xb4   : > { %462 = vadd.xlane.f32.xlu1 %v461_v18  ;;  %790 = vadd.xlane.f32.xlu0 %v789_v19  ;;  %v430_v2 = vpop.xlane.xlu0 %429  ;;  %v804_v12 = vsel %vm391_vm0, %v722_v63, 0.0  ;;  %v433_v18 = vpop.xlane.xlu1 %432  ;;  %v3863_v19 = vmov 0   ;;  %v479_v21 = vsel %vm391_vm0, %v4146_v13, 0.0  ;;  %v488_v57 = vsel %vm391_vm0, %v4184_v54, 0.0 }
  0xb5   : > { %v723_v14 = vmul.f32 %v4126_v61, %v4126_v61  ;;  %v597_v15 = vmul.f32 0.03125, %v430_v2  ;;  %1421 = vmatprep.mubr.bf16.mxu0 %v3863_v19  ;;  %3661 = vmatprep.subr.bf16.mxu1 %v3863_v19  ;;  %v598_v27 = vmul.f32 0.03125, %v433_v18 }
  0xb6   : > { %2325 = vmatprep.subr.bf16.mxu0 %v3863_v19 }
  0xb7   : > { %v807_v22 = vsel %vm391_vm0, %v723_v14, 0.0  ;;  %v4156_v23 = vsub.f32 %v3983_v24, %v597_v15  ;;  %v4167_v39 = vsub.f32 %v3986_v25, %v598_v27 }
  0xb8   : > { %793 = vadd.xlane.f32.xlu1 %v792_v34  ;;  %465 = vadd.xlane.f32.xlu0 %v464_v30  ;;  %v724_v30 = vmul.f32 %v4142_v6, %v4142_v6  ;;  %v4161_v34 = vld [vmem:[%s3920_s30 + $0xf0] sm:$0xff]  ;;  %v436_v35 = vpop.xlane.xlu0 %435  ;;  %v439_v43 = vpop.xlane.xlu1 %438 }
  0xb9   : > { %v482_v38 = vsel %vm391_vm0, %v4161_v34, 0.0  ;;  %v599_v42 = vmul.f32 0.03125, %v436_v35  ;;  %v726_v53 = vmul.f32 %v4167_v39, %v4167_v39 }
  0xba   : > { %v810_v24 = vsel %vm391_vm0, %v724_v30, 0.0 }
  0xbb   : > { %v4179_v25 = vsub.f32 %v3993_v28, %v599_v42  ;;  %v4193_v28 = vld [vmem:[%s3920_s30 + $0x108] sm:$0xff]  ;;  %v4228_v42 = vld [vmem:[%s3920_s30 + $0x120] sm:$0xff] }
  0xbc   : > { %468 = vadd.xlane.f32.xlu1 %v467_v40  ;;  %796 = vadd.xlane.f32.xlu0 %v795_v41  ;;  %v4171_v40 = vld [vmem:[%s3920_s30 + $0xf8] sm:$0xff]  ;;  %v725_v41 = vmul.f32 %v4156_v23, %v4156_v23  ;;  %v442_v55 = vpop.xlane.xlu0 %441  ;;  %v445_v63 = vpop.xlane.xlu1 %444  ;;  %v491_v2 = vsel %vm391_vm0, %v4193_v28, 0.0 }
  0xbd   : > { %v485_v46 = vsel %vm391_vm0, %v4171_v40, 0.0  ;;  %v601_v62 = vmul.f32 0.03125, %v442_v55  ;;  %v602_v5 = vmul.f32 0.03125, %v445_v63 }
  0xbf   : > { %v4211_v18 = vsub.f32 %v4006_v33, %v602_v5 }
  0xc0   : > { %799 = vadd.xlane.f32.xlu1 %v798_v50  ;;  %471 = vadd.xlane.f32.xlu0 %v470_v47  ;;  %v813_v47 = vsel %vm391_vm0, %v725_v41, 0.0  ;;  %v600_v50 = vmul.f32 0.03125, %v439_v43  ;;  %v448_v14 = vpop.xlane.xlu0 %447  ;;  %v451_v30 = vpop.xlane.xlu1 %450 }
  0xc1   : > { %v603_v27 = vmul.f32 0.03125, %v448_v14  ;;  %v730_v41 = vmul.f32 %v4211_v18, %v4211_v18 }
  0xc2   : > { %v4189_v58 = vsub.f32 %v3996_v29, %v600_v50  ;;  %v4201_v29 = vsub.f32 %v4003_v32, %v601_v62  ;;  %v4215_v32 = vld [vmem:[%s3920_s30 + $0x118] sm:$0xff]  ;;  %v4239_v50 = vld [vmem:[%s3920_s30 + $0x128] sm:$0xff] }
  0xc3   : > { %v497_v35 = vsel %vm391_vm0, %v4215_v32, 0.0  ;;  %v4223_v33 = vsub.f32 %v4013_v36, %v603_v27  ;;  %v4253_v62 = vld [vmem:[%s3920_s30 + $0x138] sm:$0xff] }
  0xc4   : > { %474 = vadd.xlane.f32.xlu1 %v473_v17  ;;  %802 = vadd.xlane.f32.xlu0 %v801_v60  ;;  %v816_v17 = vsel %vm391_vm0, %v726_v53, 0.0  ;;  %v727_v60 = vmul.f32 %v4179_v25, %v4179_v25  ;;  %v503_v53 = vsel %vm391_vm0, %v4239_v50, 0.0  ;;  %v509_v63 = vsel %vm391_vm0, %v4253_v62, 0.0 }
  0xc5   : > { %v731_v36 = vmul.f32 %v4223_v33, %v4223_v33 }
  0xc6   : > { %v819_v4 = vsel %vm391_vm0, %v727_v60, 0.0 }
  0xc7   : > { %v831_v55 = vsel %vm391_vm0, %v731_v36, 0.0 }
  0xc8   : > { %805 = vadd.xlane.f32.xlu1 %v804_v12  ;;  %477 = vadd.xlane.f32.xlu0 %v476_v20  ;;  %v728_v20 = vmul.f32 %v4189_v58, %v4189_v58  ;;  %v4206_v12 = vld [vmem:[%s3920_s30 + $0x110] sm:$0xff] }
  0xc9   : > { %v494_v15 = vsel %vm391_vm0, %v4206_v12, 0.0 }
  0xcc   : > { %480 = vadd.xlane.f32.xlu1 %v479_v21  ;;  %808 = vadd.xlane.f32.xlu0 %v807_v22  ;;  %v822_v21 = vsel %vm391_vm0, %v728_v20, 0.0  ;;  %v729_v22 = vmul.f32 %v4201_v29, %v4201_v29 }
  0xd0   : > { %811 = vadd.xlane.f32.xlu1 %v810_v24  ;;  %483 = vadd.xlane.f32.xlu0 %v482_v38  ;;  %v825_v38 = vsel %vm391_vm0, %v729_v22, 0.0  ;;  %v604_v24 = vmul.f32 0.03125, %v451_v30 }
  0xd2   : > { %v4231_v43 = vsub.f32 %v4016_v37, %v604_v24 }
  0xd4   : > { %486 = vadd.xlane.f32.xlu1 %v485_v46  ;;  %814 = vadd.xlane.f32.xlu0 %v813_v47  ;;  %v828_v46 = vsel %vm391_vm0, %v730_v41, 0.0  ;;  %v500_v47 = vsel %vm391_vm0, %v4228_v42, 0.0  ;;  %v732_v37 = vmul.f32 %v4231_v43, %v4231_v43 }
  0xd8   : > { %817 = vadd.xlane.f32.xlu1 %v816_v17  ;;  %489 = vadd.xlane.f32.xlu0 %v488_v57  ;;  %v4247_v57 = vld [vmem:[%s3920_s30 + $0x130] sm:$0xff]  ;;  %v834_v17 = vsel %vm391_vm0, %v732_v37, 0.0 }
  0xd9   : > { %v506_v60 = vsel %vm391_vm0, %v4247_v57, 0.0 }
  0xdc   : > { %492 = vadd.xlane.f32.xlu1 %v491_v2  ;;  %820 = vadd.xlane.f32.xlu0 %v819_v4 }
  0xe0   : > { %823 = vadd.xlane.f32.xlu1 %v822_v21  ;;  %495 = vadd.xlane.f32.xlu0 %v494_v15 }
  0xe4   : > { %498 = vadd.xlane.f32.xlu1 %v497_v35  ;;  %826 = vadd.xlane.f32.xlu0 %v825_v38 }
  0xe8   : > { %829 = vadd.xlane.f32.xlu1 %v828_v46  ;;  %501 = vadd.xlane.f32.xlu0 %v500_v47  ;;  %v4263_v46 = vld [vmem:[%s3920_s30 + $0x140] sm:$0xff] }
  0xec   : > { %504 = vadd.xlane.f32.xlu1 %v503_v53  ;;  %832 = vadd.xlane.f32.xlu0 %v831_v55 }
  0xf0   : > { %835 = vadd.xlane.f32.xlu1 %v834_v17  ;;  %507 = vadd.xlane.f32.xlu0 %v506_v60 }
  0xf4   : > { %510 = vadd.xlane.f32.xlu1 %v509_v63  ;;  %v512_v63 = vsel %vm391_vm0, %v4263_v46, 0.0 }
 0x12d   : > { %v779_v2 = vpop.xlane.xlu0 %778 }
 0x12e   : > { %v969_v4 = vmul.f32 0.03125, %v779_v2  ;;  %v4274_v2 = vld [vmem:[%s3920_s30 + $0x148] sm:$0xff] }
 0x130   : > { %v1033_v5 = vadd.f32 1e-05, %v969_v4 }
 0x131   : > { %v782_v20 = vpop.xlane.xlu1 %781  ;;  %v454_v14 = vpop.xlane.xlu0 %453 }
 0x132   : > { %v970_v15 = vmul.f32 0.03125, %v782_v20  ;;  %v605_v21 = vmul.f32 0.03125, %v454_v14  ;;  %3726 = vrsqrt.f32 %v1033_v5 }
 0x134   : > { %v1034_v22 = vadd.f32 1e-05, %v970_v15  ;;  %v4258_v27 = vsub.f32 %v4031_v51, %v605_v21  ;;  %v515_v15 = vsel %vm391_vm0, %v4274_v2, 0.0 }
 0x135   : > { %v457_v30 = vpop.xlane.xlu1 %456  ;;  %v785_v35 = vpop.xlane.xlu0 %784 }
 0x136   : > { %3728 = vrsqrt.f32 %v1034_v22  ;;  %v606_v38 = vmul.f32 0.03125, %v457_v30  ;;  %v971_v24 = vmul.f32 0.03125, %v785_v35  ;;  %v733_v41 = vmul.f32 %v4258_v27, %v4258_v27  ;;  %v4285_v35 = vld [vmem:[%s3920_s30 + $0x150] sm:$0xff] }
 0x138   : > { %v4266_v47 = vsub.f32 %v4047_v59, %v606_v38  ;;  %v1035_v36 = vadd.f32 1e-05, %v971_v24  ;;  %v837_v53 = vsel %vm391_vm0, %v733_v41, 0.0 }
 0x139   : > { %v788_v55 = vpop.xlane.xlu1 %787  ;;  %838 = vadd.xlane.f32.xlu0 %v837_v53  ;;  %v460_v51 = vpop.xlane.xlu0 %459 }
 0x13a   : > { %v972_v37 = vmul.f32 0.03125, %v788_v55  ;;  %v607_v17 = vmul.f32 0.03125, %v460_v51  ;;  %v734_v60 = vmul.f32 %v4266_v47, %v4266_v47  ;;  %3730 = vrsqrt.f32 %v1035_v36 }
 0x13c   : > { %v1036_v59 = vadd.f32 1e-05, %v972_v37  ;;  %v4277_v4 = vsub.f32 %v4057_v3, %v607_v17  ;;  %v840_v5 = vsel %vm391_vm0, %v734_v60, 0.0  ;;  %v518_v17 = vsel %vm391_vm0, %v4285_v35, 0.0  ;;  %v4296_v60 = vld [vmem:[%s3920_s30 + $0x158] sm:$0xff] }
 0x13d   : > { %841 = vadd.xlane.f32.xlu1 %v840_v5  ;;  %v463_v20 = vpop.xlane.xlu1 %462  ;;  %513 = vadd.xlane.f32.xlu0 %v512_v63  ;;  %v791_v14 = vpop.xlane.xlu0 %790 }
 0x13e   : > { %3732 = vrsqrt.f32 %v1036_v59  ;;  %v608_v21 = vmul.f32 0.03125, %v463_v20  ;;  %v973_v22 = vmul.f32 0.03125, %v791_v14  ;;  %v735_v30 = vmul.f32 %v4277_v4, %v4277_v4 }
 0x13f   : > { %v3727_v3 = vpop.eup %3726 }
 0x140   : > { %v4288_v38 = vsub.f32 %v4068_v8, %v608_v21  ;;  %v1037_v24 = vadd.f32 1e-05, %v973_v22  ;;  %v843_v41 = vsel %vm391_vm0, %v735_v30, 0.0  ;;  %v1161_v8 = vmul.f32 %v3727_v3, %v4023_v44 }
 0x141   : > { %516 = vadd.xlane.f32.xlu1 %v515_v15  ;;  %v794_v36 = vpop.xlane.xlu1 %793  ;;  %844 = vadd.xlane.f32.xlu0 %v843_v41  ;;  %v466_v53 = vpop.xlane.xlu0 %465  ;;  %v521_v22 = vsel %vm391_vm0, %v4296_v60, 0.0 }
 0x142   : > { %v974_v55 = vmul.f32 0.03125, %v794_v36  ;;  %v609_v51 = vmul.f32 0.03125, %v466_v53  ;;  %v736_v37 = vmul.f32 %v4288_v38, %v4288_v38  ;;  %3734 = vrsqrt.f32 %v1037_v24  ;;  %v4313_v36 = vld [vmem:[%s3920_s30 + $0x160] sm:$0xff] }
 0x143   : > { %v3729_v63 = vpop.eup %3728 }
 0x144   : > { %v1038_v59 = vadd.f32 1e-05, %v974_v55  ;;  %v4300_v5 = vsub.f32 %v4081_v26, %v609_v51  ;;  %v846_v20 = vsel %vm391_vm0, %v736_v37, 0.0  ;;  %v1162_v14 = vmul.f32 %v3729_v63, %v4034_v52 }
 0x145   : > { %847 = vadd.xlane.f32.xlu1 %v846_v20  ;;  %v469_v15 = vpop.xlane.xlu1 %468  ;;  %519 = vadd.xlane.f32.xlu0 %v518_v17  ;;  %v797_v21 = vpop.xlane.xlu0 %796 }
 0x146   : > { %3736 = vrsqrt.f32 %v1038_v59  ;;  %v610_v30 = vmul.f32 0.03125, %v469_v15  ;;  %v975_v24 = vmul.f32 0.03125, %v797_v21  ;;  %v1225_v44 = vpack.c.bf16 %v1162_v14, %v1161_v8 }
 0x147   : > { %v737_v26 = vmul.f32 %v4300_v5, %v4300_v5  ;;  %v3731_v3 = vpop.eup %3730  ;;  %v524_v59 = vsel %vm391_vm0, %v4313_v36, 0.0 }
 0x148   : > { %v4309_v41 = vsub.f32 %v4090_v10, %v610_v30  ;;  %v1039_v52 = vadd.f32 1e-05, %v975_v24  ;;  %3610 = vmatmul.mubr.msk.bf16.vlgmr.msra.gmra.mxu0 %vm391_vm0, %v1225_v44  ;;  %v4320_v10 = vld [vmem:[%s3920_s30 + $0x168] sm:$0xff]  ;;  %v1163_v20 = vmul.f32 %v3731_v3, %v4026_v48 }
 0x149   : > { %522 = vadd.xlane.f32.xlu1 %v521_v22  ;;  %v800_v53 = vpop.xlane.xlu1 %799  ;;  %v849_v55 = vsel %vm391_vm0, %v737_v26, 0.0  ;;  %v472_v51 = vpop.xlane.xlu0 %471  ;;  %1431 = vmatprep.mubr.bf16.mxu0 %v3863_v19  ;;  %v527_v44 = vsel %vm391_vm0, %v4320_v10, 0.0 }
 0x14a   : > { %v976_v37 = vmul.f32 0.03125, %v800_v53  ;;  %850 = vadd.xlane.f32.xlu0 %v849_v55  ;;  %v611_v17 = vmul.f32 0.03125, %v472_v51  ;;  %v738_v63 = vmul.f32 %v4309_v41, %v4309_v41  ;;  %3738 = vrsqrt.f32 %v1039_v52  ;;  %v4339_v55 = vld [vmem:[%s3920_s30 + $0x170] sm:$0xff] }
 0x14b   : > { %v3733_v8 = vpop.eup %3732 }
 0x14c   : > { %v1040_v14 = vadd.f32 1e-05, %v976_v37  ;;  %v4326_v15 = vsub.f32 %v4103_v45, %v611_v17  ;;  %v852_v21 = vsel %vm391_vm0, %v738_v63, 0.0  ;;  %v1164_v22 = vmul.f32 %v3733_v8, %v4040_v56 }
 0x14d   : > { %853 = vadd.xlane.f32.xlu1 %v852_v21  ;;  %v475_v30 = vpop.xlane.xlu1 %474  ;;  %v803_v24 = vpop.xlane.xlu0 %802 }
 0x14e   : > { %3740 = vrsqrt.f32 %v1040_v14  ;;  %v612_v26 = vmul.f32 0.03125, %v475_v30  ;;  %525 = vadd.xlane.f32.xlu0 %v524_v59  ;;  %v977_v52 = vmul.f32 0.03125, %v803_v24  ;;  %v1226_v48 = vpack.c.bf16 %v1164_v22, %v1163_v20 }
 0x14f   : > { %v739_v45 = vmul.f32 %v4326_v15, %v4326_v15  ;;  %v3735_v3 = vpop.eup %3734  ;;  %v530_v14 = vsel %vm391_vm0, %v4339_v55, 0.0 }
 0x150   : > { %v4335_v53 = vsub.f32 %v4112_v16, %v612_v26  ;;  %v1041_v56 = vadd.f32 1e-05, %v977_v52  ;;  %3611 = vmatmul.mubr.msk.bf16.gmra.mxu0 %vm391_vm0, %v1226_v48  ;;  %v4346_v16 = vld [vmem:[%s3920_s30 + $0x178] sm:$0xff]  ;;  %v1165_v21 = vmul.f32 %v3735_v3, %v4054_v1 }
 0x151   : > { %528 = vadd.xlane.f32.xlu1 %v527_v44  ;;  %v806_v51 = vpop.xlane.xlu1 %805  ;;  %v855_v37 = vsel %vm391_vm0, %v739_v45, 0.0  ;;  %v478_v17 = vpop.xlane.xlu0 %477  ;;  %1441 = vmatprep.mubr.bf16.mxu0 %v3863_v19  ;;  %v533_v48 = vsel %vm391_vm0, %v4346_v16, 0.0 }
 0x152   : > { %v978_v63 = vmul.f32 0.03125, %v806_v51  ;;  %856 = vadd.xlane.f32.xlu0 %v855_v37  ;;  %v613_v8 = vmul.f32 0.03125, %v478_v17  ;;  %v740_v59 = vmul.f32 %v4335_v53, %v4335_v53  ;;  %3742 = vrsqrt.f32 %v1041_v56  ;;  %v4365_v37 = vld [vmem:[%s3920_s30 + $0x180] sm:$0xff] }
 0x153   : > { %v3737_v20 = vpop.eup %3736 }
 0x154   : > { %v1042_v22 = vadd.f32 1e-05, %v978_v63  ;;  %v4352_v30 = vsub.f32 %v4131_v0, %v613_v8  ;;  %v858_v24 = vsel %vm391_vm0, %v740_v59, 0.0  ;;  %v1166_v44 = vmul.f32 %v3737_v20, %v4064_v7 }
 0x155   : > { %859 = vadd.xlane.f32.xlu1 %v858_v24  ;;  %v481_v26 = vpop.xlane.xlu1 %480  ;;  %v809_v52 = vpop.xlane.xlu0 %808 }
 0x156   : > { %3744 = vrsqrt.f32 %v1042_v22  ;;  %v614_v45 = vmul.f32 0.03125, %v481_v26  ;;  %531 = vadd.xlane.f32.xlu0 %v530_v14  ;;  %v979_v56 = vmul.f32 0.03125, %v809_v52  ;;  %v1227_v1 = vpack.c.bf16 %v1166_v44, %v1165_v21 }
 0x157   : > { %v741_v0 = vmul.f32 %v4352_v30, %v4352_v30  ;;  %v3739_v3 = vpop.eup %3738  ;;  %v536_v22 = vsel %vm391_vm0, %v4365_v37, 0.0 }
 0x158   : > { %v4361_v51 = vsub.f32 %v4146_v13, %v614_v45  ;;  %v1043_v7 = vadd.f32 1e-05, %v979_v56  ;;  %3612 = vmatmul.mubr.msk.bf16.gmra.mxu0 %vm391_vm0, %v1227_v1  ;;  %v4372_v13 = vld [vmem:[%s3920_s30 + $0x188] sm:$0xff]  ;;  %v1167_v24 = vmul.f32 %v3739_v3, %v4076_v9 }
 0x159   : > { %534 = vadd.xlane.f32.xlu1 %v533_v48  ;;  %v812_v17 = vpop.xlane.xlu1 %811  ;;  %v861_v63 = vsel %vm391_vm0, %v741_v0, 0.0  ;;  %v484_v8 = vpop.xlane.xlu0 %483  ;;  %1451 = vmatprep.mubr.bf16.mxu0 %v3863_v19  ;;  %v539_v1 = vsel %vm391_vm0, %v4372_v13, 0.0 }
 0x15a   : > { %v980_v59 = vmul.f32 0.03125, %v812_v17  ;;  %862 = vadd.xlane.f32.xlu0 %v861_v63  ;;  %v615_v20 = vmul.f32 0.03125, %v484_v8  ;;  %v742_v14 = vmul.f32 %v4361_v51, %v4361_v51  ;;  %3746 = vrsqrt.f32 %v1043_v7  ;;  %v4391_v63 = vld [vmem:[%s3920_s30 + $0x190] sm:$0xff] }
 0x15b   : > { %v3741_v21 = vpop.eup %3740 }
 0x15c   : > { %v1044_v44 = vadd.f32 1e-05, %v980_v59  ;;  %v4378_v26 = vsub.f32 %v4161_v34, %v615_v20  ;;  %v864_v52 = vsel %vm391_vm0, %v742_v14, 0.0  ;;  %v1168_v48 = vmul.f32 %v3741_v21, %v4086_v31 }
 0x15d   : > { %865 = vadd.xlane.f32.xlu1 %v864_v52  ;;  %v487_v45 = vpop.xlane.xlu1 %486  ;;  %v815_v56 = vpop.xlane.xlu0 %814 }
 0x15e   : > { %3748 = vrsqrt.f32 %v1044_v44  ;;  %v616_v0 = vmul.f32 0.03125, %v487_v45  ;;  %537 = vadd.xlane.f32.xlu0 %v536_v22  ;;  %v981_v7 = vmul.f32 0.03125, %v815_v56  ;;  %v1228_v9 = vpack.c.bf16 %v1168_v48, %v1167_v24 }
 0x15f   : > { %v743_v34 = vmul.f32 %v4378_v26, %v4378_v26  ;;  %v3743_v3 = vpop.eup %3742  ;;  %v542_v44 = vsel %vm391_vm0, %v4391_v63, 0.0 }
 0x160   : > { %v4387_v17 = vsub.f32 %v4171_v40, %v616_v0  ;;  %v1045_v31 = vadd.f32 1e-05, %v981_v7  ;;  %3613 = vmatmul.mubr.msk.bf16.gmra.mxu0 %vm391_vm0, %v1228_v9  ;;  %v4398_v40 = vld [vmem:[%s3920_s30 + $0x198] sm:$0xff]  ;;  %v1169_v52 = vmul.f32 %v3743_v3, %v4098_v11 }
 0x161   : > { %540 = vadd.xlane.f32.xlu1 %v539_v1  ;;  %v818_v8 = vpop.xlane.xlu1 %817  ;;  %v867_v59 = vsel %vm391_vm0, %v743_v34, 0.0  ;;  %v490_v20 = vpop.xlane.xlu0 %489  ;;  %1461 = vmatprep.mubr.bf16.mxu0 %v3863_v19  ;;  %v545_v9 = vsel %vm391_vm0, %v4398_v40, 0.0 }
 0x162   : > { %v982_v14 = vmul.f32 0.03125, %v818_v8  ;;  %868 = vadd.xlane.f32.xlu0 %v867_v59  ;;  %v617_v21 = vmul.f32 0.03125, %v490_v20  ;;  %v744_v22 = vmul.f32 %v4387_v17, %v4387_v17  ;;  %3750 = vrsqrt.f32 %v1045_v31  ;;  %v4417_v59 = vld [vmem:[%s3920_s30 + $0x1a0] sm:$0xff] }
 0x163   : > { %v3745_v24 = vpop.eup %3744 }
 0x164   : > { %v1046_v48 = vadd.f32 1e-05, %v982_v14  ;;  %v4404_v45 = vsub.f32 %v4184_v54, %v617_v21  ;;  %v870_v56 = vsel %vm391_vm0, %v744_v22, 0.0  ;;  %v1170_v1 = vmul.f32 %v3745_v24, %v4108_v49 }
 0x165   : > { %871 = vadd.xlane.f32.xlu1 %v870_v56  ;;  %v493_v0 = vpop.xlane.xlu1 %492  ;;  %v821_v7 = vpop.xlane.xlu0 %820 }
 0x166   : > { %3752 = vrsqrt.f32 %v1046_v48  ;;  %v618_v34 = vmul.f32 0.03125, %v493_v0  ;;  %543 = vadd.xlane.f32.xlu0 %v542_v44  ;;  %v983_v31 = vmul.f32 0.03125, %v821_v7  ;;  %v1229_v11 = vpack.c.bf16 %v1170_v1, %v1169_v52 }
 0x167   : > { %v745_v54 = vmul.f32 %v4404_v45, %v4404_v45  ;;  %v3747_v3 = vpop.eup %3746  ;;  %v548_v48 = vsel %vm391_vm0, %v4417_v59, 0.0 }
 0x168   : > { %v4413_v8 = vsub.f32 %v4193_v28, %v618_v34  ;;  %v1047_v49 = vadd.f32 1e-05, %v983_v31  ;;  %3614 = vmatmul.mubr.msk.bf16.gmra.mxu0 %vm391_vm0, %v1229_v11  ;;  %v4424_v28 = vld [vmem:[%s3920_s30 + $0x1a8] sm:$0xff]  ;;  %v1171_v56 = vmul.f32 %v3747_v3, %v4126_v61 }
 0x169   : > { %546 = vadd.xlane.f32.xlu1 %v545_v9  ;;  %v824_v20 = vpop.xlane.xlu1 %823  ;;  %v873_v14 = vsel %vm391_vm0, %v745_v54, 0.0  ;;  %v496_v21 = vpop.xlane.xlu0 %495  ;;  %1471 = vmatprep.mubr.bf16.mxu0 %v3863_v19  ;;  %v551_v11 = vsel %vm391_vm0, %v4424_v28, 0.0 }
 0x16a   : > { %v984_v22 = vmul.f32 0.03125, %v824_v20  ;;  %874 = vadd.xlane.f32.xlu0 %v873_v14  ;;  %v619_v24 = vmul.f32 0.03125, %v496_v21  ;;  %v746_v44 = vmul.f32 %v4413_v8, %v4413_v8  ;;  %3754 = vrsqrt.f32 %v1047_v49  ;;  %v4446_v21 = vld [vmem:[%s3920_s30 + $0x1b0] sm:$0xff] }
 0x16b   : > { %v3749_v52 = vpop.eup %3748 }
 0x16c   : > { %v1048_v1 = vadd.f32 1e-05, %v984_v22  ;;  %v4430_v0 = vsub.f32 %v4206_v12, %v619_v24  ;;  %v876_v7 = vsel %vm391_vm0, %v746_v44, 0.0  ;;  %v1172_v9 = vmul.f32 %v3749_v52, %v4142_v6  ;;  %v3710_v6 = vld [vmem:[%s5972_s5 + $0x38] sm:$0xff]  }
 0x16d   : > { %877 = vadd.xlane.f32.xlu1 %v876_v7  ;;  %v499_v34 = vpop.xlane.xlu1 %498  ;;  %v827_v31 = vpop.xlane.xlu0 %826  ;;  %3677 = vmatpush1.bf16.msra.mxu1 %v3710_v6  ;;  %v554_v7 = vsel %vm391_vm0, %v4446_v21, 0.0 }
 0x16e   : > { %3756 = vrsqrt.f32 %v1048_v1  ;;  %v620_v54 = vmul.f32 0.03125, %v499_v34  ;;  %549 = vadd.xlane.f32.xlu0 %v548_v48  ;;  %v985_v49 = vmul.f32 0.03125, %v827_v31  ;;  %v1230_v61 = vpack.c.bf16 %v1172_v9, %v1171_v56  ;;  %3662 = vmatprep.subr.bf16.mxu1 %v3863_v19  ;;  %v3711_v34 = vld [vmem:[%s5972_s5 + $0x30] sm:$0xff]  }
 0x16f   : > { %v747_v12 = vmul.f32 %v4430_v0, %v4430_v0  ;;  %v3751_v3 = vpop.eup %3750  ;;  %2326 = vmatpush1.bf16.msra.mxu0 %v3710_v6 }
 0x170   : > { %v4442_v20 = vsub.f32 %v4215_v32, %v620_v54  ;;  %v1049_v14 = vadd.f32 1e-05, %v985_v49  ;;  %3615 = vmatmul.mubr.msk.bf16.gmra.mxu0 %vm391_vm0, %v1230_v61  ;;  %v4453_v32 = vld [vmem:[%s3920_s30 + $0x1b8] sm:$0xff]  ;;  %v1173_v9 = vmul.f32 %v3751_v3, %v4156_v23  ;;  %2327 = vmatprep.subr.bf16.mxu0 %v3863_v19 }
 0x171   : > { %552 = vadd.xlane.f32.xlu1 %v551_v11  ;;  %v830_v22 = vpop.xlane.xlu1 %829  ;;  %v879_v24 = vsel %vm391_vm0, %v747_v12, 0.0  ;;  %v502_v44 = vpop.xlane.xlu0 %501  ;;  %1481 = vmatprep.mubr.bf16.mxu0 %v3863_v19  ;;  %v557_v12 = vsel %vm391_vm0, %v4453_v32, 0.0 }
 0x172   : > { %v986_v52 = vmul.f32 0.03125, %v830_v22  ;;  %880 = vadd.xlane.f32.xlu0 %v879_v24  ;;  %v621_v48 = vmul.f32 0.03125, %v502_v44  ;;  %v748_v56 = vmul.f32 %v4442_v20, %v4442_v20  ;;  %3758 = vrsqrt.f32 %v1049_v14  ;;  %3678 = vmatpush1.bf16.msra.mxu1 %v3711_v34 }
 0x173   : > { %v3753_v1 = vpop.eup %3752  ;;  %3663 = vmatprep.subr.bf16.mxu1 %v3863_v19  ;;  %2328 = vmatpush1.bf16.msra.mxu0 %v3711_v34  ;;  %v4489_v34 = vld [vmem:[%s3920_s30 + $0x1c8] sm:$0xff] }
 0x174   : > { %v1050_v31 = vadd.f32 1e-05, %v986_v52  ;;  %v4463_v11 = vsub.f32 %v4228_v42, %v621_v48  ;;  %v882_v54 = vsel %vm391_vm0, %v748_v56, 0.0  ;;  %v1174_v49 = vmul.f32 %v3753_v1, %v4167_v39  ;;  %v3712_v39 = vld [vmem:[%s5972_s5 + $0x28] sm:$0xff]   ;;  %v4481_v52 = vld [vmem:[%s3920_s30 + $0x1c0] sm:$0xff]  ;;  %2329 = vmatprep.subr.bf16.mxu0 %v3863_v19 }
 0x175   : > { %883 = vadd.xlane.f32.xlu1 %v882_v54  ;;  %v505_v61 = vpop.xlane.xlu1 %504  ;;  %v833_v23 = vpop.xlane.xlu0 %832  ;;  %v560_v54 = vsel %vm391_vm0, %v4481_v52, 0.0 }
 0x176   : > { %3760 = vrsqrt.f32 %v1050_v31  ;;  %v622_v3 = vmul.f32 0.03125, %v505_v61  ;;  %555 = vadd.xlane.f32.xlu0 %v554_v7  ;;  %v987_v6 = vmul.f32 0.03125, %v833_v23  ;;  %v1231_v14 = vpack.c.bf16 %v1174_v49, %v1173_v9  ;;  %3679 = vmatpush1.bf16.msra.mxu1 %v3712_v39  ;;  %v3713_v61 = vld [vmem:[%s5972_s5 + $0x20] sm:$0xff]  }
 0x177   : > { %v749_v42 = vmul.f32 %v4463_v11, %v4463_v11  ;;  %v3755_v22 = vpop.eup %3754  ;;  %3664 = vmatprep.subr.bf16.mxu1 %v3863_v19  ;;  %2330 = vmatpush1.bf16.msra.mxu0 %v3712_v39 }
 0x178   : > { %v4477_v24 = vsub.f32 %v4239_v50, %v622_v3  ;;  %v1051_v44 = vadd.f32 1e-05, %v987_v6  ;;  %3616 = vmatmul.mubr.msk.bf16.gmra.mxu0 %vm391_vm0, %v1231_v14  ;;  %v1175_v49 = vmul.f32 %v3755_v22, %v4179_v25  ;;  %2331 = vmatprep.subr.bf16.mxu0 %v3863_v19  ;;  %v563_v14 = vsel %vm391_vm0, %v4489_v34, 0.0 }
 0x179   : > { %558 = vadd.xlane.f32.xlu1 %v557_v12  ;;  %v836_v48 = vpop.xlane.xlu1 %835  ;;  %v885_v56 = vsel %vm391_vm0, %v749_v42, 0.0  ;;  %v508_v1 = vpop.xlane.xlu0 %507  ;;  %1491 = vmatprep.mubr.bf16.mxu0 %v3863_v19 }
 0x17a   : > { %v988_v7 = vmul.f32 0.03125, %v836_v48  ;;  %886 = vadd.xlane.f32.xlu0 %v885_v56  ;;  %v623_v9 = vmul.f32 0.03125, %v508_v1  ;;  %v750_v50 = vmul.f32 %v4477_v24, %v4477_v24  ;;  %3762 = vrsqrt.f32 %v1051_v44  ;;  %3680 = vmatpush1.bf16.msra.mxu1 %v3713_v61  ;;  %v4518_v56 = vld [vmem:[%s3920_s30 + $0x1d0] sm:$0xff] }
 0x17b   : > { %v3757_v31 = vpop.eup %3756  ;;  %3665 = vmatprep.subr.bf16.mxu1 %v3863_v19  ;;  %2332 = vmatpush1.bf16.msra.mxu0 %v3713_v61 }
 0x17c   : > { %v1052_v23 = vadd.f32 1e-05, %v988_v7  ;;  %v4499_v12 = vsub.f32 %v4247_v57, %v623_v9  ;;  %v888_v3 = vsel %vm391_vm0, %v750_v50, 0.0  ;;  %v1176_v6 = vmul.f32 %v3757_v31, %v4189_v58  ;;  %v3714_v58 = vld [vmem:[%s5972_s5 + $0x18] sm:$0xff]   ;;  %2333 = vmatprep.subr.bf16.mxu0 %v3863_v19  ;;  %v3715_v50 = vld [vmem:[%s5972_s5 + $0x10] sm:$0xff]  }
 0x17d   : > { %889 = vadd.xlane.f32.xlu1 %v888_v3  ;;  %v511_v25 = vpop.xlane.xlu1 %510  ;;  %v4527_v9 = vld [vmem:[%s3920_s30 + $0x1d8] sm:$0xff]  ;;  %v3716_v3 = vld [vmem:[%s5972_s5 + $0x8] sm:$0xff]  }
 0x17e   : > { %3764 = vrsqrt.f32 %v1052_v23  ;;  %v624_v42 = vmul.f32 0.03125, %v511_v25  ;;  %561 = vadd.xlane.f32.xlu0 %v560_v54  ;;  %v1232_v39 = vpack.c.bf16 %v1176_v6, %v1175_v49  ;;  %v751_v57 = vmul.f32 %v4499_v12, %v4499_v12  ;;  %3681 = vmatpush1.bf16.msra.mxu1 %v3714_v58 }
 0x17f   : > { %v3759_v22 = vpop.eup %3758  ;;  %3666 = vmatprep.subr.bf16.mxu1 %v3863_v19  ;;  %2334 = vmatpush1.bf16.msra.mxu0 %v3714_v58  ;;  %v569_v23 = vsel %vm391_vm0, %v4527_v9, 0.0  ;;  %v3722_v58 = vld [vmem:[%s5972_s5 + $0x58] sm:$0xff]  }
 0x180   : > { %v4513_v44 = vsub.f32 %v4253_v62, %v624_v42  ;;  %3617 = vmatmul.mubr.msk.bf16.gmra.mxu0 %vm391_vm0, %v1232_v39  ;;  %v891_v48 = vsel %vm391_vm0, %v751_v57, 0.0  ;;  %v566_v62 = vsel %vm391_vm0, %v4518_v56, 0.0  ;;  %v1177_v54 = vmul.f32 %v3759_v22, %v4201_v29  ;;  %2335 = vmatprep.subr.bf16.mxu0 %v3863_v19  ;;  %v3718_v39 = vld [vmem:[%s5972_s5 + $0x78] sm:$0xff]   ;;  %v3721_v57 = vld [vmem:[%s5972_s5 + $0x60] sm:$0xff]   ;;  %v3723_v22 = vld [vmem:[%s5972_s5 + $0x50] sm:$0xff]  }
 0x181   : > { %564 = vadd.xlane.f32.xlu1 %v563_v14  ;;  %1501 = vmatprep.mubr.bf16.mxu0 %v3863_v19 }
 0x182   : > { %892 = vadd.xlane.f32.xlu0 %v891_v48  ;;  %v752_v1 = vmul.f32 %v4513_v44, %v4513_v44  ;;  %3682 = vmatpush1.bf16.msra.mxu1 %v3715_v50  ;;  %v3724_v48 = vld [vmem:[%s5972_s5 + $0x48] sm:$0xff]  }
 0x183   : > { %v3761_v7 = vpop.eup %3760  ;;  %3667 = vmatprep.subr.bf16.mxu1 %v3863_v19  ;;  %2336 = vmatpush1.bf16.msra.mxu0 %v3715_v50 }
 0x184   : > { %v894_v31 = vsel %vm391_vm0, %v752_v1, 0.0  ;;  %v1178_v49 = vmul.f32 %v3761_v7, %v4211_v18  ;;  %2337 = vmatprep.subr.bf16.mxu0 %v3863_v19  ;;  %v3717_v18 = vld [vmem:[%s5972_s5] sm:$0xff]  }
 0x185   : > { %895 = vadd.xlane.f32.xlu1 %v894_v31  ;;  %v3725_v1 = vld [vmem:[%s5972_s5 + $0x40] sm:$0xff]  }
 0x186   : > { %567 = vadd.xlane.f32.xlu0 %v566_v62  ;;  %v1233_v61 = vpack.c.bf16 %v1178_v49, %v1177_v54  ;;  %3683 = vmatpush1.bf16.msra.mxu1 %v3716_v3 }
 0x187   : > { %v3763_v6 = vpop.eup %3762  ;;  %3668 = vmatprep.subr.bf16.mxu1 %v3863_v19  ;;  %2338 = vmatpush1.bf16.msra.mxu0 %v3716_v3 }
 0x188   : > { %3618 = vmatmul.mubr.msk.bf16.gmra.mxu0 %vm391_vm0, %v1233_v61  ;;  %v1179_v25 = vmul.f32 %v3763_v6, %v4223_v33  ;;  %2339 = vmatprep.subr.bf16.mxu0 %v3863_v19  ;;  %v3719_v33 = vld [vmem:[%s5972_s5 + $0x70] sm:$0xff]  }
 0x189   : > { %570 = vadd.xlane.f32.xlu1 %v569_v23  ;;  %1511 = vmatprep.mubr.bf16.mxu0 %v3863_v19 }
 0x18a   : > { %3684 = vmatpush1.bf16.msra.mxu1 %v3717_v18 }
 0x18b   : > { %v3765_v29 = vpop.eup %3764  ;;  %3669 = vmatprep.subr.bf16.mxu1 %v3863_v19  ;;  %2340 = vmatpush1.bf16.msra.mxu0 %v3717_v18 }
 0x18c   : > { %v1180_v14 = vmul.f32 %v3765_v29, %v4231_v43  ;;  %2341 = vmatprep.subr.bf16.mxu0 %v3863_v19  ;;  %v3720_v43 = vld [vmem:[%s5972_s5 + $0x68] sm:$0xff]  }
 0x18e   : > { %v1234_v42 = vpack.c.bf16 %v1180_v14, %v1179_v25  ;;  %3685 = vmatpush2.bf16.msra.mxu1 %v3718_v39 }
 0x18f   : > { %3670 = vmatprep.subr.bf16.mxu1 %v3863_v19  ;;  %2342 = vmatpush2.bf16.msra.mxu0 %v3718_v39 }
 0x190   : > { %3619 = vmatmul.mubr.msk.bf16.gmra.mxu0 %vm391_vm0, %v1234_v42  ;;  %2343 = vmatprep.subr.bf16.mxu0 %v3863_v19  ;;  %v4601_v42 = vld [vmem:[%s3920_s30 + $0x1e0] sm:$0xff] }
 0x191   : > { %1521 = vmatprep.mubr.bf16.mxu0 %v3863_v19 }
 0x192   : > { %3686 = vmatpush2.bf16.msra.mxu1 %v3719_v33 }
 0x193   : > { %3671 = vmatprep.subr.bf16.mxu1 %v3863_v19  ;;  %2344 = vmatpush2.bf16.msra.mxu0 %v3719_v33 }
 0x194   : > { %2345 = vmatprep.subr.bf16.mxu0 %v3863_v19 }
 0x196   : > { %3687 = vmatpush2.bf16.msra.mxu1 %v3720_v43 }
 0x197   : > { %2346 = vmatpush2.bf16.msra.mxu0 %v3720_v43  ;;  %3672 = vmatprep.subr.bf16.mxu1 %v3863_v19 }
 0x198   : > { %2347 = vmatprep.subr.bf16.mxu0 %v3863_v19 }
 0x19a   : > { %3688 = vmatpush2.bf16.msra.mxu1 %v3721_v57 }
 0x19b   : > { %2348 = vmatpush2.bf16.msra.mxu0 %v3721_v57  ;;  %3673 = vmatprep.subr.bf16.mxu1 %v3863_v19 }
 0x19c   : > { %2349 = vmatprep.subr.bf16.mxu0 %v3863_v19 }
 0x19e   : > { %3689 = vmatpush2.bf16.msra.mxu1 %v3722_v58 }
 0x19f   : > { %2350 = vmatpush2.bf16.msra.mxu0 %v3722_v58  ;;  %3674 = vmatprep.subr.bf16.mxu1 %v3863_v19 }
 0x1a0   : > { %2351 = vmatprep.subr.bf16.mxu0 %v3863_v19 }
 0x1a2   : > { %3690 = vmatpush2.bf16.msra.mxu1 %v3723_v22 }
 0x1a3   : > { %2352 = vmatpush2.bf16.msra.mxu0 %v3723_v22  ;;  %3675 = vmatprep.subr.bf16.mxu1 %v3863_v19 }
 0x1a4   : > { %2353 = vmatprep.subr.bf16.mxu0 %v3863_v19 }
 0x1a6   : > { %3691 = vmatpush2.bf16.msra.mxu1 %v3724_v48 }
 0x1a7   : > { %2354 = vmatpush2.bf16.msra.mxu0 %v3724_v48  ;;  %3676 = vmatprep.subr.bf16.mxu1 %v3863_v19 }
 0x1a8   : > { %2355 = vmatprep.subr.bf16.mxu0 %v3863_v19 }
 0x1aa   : > { %3692 = vmatpush2.bf16.msra.mxu1 %v3725_v1 }
 0x1ab   : > { %2356 = vmatpush2.bf16.msra.mxu0 %v3725_v1  ;;  %v572_v1 = vsel %vm391_vm0, %v4601_v42, 0.0 }
 0x1c2   : > { %v839_v7 = vpop.xlane.xlu0 %838 }
 0x1c3   : > { %v989_v62 = vmul.f32 0.03125, %v839_v7  ;;  %v4612_v7 = vld [vmem:[%s3920_s30 + $0x1e8] sm:$0xff] }
 0x1c5   : > { %v1053_v50 = vadd.f32 1e-05, %v989_v62 }
 0x1c6   : > { %v842_v31 = vpop.xlane.xlu1 %841  ;;  %v514_v54 = vpop.xlane.xlu0 %513 }
 0x1c7   : > { %v990_v49 = vmul.f32 0.03125, %v842_v31  ;;  %v625_v61 = vmul.f32 0.03125, %v514_v54  ;;  %3766 = vrsqrt.f32 %v1053_v50 }
 0x1c9   : > { %v1054_v23 = vadd.f32 1e-05, %v990_v49  ;;  %v4596_v3 = vsub.f32 %v4263_v46, %v625_v61  ;;  %v575_v61 = vsel %vm391_vm0, %v4612_v7, 0.0 }
 0x1ca   : > { %v517_v6 = vpop.xlane.xlu1 %516  ;;  %v845_v29 = vpop.xlane.xlu0 %844 }
 0x1cb   : > { %3768 = vrsqrt.f32 %v1054_v23  ;;  %v626_v18 = vmul.f32 0.03125, %v517_v6  ;;  %v991_v25 = vmul.f32 0.03125, %v845_v29  ;;  %v753_v14 = vmul.f32 %v4596_v3, %v4596_v3  ;;  %v4623_v29 = vld [vmem:[%s3920_s30 + $0x1f0] sm:$0xff] }
 0x1cd   : > { %v4604_v39 = vsub.f32 %v4274_v2, %v626_v18  ;;  %v1055_v33 = vadd.f32 1e-05, %v991_v25  ;;  %v897_v43 = vsel %vm391_vm0, %v753_v14, 0.0 }
 0x1ce   : > { %v848_v57 = vpop.xlane.xlu1 %847  ;;  %898 = vadd.xlane.f32.xlu0 %v897_v43  ;;  %v520_v46 = vpop.xlane.xlu0 %519 }
 0x1cf   : > { %v992_v58 = vmul.f32 0.03125, %v848_v57  ;;  %v627_v22 = vmul.f32 0.03125, %v520_v46  ;;  %v754_v48 = vmul.f32 %v4604_v39, %v4604_v39  ;;  %3770 = vrsqrt.f32 %v1055_v33 }
 0x1d1   : > { %v1056_v2 = vadd.f32 1e-05, %v992_v58  ;;  %v4615_v62 = vsub.f32 %v4285_v35, %v627_v22  ;;  %v900_v50 = vsel %vm391_vm0, %v754_v48, 0.0  ;;  %v578_v58 = vsel %vm391_vm0, %v4623_v29, 0.0 }
 0x1d2   : > { %901 = vadd.xlane.f32.xlu1 %v900_v50  ;;  %v523_v31 = vpop.xlane.xlu1 %522  ;;  %573 = vadd.xlane.f32.xlu0 %v572_v1 }
 0x1d3   : > { %3772 = vrsqrt.f32 %v1056_v2  ;;  %v628_v54 = vmul.f32 0.03125, %v523_v31  ;;  %v851_v49 = vpop.xlane.xlu0 %850  ;;  %v755_v23 = vmul.f32 %v4615_v62, %v4615_v62 }
 0x1d4   : > { %v993_v6 = vmul.f32 0.03125, %v851_v49  ;;  %v3767_v25 = vpop.eup %3766 }
 0x1d5   : > { %v4626_v35 = vsub.f32 %v4296_v60, %v628_v54  ;;  %v903_v18 = vsel %vm391_vm0, %v755_v23, 0.0  ;;  %v4634_v60 = vld [vmem:[%s3920_s30 + $0x1f8] sm:$0xff]  ;;  %v1181_v50 = vmul.f32 %v3767_v25, %v4258_v27 }
 0x1d6   : > { %v1057_v14 = vadd.f32 1e-05, %v993_v6  ;;  %576 = vadd.xlane.f32.xlu1 %v575_v61  ;;  %v854_v33 = vpop.xlane.xlu1 %853  ;;  %904 = vadd.xlane.f32.xlu0 %v903_v18  ;;  %v581_v18 = vsel %vm391_vm0, %v4634_v60, 0.0 }
 0x1d7   : > { %v994_v43 = vmul.f32 0.03125, %v854_v33  ;;  %v526_v57 = vpop.xlane.xlu0 %525  ;;  %v756_v46 = vmul.f32 %v4626_v35, %v4626_v35 }
 0x1d8   : > { %v3769_v22 = vpop.eup %3768  ;;  %3774 = vrsqrt.f32 %v1057_v14  ;;  %v629_v48 = vmul.f32 0.03125, %v526_v57 }
 0x1d9   : > { %v1058_v1 = vadd.f32 1e-05, %v994_v43  ;;  %v906_v2 = vsel %vm391_vm0, %v756_v46, 0.0  ;;  %v1182_v31 = vmul.f32 %v3769_v22, %v4266_v47 }
 0x1da   : > { %v4640_v54 = vsub.f32 %v4313_v36, %v629_v48  ;;  %907 = vadd.xlane.f32.xlu1 %v906_v2  ;;  %v529_v49 = vpop.xlane.xlu1 %528  ;;  %579 = vadd.xlane.f32.xlu0 %v578_v58 }
 0x1db   : > { %3776 = vrsqrt.f32 %v1058_v1  ;;  %v630_v61 = vmul.f32 0.03125, %v529_v49  ;;  %v857_v23 = vpop.xlane.xlu0 %856  ;;  %v1235_v6 = vpack.c.bf16 %v1182_v31, %v1181_v50 }
 0x1dc   : > { %v995_v14 = vmul.f32 0.03125, %v857_v23  ;;  %v757_v33 = vmul.f32 %v4640_v54, %v4640_v54  ;;  %v3771_v47 = vpop.eup %3770 }
 0x1dd   : > { %v4647_v27 = vsub.f32 %v4320_v10, %v630_v61  ;;  %3620 = vmatmul.mubr.msk.bf16.gmra.mxu0 %vm391_vm0, %v1235_v6  ;;  %v1183_v2 = vmul.f32 %v3771_v47, %v4277_v4 }
 0x1de   : > { %v1059_v36 = vadd.f32 1e-05, %v995_v14  ;;  %582 = vadd.xlane.f32.xlu1 %v581_v18  ;;  %v860_v25 = vpop.xlane.xlu1 %859  ;;  %v909_v43 = vsel %vm391_vm0, %v757_v33, 0.0  ;;  %1531 = vmatprep.mubr.bf16.mxu0 %v3863_v19 }
 0x1df   : > { %v996_v57 = vmul.f32 0.03125, %v860_v25  ;;  %910 = vadd.xlane.f32.xlu0 %v909_v43  ;;  %v532_v46 = vpop.xlane.xlu0 %531  ;;  %v758_v58 = vmul.f32 %v4647_v27, %v4647_v27 }
 0x1e0   : > { %v3773_v22 = vpop.eup %3772  ;;  %3778 = vrsqrt.f32 %v1059_v36  ;;  %v631_v10 = vmul.f32 0.03125, %v532_v46 }
 0x1e1   : > { %v1060_v48 = vadd.f32 1e-05, %v996_v57  ;;  %v912_v1 = vsel %vm391_vm0, %v758_v58, 0.0  ;;  %v1184_v50 = vmul.f32 %v3773_v22, %v4288_v38 }
 0x1e2   : > { %v4658_v31 = vsub.f32 %v4339_v55, %v631_v10  ;;  %913 = vadd.xlane.f32.xlu1 %v912_v1  ;;  %v535_v49 = vpop.xlane.xlu1 %534 }
 0x1e3   : > { %3780 = vrsqrt.f32 %v1060_v48  ;;  %v632_v61 = vmul.f32 0.03125, %v535_v49  ;;  %v863_v23 = vpop.xlane.xlu0 %862  ;;  %v1236_v6 = vpack.c.bf16 %v1184_v50, %v1183_v2 }
 0x1e4   : > { %v997_v18 = vmul.f32 0.03125, %v863_v23  ;;  %v759_v14 = vmul.f32 %v4658_v31, %v4658_v31 }
 0x1e5   : > { %v3775_v33 = vpop.eup %3774  ;;  %v4663_v36 = vsub.f32 %v4346_v16, %v632_v61  ;;  %3621 = vmatmul.mubr.msk.bf16.gmra.mxu0 %vm391_vm0, %v1236_v6 }
 0x1e6   : > { %v1061_v4 = vadd.f32 1e-05, %v997_v18  ;;  %v866_v38 = vpop.xlane.xlu1 %865  ;;  %v915_v55 = vsel %vm391_vm0, %v759_v14, 0.0  ;;  %1541 = vmatprep.mubr.bf16.mxu0 %v3863_v19  ;;  %v1185_v58 = vmul.f32 %v3775_v33, %v4300_v5 }
 0x1e7   : > { %v998_v47 = vmul.f32 0.03125, %v866_v38  ;;  %916 = vadd.xlane.f32.xlu0 %v915_v55  ;;  %v538_v25 = vpop.xlane.xlu0 %537  ;;  %v760_v43 = vmul.f32 %v4663_v36, %v4663_v36 }
 0x1e8   : > { %v3777_v57 = vpop.eup %3776  ;;  %v633_v46 = vmul.f32 0.03125, %v538_v25  ;;  %3782 = vrsqrt.f32 %v1061_v4 }
 0x1e9   : > { %v1062_v16 = vadd.f32 1e-05, %v998_v47  ;;  %v918_v22 = vsel %vm391_vm0, %v760_v43, 0.0  ;;  %v1186_v10 = vmul.f32 %v3777_v57, %v4309_v41 }
 0x1ea   : > { %v4674_v48 = vsub.f32 %v4365_v37, %v633_v46  ;;  %919 = vadd.xlane.f32.xlu1 %v918_v22  ;;  %v541_v1 = vpop.xlane.xlu1 %540 }
 0x1eb   : > { %3784 = vrsqrt.f32 %v1062_v16  ;;  %v634_v2 = vmul.f32 0.03125, %v541_v1  ;;  %v869_v50 = vpop.xlane.xlu0 %868  ;;  %v1237_v49 = vpack.c.bf16 %v1186_v10, %v1185_v58 }
 0x1ec   : > { %v999_v61 = vmul.f32 0.03125, %v869_v50  ;;  %v761_v23 = vmul.f32 %v4674_v48, %v4674_v48 }
 0x1ed   : > { %v3779_v5 = vpop.eup %3778  ;;  %v4679_v6 = vsub.f32 %v4372_v13, %v634_v2  ;;  %3622 = vmatmul.mubr.msk.bf16.gmra.mxu0 %vm391_vm0, %v1237_v49 }
 0x1ee   : > { %v1063_v41 = vadd.f32 1e-05, %v999_v61  ;;  %v872_v18 = vpop.xlane.xlu1 %871  ;;  %v921_v37 = vsel %vm391_vm0, %v761_v23, 0.0  ;;  %1551 = vmatprep.mubr.bf16.mxu0 %v3863_v19  ;;  %v1187_v47 = vmul.f32 %v3779_v5, %v4326_v15 }
 0x1ef   : > { %v1000_v14 = vmul.f32 0.03125, %v872_v18  ;;  %922 = vadd.xlane.f32.xlu0 %v921_v37  ;;  %v544_v33 = vpop.xlane.xlu0 %543  ;;  %v762_v4 = vmul.f32 %v4679_v6, %v4679_v6  ;;  %v1263_v18 = vlaneseq }
 0x1f0   : > { %v3781_v38 = vpop.eup %3780  ;;  %v635_v55 = vmul.f32 0.03125, %v544_v33  ;;  %3786 = vrsqrt.f32 %v1063_v41 }
 0x1f1   : > { %v1064_v13 = vadd.f32 1e-05, %v1000_v14  ;;  %v924_v25 = vsel %vm391_vm0, %v762_v4, 0.0  ;;  %v1188_v43 = vmul.f32 %v3781_v38, %v4335_v53 }
 0x1f2   : > { %v4690_v57 = vsub.f32 %v4391_v63, %v635_v55  ;;  %925 = vadd.xlane.f32.xlu1 %v924_v25  ;;  %v547_v46 = vpop.xlane.xlu1 %546 }
 0x1f3   : > { %3788 = vrsqrt.f32 %v1064_v13  ;;  %v636_v58 = vmul.f32 0.03125, %v547_v46  ;;  %v875_v16 = vpop.xlane.xlu0 %874  ;;  %v1238_v22 = vpack.c.bf16 %v1188_v43, %v1187_v47  ;;  %v4710_v46 = vshrl.u32 %v1263_v18, 7 }
 0x1f4   : > { %v1001_v10 = vmul.f32 0.03125, %v875_v16  ;;  %v763_v1 = vmul.f32 %v4690_v57, %v4690_v57 }
 0x1f5   : > { %v4695_v15 = vsub.f32 %v4398_v40, %v636_v58  ;;  %3623 = vmatmul.mubr.msk.bf16.gmra.mxu0 %vm391_vm0, %v1238_v22  ;;  %v3783_v2 = vpop.eup %3782 }
 0x1f6   : > { %v1065_v53 = vadd.f32 1e-05, %v1001_v10  ;;  %v878_v50 = vpop.xlane.xlu1 %877  ;;  %v927_v63 = vsel %vm391_vm0, %v763_v1, 0.0  ;;  %1561 = vmatprep.mubr.bf16.mxu0 %v3863_v19  ;;  %v1189_v14 = vmul.f32 %v3783_v2, %v4352_v30 }
 0x1f7   : > { %v1002_v49 = vmul.f32 0.03125, %v878_v50  ;;  %928 = vadd.xlane.f32.xlu0 %v927_v63  ;;  %v550_v61 = vpop.xlane.xlu0 %549  ;;  %v764_v23 = vmul.f32 %v4695_v15, %v4695_v15 }
 0x1f8   : > { %v3785_v5 = vpop.eup %3784  ;;  %v637_v41 = vmul.f32 0.03125, %v550_v61  ;;  %3790 = vrsqrt.f32 %v1065_v53 }
 0x1f9   : > { %v1066_v40 = vadd.f32 1e-05, %v1002_v49  ;;  %v930_v37 = vsel %vm391_vm0, %v764_v23, 0.0  ;;  %v1190_v33 = vmul.f32 %v3785_v5, %v4361_v51 }
 0x1fa   : > { %v4706_v4 = vsub.f32 %v4417_v59, %v637_v41  ;;  %931 = vadd.xlane.f32.xlu1 %v930_v37  ;;  %v553_v38 = vpop.xlane.xlu1 %552  ;;  %v4730_v41 = vld [vmem:[%s5971_s4] sm:$0x3] }
 0x1fb   : > { %3792 = vrsqrt.f32 %v1066_v40  ;;  %v638_v55 = vmul.f32 0.03125, %v553_v38  ;;  %v881_v47 = vpop.xlane.xlu0 %880  ;;  %v1239_v13 = vpack.c.bf16 %v1190_v33, %v1189_v14 }
 0x1fc   : > { %v1003_v25 = vmul.f32 0.03125, %v881_v47  ;;  %v765_v43 = vmul.f32 %v4706_v4, %v4706_v4 }
 0x1fd   : > { %v4713_v30 = vsub.f32 %v4424_v28, %v638_v55  ;;  %3624 = vmatmul.mubr.msk.bf16.gmra.mxu0 %vm391_vm0, %v1239_v13  ;;  %v3787_v51 = vpop.eup %3786  ;;  %v1265_v28 = vsub.s32 0, %v4710_v46 }
 0x1fe   : > { %v884_v59 = vpop.xlane.xlu1 %883  ;;  %v933_v58 = vsel %vm391_vm0, %v765_v43, 0.0  ;;  %1571 = vmatprep.mubr.bf16.mxu0 %v3863_v19  ;;  %v1067_v2 = vadd.f32 1e-05, %v1003_v25  ;;  %v1191_v49 = vmul.f32 %v3787_v51, %v4378_v26 }
 0x1ff   : > { %v1004_v16 = vmul.f32 0.03125, %v884_v59  ;;  %934 = vadd.xlane.f32.xlu0 %v933_v58  ;;  %v556_v22 = vpop.xlane.xlu0 %555  ;;  %v766_v10 = vmul.f32 %v4713_v30, %v4713_v30 }
 0x200   : > { %v3789_v1 = vpop.eup %3788  ;;  %v639_v53 = vmul.f32 0.03125, %v556_v22 }
 0x201   : > { %v1068_v50 = vadd.f32 1e-05, %v1004_v16  ;;  %v936_v63 = vsel %vm391_vm0, %v766_v10, 0.0  ;;  %v1192_v61 = vmul.f32 %v3789_v1, %v4387_v17 }
 0x202   : > { %v4725_v23 = vsub.f32 %v4446_v21, %v639_v53  ;;  %937 = vadd.xlane.f32.xlu1 %v936_v63  ;;  %v559_v5 = vpop.xlane.xlu1 %558  ;;  %v4739_v21 = vrot.slane %v4730_v41, %v1265_v28 }
 0x203   : > { %3794 = vrsqrt.f32 %v1068_v50  ;;  %v640_v18 = vmul.f32 0.03125, %v559_v5  ;;  %v887_v40 = vpop.xlane.xlu0 %886  ;;  %v1240_v37 = vpack.c.bf16 %v1192_v61, %v1191_v49 }
 0x204   : > { %3796 = vrsqrt.f32 %v1067_v2  ;;  %v1005_v14 = vmul.f32 0.03125, %v887_v40  ;;  %v767_v26 = vmul.f32 %v4725_v23, %v4725_v23 }
 0x205   : > { %v4735_v17 = vsub.f32 %v4453_v32, %v640_v18  ;;  %3625 = vmatmul.mubr.msk.bf16.gmra.mxu0 %vm391_vm0, %v1240_v37  ;;  %v3791_v47 = vpop.eup %3790 }
 0x206   : > { %v1069_v33 = vadd.f32 1e-05, %v1005_v14  ;;  %v890_v38 = vpop.xlane.xlu1 %889  ;;  %v939_v55 = vsel %vm391_vm0, %v767_v26, 0.0  ;;  %1581 = vmatprep.mubr.bf16.mxu0 %v3863_v19  ;;  %v1193_v28 = vmul.f32 %v3791_v47, %v4404_v45 }
 0x207   : > { %v1006_v13 = vmul.f32 0.03125, %v890_v38  ;;  %940 = vadd.xlane.f32.xlu0 %v939_v55  ;;  %v562_v25 = vpop.xlane.xlu0 %561  ;;  %v768_v43 = vmul.f32 %v4735_v17, %v4735_v17 }
 0x208   : > { %v3793_v32 = vpop.eup %3792  ;;  %v641_v51 = vmul.f32 0.03125, %v562_v25  ;;  %v1423_v59 = vpop.f32.mrf.mxu0  ;;  %3798 = vrsqrt.f32 %v1069_v33 }
 0x209   : > { %v1070_v58 = vadd.f32 1e-05, %v1006_v13  ;;  %v1424_v16 = vadd.f32 %v1423_v59, %v4739_v21  ;;  %v942_v22 = vsel %vm391_vm0, %v768_v43, 0.0  ;;  %v1194_v10 = vmul.f32 %v3793_v32, %v4413_v8 }
 0x20a   : > { %v4749_v1 = vsub.f32 %v4481_v52, %v641_v51  ;;  %943 = vadd.xlane.f32.xlu1 %v942_v22  ;;  %v565_v2 = vpop.xlane.xlu1 %564  ;;  %v4751_v53 = vpop.f32.mrf.mxu0 }
 0x20b   : > { %3800 = vrsqrt.f32 %v1070_v58  ;;  %v642_v50 = vmul.f32 0.03125, %v565_v2  ;;  %v893_v63 = vpop.xlane.xlu0 %892  ;;  %v1241_v5 = vpack.c.bf16 %v1194_v10, %v1193_v28  ;;  %v1870_v8 = vmul.f32 0.01, %v1424_v16 }
 0x20c   : > { %v1007_v49 = vmul.f32 0.03125, %v893_v63  ;;  %v1427_v61 = vpop.f32.mrf.mxu0  ;;  %v769_v18 = vmul.f32 %v4749_v1, %v4749_v1  ;;  %vm1742_vm1 = vcmp.gt.f32.partialorder %v1424_v16, 0.0 }
 0x20d   : > { %v4757_v40 = vsub.f32 %v4489_v34, %v642_v50  ;;  %v1428_v52 = vadd.f32 %v1427_v61, %v4739_v21  ;;  %3626 = vmatmul.mubr.msk.bf16.gmra.mxu0 %vm391_vm0, %v1241_v5  ;;  %v4768_v32 = vsel %vm1742_vm1, %v1424_v16, %v1870_v8 }
 0x20e   : > { %v1071_v37 = vadd.f32 1e-05, %v1007_v49  ;;  %v896_v45 = vpop.xlane.xlu1 %895  ;;  %v4761_v14 = vpop.f32.mrf.mxu0  ;;  %v945_v26 = vsel %vm391_vm0, %v769_v18, 0.0  ;;  %1591 = vmatprep.mubr.bf16.mxu0 %v3863_v19 }
 0x20f   : > { %vm1744_vm2 = vcmp.gt.f32.partialorder %v1428_v52, 0.0  ;;  %v1872_v33 = vmul.f32 0.01, %v1428_v52  ;;  %v1008_v38 = vmul.f32 0.03125, %v896_v45  ;;  %946 = vadd.xlane.f32.xlu0 %v945_v26  ;;  %v568_v55 = vpop.xlane.xlu0 %567  ;;  %v770_v25 = vmul.f32 %v4757_v40, %v4757_v40 }
 0x210   : > { %v3795_v34 = vpop.eup %3794  ;;  %v643_v47 = vmul.f32 0.03125, %v568_v55  ;;  %v1433_v13 = vpop.f32.mrf.mxu0  ;;  %3802 = vrsqrt.f32 %v1071_v37 }
 0x211   : > { %v3797_v43 = vpop.eup %3796  ;;  %v4770_v51 = vsel %vm1744_vm2, %v1428_v52, %v1872_v33  ;;  %v1072_v59 = vadd.f32 1e-05, %v1008_v38  ;;  %v1434_v10 = vadd.f32 %v1433_v13, %v4739_v21  ;;  %v948_v2 = vsel %vm391_vm0, %v770_v25, 0.0 }
 0x212   : > { %v2126_v58 = vpack.c.bf16 %v4770_v51, %v4768_v32  ;;  %v4775_v22 = vsub.f32 %v4518_v56, %v643_v47  ;;  %v571_v28 = vpop.xlane.xlu1 %570  ;;  %v4779_v50 = vpop.f32.mrf.mxu0  ;;  %949 = vadd.xlane.f32.xlu1 %v948_v2  ;;  %v1196_v63 = vmul.f32 %v3795_v34, %v4442_v20  ;;  %v1195_v61 = vmul.f32 %v3797_v43, %v4430_v0  ;;  %v2694_v32 = vld [vmem:[%s5108_s15 + $0x80] sm:$0xff] }
 0x213   : > { %3804 = vrsqrt.f32 %v1072_v59  ;;  %v644_v16 = vmul.f32 0.03125, %v571_v28  ;;  %v1874_v56 = vmul.f32 0.01, %v1434_v10  ;;  %vm1746_vm3 = vcmp.gt.f32.partialorder %v1434_v10, 0.0 }
 0x214   : > { %v1437_v49 = vpop.f32.mrf.mxu0  ;;  %v771_v5 = vmul.f32 %v4775_v22, %v4775_v22  ;;  %v1242_v52 = vpack.c.bf16 %v1196_v63, %v1195_v61  ;;  %v1269_v28 = vsub.s32 1, %v4710_v46 }
 0x215   : > { %v4786_v18 = vsub.f32 %v4527_v9, %v644_v16  ;;  %v1438_v8 = vadd.f32 %v1437_v49, %v4739_v21  ;;  %v3799_v26 = vpop.eup %3798  ;;  %v4795_v38 = vsel %vm1746_vm3, %v1434_v10, %v1874_v56 }
 0x216   : > { %v4789_v37 = vpop.f32.mrf.mxu0  ;;  %v951_v45 = vsel %vm391_vm0, %v771_v5, 0.0  ;;  %3627 = vmatmul.mubr.msk.bf16.gmra.mxu0 %vm391_vm0, %v1242_v52  ;;  %v1197_v43 = vmul.f32 %v3799_v26, %v4463_v11 }
 0x217   : > { %vm1748_vm4 = vcmp.gt.f32.partialorder %v1438_v8, 0.0  ;;  %v1876_v20 = vmul.f32 0.01, %v1438_v8  ;;  %952 = vadd.xlane.f32.xlu0 %v951_v45  ;;  %v772_v0 = vmul.f32 %v4786_v18, %v4786_v18  ;;  %1601 = vmatprep.mubr.bf16.mxu0 %v3863_v19 }
 0x218   : > { %v3801_v33 = vpop.eup %3800  ;;  %v1443_v9 = vpop.f32.mrf.mxu0 }
 0x219   : > { %v4797_v55 = vsel %vm1748_vm4, %v1438_v8, %v1876_v20  ;;  %v1444_v34 = vadd.f32 %v1443_v9, %v4739_v21  ;;  %v954_v13 = vsel %vm391_vm0, %v772_v0, 0.0  ;;  %v1198_v59 = vmul.f32 %v3801_v33, %v4477_v24 }
 0x21a   : > { %v4804_v25 = vpop.f32.mrf.mxu0  ;;  %955 = vadd.xlane.f32.xlu1 %v954_v13  ;;  %v4814_v24 = vrot.slane %v4730_v41, %v1269_v28 }
 0x21b   : > { %v1243_v2 = vpack.c.bf16 %v1198_v59, %v1197_v43  ;;  %v1878_v16 = vmul.f32 0.01, %v1444_v34  ;;  %vm1750_vm5 = vcmp.gt.f32.partialorder %v1444_v34, 0.0 }
 0x21c   : > { %v1447_v10 = vpop.f32.mrf.mxu0 }
 0x21d   : > { %v1448_v63 = vadd.f32 %v1447_v10, %v4739_v21  ;;  %v3803_v49 = vpop.eup %3802  ;;  %v4816_v8 = vsel %vm1750_vm5, %v1444_v34, %v1878_v16 }
 0x21e   : > { %v4810_v61 = vpop.f32.mrf.mxu0  ;;  %3628 = vmatmul.mubr.msk.bf16.gmra.mxu0 %vm391_vm0, %v1243_v2  ;;  %v1199_v26 = vmul.f32 %v3803_v49, %v4499_v12 }
 0x21f   : > { %vm1752_vm6 = vcmp.gt.f32.partialorder %v1448_v63, 0.0  ;;  %v1880_v5 = vmul.f32 0.01, %v1448_v63  ;;  %1611 = vmatprep.mubr.bf16.mxu0 %v3863_v19 }
 0x220   : > { %v3805_v56 = vpop.eup %3804  ;;  %v1453_v11 = vpop.f32.mrf.mxu0 }
 0x221   : > { %v4818_v52 = vsel %vm1752_vm6, %v1448_v63, %v1880_v5  ;;  %v1200_v20 = vmul.f32 %v3805_v56, %v4513_v44  ;;  %v1454_v33 = vadd.f32 %v1453_v11, %v4739_v21 }
 0x222   : > { %v1455_v45 = vpop.f32.mrf.mxu0 }
 0x223   : > { %v1456_v0 = vadd.f32 %v1455_v45, %v4814_v24  ;;  %v1244_v9 = vpack.c.bf16 %v1200_v20, %v1199_v26  ;;  %v1882_v2 = vmul.f32 0.01, %v1454_v33  ;;  %vm1754_vm9 = vcmp.gt.f32.partialorder %v1454_v33, 0.0 }
 0x224   : > { %v1457_v41 = vpop.f32.mrf.mxu0 }
 0x225   : > { %v1458_v34 = vadd.f32 %v1457_v41, %v4739_v21  ;;  %v1883_v43 = vmul.f32 0.01, %v1456_v0  ;;  %vm1755_vm8 = vcmp.gt.f32.partialorder %v1456_v0, 0.0  ;;  %v2010_v26 = vsel %vm1754_vm9, %v1454_v33, %v1882_v2 }
 0x226   : > { %v1459_v13 = vpop.f32.mrf.mxu0  ;;  %3629 = vmatmul.mubr.msk.bf16.gmra.mxu0 %vm391_vm0, %v1244_v9 }
 0x227   : > { %vm1756_vm7 = vcmp.gt.f32.partialorder %v1458_v34, 0.0  ;;  %v1884_v59 = vmul.f32 0.01, %v1458_v34  ;;  %v1460_v10 = vadd.f32 %v1459_v13, %v4814_v24  ;;  %1621 = vmatprep.mubr.bf16.mxu0 %v3863_v19  ;;  %v2011_v49 = vsel %vm1755_vm8, %v1456_v0, %v1883_v43 }
 0x228   : > { %v1463_v12 = vpop.f32.mrf.mxu0 }
 0x229   : > { %vm1757_vm10 = vcmp.gt.f32.partialorder %v1460_v10, 0.0  ;;  %v1885_v44 = vmul.f32 0.01, %v1460_v10  ;;  %v2012_v16 = vsel %vm1756_vm7, %v1458_v34, %v1884_v59  ;;  %v1464_v56 = vadd.f32 %v1463_v12, %v4739_v21 }
 0x22a   : > { %v1465_v28 = vpop.f32.mrf.mxu0  ;;  %v2132_v41 = vpack.c.bf16 %v2012_v16, %v2010_v26 }
 0x22b   : > { %v1466_v63 = vadd.f32 %v1465_v28, %v4814_v24  ;;  %v2013_v5 = vsel %vm1757_vm10, %v1460_v10, %v1885_v44  ;;  %v1886_v34 = vmul.f32 0.01, %v1464_v56  ;;  %vm1758_vm13 = vcmp.gt.f32.partialorder %v1464_v56, 0.0 }
 0x22c   : > { %v1467_v11 = vpop.f32.mrf.mxu0  ;;  %v2133_v45 = vpack.c.bf16 %v2013_v5, %v2011_v49 }
 0x22d   : > { %v1468_v20 = vadd.f32 %v1467_v11, %v4739_v21  ;;  %v1887_v13 = vmul.f32 0.01, %v1466_v63  ;;  %vm1759_vm12 = vcmp.gt.f32.partialorder %v1466_v63, 0.0  ;;  %v2014_v49 = vsel %vm1758_vm13, %v1464_v56, %v1886_v34 }
 0x22e   : > { %v1469_v9 = vpop.f32.mrf.mxu0  ;;  %2381 = vmatprep.mubr.bf16.mxu1 %v2133_v45 }
 0x22f   : > { %vm1760_vm11 = vcmp.gt.f32.partialorder %v1468_v20, 0.0  ;;  %v1888_v46 = vmul.f32 0.01, %v1468_v20  ;;  %v1470_v47 = vadd.f32 %v1469_v9, %v4814_v24  ;;  %2382 = vmatmul.mubr.bf16.vlgmr.msra.gmra.mxu1 %v2132_v41  ;;  %v2015_v2 = vsel %vm1759_vm12, %v1466_v63, %v1887_v13 }
 0x230   : > { %v1473_v0 = vpop.f32.mrf.mxu0 }
 0x231   : > { %vm1761_vm14 = vcmp.gt.f32.partialorder %v1470_v47, 0.0  ;;  %v1889_v43 = vmul.f32 0.01, %v1470_v47  ;;  %v2016_v10 = vsel %vm1760_vm11, %v1468_v20, %v1888_v46  ;;  %v1474_v44 = vadd.f32 %v1473_v0, %v4739_v21 }
 0x232   : > { %v1475_v59 = vpop.f32.mrf.mxu0  ;;  %v2134_v11 = vpack.c.bf16 %v2016_v10, %v2014_v49 }
 0x233   : > { %v1476_v33 = vadd.f32 %v1475_v59, %v4814_v24  ;;  %v2017_v12 = vsel %vm1761_vm14, %v1470_v47, %v1889_v43  ;;  %v1890_v46 = vmul.f32 0.01, %v1474_v44  ;;  %vm1762_vm2 = vcmp.gt.f32.partialorder %v1474_v44, 0.0 }
 0x234   : > { %v1477_v28 = vpop.f32.mrf.mxu0  ;;  %v2135_v16 = vpack.c.bf16 %v2017_v12, %v2015_v2 }
 0x235   : > { %v1478_v5 = vadd.f32 %v1477_v28, %v4739_v21  ;;  %v1891_v26 = vmul.f32 0.01, %v1476_v33  ;;  %vm1763_vm1 = vcmp.gt.f32.partialorder %v1476_v33, 0.0  ;;  %v2018_v2 = vsel %vm1762_vm2, %v1474_v44, %v1890_v46 }
 0x236   : > { %v1479_v45 = vpop.f32.mrf.mxu0  ;;  %2389 = vmatprep.mubr.bf16.mxu1 %v2135_v16 }
 0x237   : > { %vm1764_vm15 = vcmp.gt.f32.partialorder %v1478_v5, 0.0  ;;  %v1892_v41 = vmul.f32 0.01, %v1478_v5  ;;  %v1480_v9 = vadd.f32 %v1479_v45, %v4814_v24  ;;  %2390 = vmatmul.mubr.bf16.gmra.mxu1 %v2134_v11  ;;  %v2019_v34 = vsel %vm1763_vm1, %v1476_v33, %v1891_v26 }
 0x238   : > { %v1483_v63 = vpop.f32.mrf.mxu0 }
 0x239   : > { %vm1765_vm3 = vcmp.gt.f32.partialorder %v1480_v9, 0.0  ;;  %v1893_v47 = vmul.f32 0.01, %v1480_v9  ;;  %v2020_v13 = vsel %vm1764_vm15, %v1478_v5, %v1892_v41  ;;  %v1484_v43 = vadd.f32 %v1483_v63, %v4739_v21 }
 0x23a   : > { %v1485_v20 = vpop.f32.mrf.mxu0  ;;  %v2136_v28 = vpack.c.bf16 %v2020_v13, %v2018_v2 }
 0x23b   : > { %v1486_v56 = vadd.f32 %v1485_v20, %v4814_v24  ;;  %v2021_v0 = vsel %vm1765_vm3, %v1480_v9, %v1893_v47  ;;  %v1894_v5 = vmul.f32 0.01, %v1484_v43  ;;  %vm1766_vm6 = vcmp.gt.f32.partialorder %v1484_v43, 0.0 }
 0x23c   : > { %v1487_v59 = vpop.f32.mrf.mxu0  ;;  %v2137_v10 = vpack.c.bf16 %v2021_v0, %v2019_v34 }
 0x23d   : > { %v1488_v12 = vadd.f32 %v1487_v59, %v4739_v21  ;;  %v1895_v49 = vmul.f32 0.01, %v1486_v56  ;;  %vm1767_vm5 = vcmp.gt.f32.partialorder %v1486_v56, 0.0  ;;  %v2022_v34 = vsel %vm1766_vm6, %v1484_v43, %v1894_v5 }
 0x23e   : > { %v1489_v16 = vpop.f32.mrf.mxu0  ;;  %2397 = vmatprep.mubr.bf16.mxu1 %v2137_v10 }
 0x23f   : > { %vm1768_vm4 = vcmp.gt.f32.partialorder %v1488_v12, 0.0  ;;  %v1896_v11 = vmul.f32 0.01, %v1488_v12  ;;  %v1490_v45 = vadd.f32 %v1489_v16, %v4814_v24  ;;  %2398 = vmatmul.mubr.bf16.gmra.mxu1 %v2136_v28  ;;  %v2023_v46 = vsel %vm1767_vm5, %v1486_v56, %v1895_v49 }
 0x240   : > { %v1493_v33 = vpop.f32.mrf.mxu0 }
 0x241   : > { %vm1769_vm7 = vcmp.gt.f32.partialorder %v1490_v45, 0.0  ;;  %v1897_v26 = vmul.f32 0.01, %v1490_v45  ;;  %v2024_v9 = vsel %vm1768_vm4, %v1488_v12, %v1896_v11  ;;  %v1494_v47 = vadd.f32 %v1493_v33, %v4739_v21 }
 0x242   : > { %v1495_v41 = vpop.f32.mrf.mxu0  ;;  %v2138_v59 = vpack.c.bf16 %v2024_v9, %v2022_v34 }
 0x243   : > { %v1496_v44 = vadd.f32 %v1495_v41, %v4814_v24  ;;  %v2025_v63 = vsel %vm1769_vm7, %v1490_v45, %v1897_v26  ;;  %v1898_v12 = vmul.f32 0.01, %v1494_v47  ;;  %vm1770_vm10 = vcmp.gt.f32.partialorder %v1494_v47, 0.0 }
 0x244   : > { %v1497_v20 = vpop.f32.mrf.mxu0  ;;  %v2139_v13 = vpack.c.bf16 %v2025_v63, %v2023_v46 }
 0x245   : > { %v1498_v0 = vadd.f32 %v1497_v20, %v4739_v21  ;;  %v1899_v2 = vmul.f32 0.01, %v1496_v44  ;;  %vm1771_vm9 = vcmp.gt.f32.partialorder %v1496_v44, 0.0  ;;  %v2026_v46 = vsel %vm1770_vm10, %v1494_v47, %v1898_v12 }
 0x246   : > { %v1499_v10 = vpop.f32.mrf.mxu0  ;;  %2405 = vmatprep.mubr.bf16.mxu1 %v2139_v13 }
 0x247   : > { %vm1772_vm8 = vcmp.gt.f32.partialorder %v1498_v0, 0.0  ;;  %v1900_v28 = vmul.f32 0.01, %v1498_v0  ;;  %v1500_v16 = vadd.f32 %v1499_v10, %v4814_v24  ;;  %2406 = vmatmul.mubr.bf16.gmra.mxu1 %v2138_v59  ;;  %v2027_v5 = vsel %vm1771_vm9, %v1496_v44, %v1899_v2 }
 0x248   : > { %v1503_v56 = vpop.f32.mrf.mxu0 }
 0x249   : > { %vm1773_vm11 = vcmp.gt.f32.partialorder %v1500_v16, 0.0  ;;  %v1901_v49 = vmul.f32 0.01, %v1500_v16  ;;  %v2028_v45 = vsel %vm1772_vm8, %v1498_v0, %v1900_v28  ;;  %v1504_v26 = vadd.f32 %v1503_v56, %v4739_v21 }
 0x24a   : > { %v1505_v11 = vpop.f32.mrf.mxu0  ;;  %v2140_v20 = vpack.c.bf16 %v2028_v45, %v2026_v46 }
 0x24b   : > { %v1506_v43 = vadd.f32 %v1505_v11, %v4814_v24  ;;  %v2029_v33 = vsel %vm1773_vm11, %v1500_v16, %v1901_v49  ;;  %v1902_v0 = vmul.f32 0.01, %v1504_v26  ;;  %vm1774_vm14 = vcmp.gt.f32.partialorder %v1504_v26, 0.0 }
 0x24c   : > { %v1507_v41 = vpop.f32.mrf.mxu0  ;;  %v2141_v9 = vpack.c.bf16 %v2029_v33, %v2027_v5 }
 0x24d   : > { %v1508_v63 = vadd.f32 %v1507_v41, %v4739_v21  ;;  %v1903_v34 = vmul.f32 0.01, %v1506_v43  ;;  %vm1775_vm13 = vcmp.gt.f32.partialorder %v1506_v43, 0.0  ;;  %v2030_v5 = vsel %vm1774_vm14, %v1504_v26, %v1902_v0 }
 0x24e   : > { %v1509_v13 = vpop.f32.mrf.mxu0  ;;  %2413 = vmatprep.mubr.bf16.mxu1 %v2141_v9 }
 0x24f   : > { %vm1776_vm12 = vcmp.gt.f32.partialorder %v1508_v63, 0.0  ;;  %v1904_v59 = vmul.f32 0.01, %v1508_v63  ;;  %v1510_v10 = vadd.f32 %v1509_v13, %v4814_v24  ;;  %2414 = vmatmul.mubr.bf16.gmra.mxu1 %v2140_v20  ;;  %v2031_v12 = vsel %vm1775_vm13, %v1506_v43, %v1903_v34 }
 0x250   : > { %v1513_v44 = vpop.f32.mrf.mxu0 }
 0x251   : > { %vm1777_vm15 = vcmp.gt.f32.partialorder %v1510_v10, 0.0  ;;  %v1905_v2 = vmul.f32 0.01, %v1510_v10  ;;  %v2032_v16 = vsel %vm1776_vm12, %v1508_v63, %v1904_v59  ;;  %v1514_v49 = vadd.f32 %v1513_v44, %v4739_v21 }
 0x252   : > { %v1515_v28 = vpop.f32.mrf.mxu0  ;;  %v2142_v41 = vpack.c.bf16 %v2032_v16, %v2030_v5 }
 0x253   : > { %v1516_v47 = vadd.f32 %v1515_v28, %v4814_v24  ;;  %v2033_v56 = vsel %vm1777_vm15, %v1510_v10, %v1905_v2  ;;  %v1906_v59 = vmul.f32 0.01, %v1514_v49  ;;  %vm1778_vm3 = vcmp.gt.f32.partialorder %v1514_v49, 0.0 }
 0x254   : > { %v1517_v11 = vpop.f32.mrf.mxu0  ;;  %v2143_v45 = vpack.c.bf16 %v2033_v56, %v2031_v12 }
 0x255   : > { %v1518_v33 = vadd.f32 %v1517_v11, %v4739_v21  ;;  %v1907_v46 = vmul.f32 0.01, %v1516_v47  ;;  %vm1779_vm2 = vcmp.gt.f32.partialorder %v1516_v47, 0.0  ;;  %v2034_v11 = vsel %vm1778_vm3, %v1514_v49, %v1906_v59 }
 0x256   : > { %v1519_v9 = vpop.f32.mrf.mxu0  ;;  %2421 = vmatprep.mubr.bf16.mxu1 %v2143_v45 }
 0x257   : > { %vm1780_vm1 = vcmp.gt.f32.partialorder %v1518_v33, 0.0  ;;  %v1908_v20 = vmul.f32 0.01, %v1518_v33  ;;  %v1520_v13 = vadd.f32 %v1519_v9, %v4814_v24  ;;  %2422 = vmatmul.mubr.bf16.gmra.mxu1 %v2142_v41  ;;  %v899_v63 = vpop.xlane.xlu0 %898  ;;  %v2035_v2 = vsel %vm1779_vm2, %v1516_v47, %v1907_v46 }
 0x258   : > { %v1009_v43 = vmul.f32 0.03125, %v899_v63 }
 0x259   : > { %vm1781_vm4 = vcmp.gt.f32.partialorder %v1520_v13, 0.0  ;;  %v1909_v34 = vmul.f32 0.01, %v1520_v13  ;;  %v2036_v26 = vsel %vm1780_vm1, %v1518_v33, %v1908_v20 }
 0x25a   : > { %v1073_v10 = vadd.f32 1e-05, %v1009_v43  ;;  %v2144_v45 = vpack.c.bf16 %v2036_v26, %v2034_v11 }
 0x25b   : > { %v902_v0 = vpop.xlane.xlu1 %901  ;;  %v574_v44 = vpop.xlane.xlu0 %573  ;;  %v2037_v28 = vsel %vm1781_vm4, %v1520_v13, %v1909_v34 }
 0x25c   : > { %v1010_v16 = vmul.f32 0.03125, %v902_v0  ;;  %v645_v12 = vmul.f32 0.03125, %v574_v44  ;;  %v2145_v56 = vpack.c.bf16 %v2037_v28, %v2035_v2  ;;  %3806 = vrsqrt.f32 %v1073_v10 }
 0x25e   : > { %v1074_v5 = vadd.f32 1e-05, %v1010_v16  ;;  %v4856_v41 = vsub.f32 %v4601_v42, %v645_v12  ;;  %2429 = vmatprep.mubr.bf16.mxu1 %v2145_v56 }
 0x25f   : > { %v577_v9 = vpop.xlane.xlu1 %576  ;;  %2430 = vmatmul.mubr.bf16.gmra.mxu1 %v2144_v45  ;;  %v905_v63 = vpop.xlane.xlu0 %904 }
 0x260   : > { %3808 = vrsqrt.f32 %v1074_v5  ;;  %v646_v33 = vmul.f32 0.03125, %v577_v9  ;;  %v1011_v20 = vmul.f32 0.03125, %v905_v63  ;;  %v773_v47 = vmul.f32 %v4856_v41, %v4856_v41 }
 0x262   : > { %v4861_v46 = vsub.f32 %v4612_v7, %v646_v33  ;;  %v1075_v49 = vadd.f32 1e-05, %v1011_v20  ;;  %v957_v13 = vsel %vm391_vm0, %v773_v47, 0.0 }
 0x263   : > { %v908_v59 = vpop.xlane.xlu1 %907  ;;  %958 = vadd.xlane.f32.xlu0 %v957_v13  ;;  %v580_v42 = vpop.xlane.xlu0 %579 }
 0x264   : > { %v1012_v43 = vmul.f32 0.03125, %v908_v59  ;;  %v647_v34 = vmul.f32 0.03125, %v580_v42  ;;  %v774_v10 = vmul.f32 %v4861_v46, %v4861_v46  ;;  %3810 = vrsqrt.f32 %v1075_v49 }
 0x266   : > { %v1076_v26 = vadd.f32 1e-05, %v1012_v43  ;;  %v4867_v0 = vsub.f32 %v4623_v29, %v647_v34  ;;  %v960_v44 = vsel %vm391_vm0, %v774_v10, 0.0 }
 0x267   : > { %961 = vadd.xlane.f32.xlu1 %v960_v44  ;;  %v583_v7 = vpop.xlane.xlu1 %582 }
 0x268   : > { %3812 = vrsqrt.f32 %v1076_v26  ;;  %v648_v2 = vmul.f32 0.03125, %v583_v7  ;;  %v911_v28 = vpop.xlane.xlu0 %910  ;;  %v775_v16 = vmul.f32 %v4867_v0, %v4867_v0 }
 0x269   : > { %v1013_v12 = vmul.f32 0.03125, %v911_v28  ;;  %v3807_v56 = vpop.eup %3806 }
 0x26a   : > { %v4873_v11 = vsub.f32 %v4634_v60, %v648_v2  ;;  %v963_v45 = vsel %vm391_vm0, %v775_v16, 0.0  ;;  %v1201_v20 = vmul.f32 %v3807_v56, %v4596_v3 }
 0x26b   : > { %v1077_v5 = vadd.f32 1e-05, %v1013_v12  ;;  %v914_v29 = vpop.xlane.xlu1 %913  ;;  %964 = vadd.xlane.f32.xlu0 %v963_v45 }
 0x26c   : > { %v1014_v9 = vmul.f32 0.03125, %v914_v29  ;;  %v776_v63 = vmul.f32 %v4873_v11, %v4873_v11 }
 0x26d   : > { %v3809_v33 = vpop.eup %3808  ;;  %3814 = vrsqrt.f32 %v1077_v5  ;;  %v2615_v5 = vld [vmem:[%s4891_s11 + $0x8] sm:$0xff] }
 0x26e   : > { %v1078_v47 = vadd.f32 1e-05, %v1014_v9  ;;  %v966_v49 = vsel %vm391_vm0, %v776_v63, 0.0  ;;  %v1202_v13 = vmul.f32 %v3809_v33, %v4604_v39  ;;  %v2614_v33 = vld [vmem:[%s4891_s11] sm:$0xff] }
 0x26f   : > { %967 = vadd.xlane.f32.xlu1 %v966_v49 }
 0x270   : > { %3816 = vrsqrt.f32 %v1078_v47  ;;  %v917_v60 = vpop.xlane.xlu0 %916  ;;  %v1245_v59 = vpack.c.bf16 %v1202_v13, %v1201_v20  ;;  %v2616_v13 = vld [vmem:[%s4891_s11 + $0x10] sm:$0xff] }
 0x271   : > { %v1015_v42 = vmul.f32 0.03125, %v917_v60  ;;  %v3811_v43 = vpop.eup %3810  ;;  %v2618_v60 = vld [vmem:[%s4891_s11 + $0x20] sm:$0xff] }
 0x272   : > { %3630 = vmatmul.mubr.msk.bf16.gmra.mxu0 %vm391_vm0, %v1245_v59  ;;  %v1203_v7 = vmul.f32 %v3811_v43, %v4615_v62 }
 0x273   : > { %v1079_v34 = vadd.f32 1e-05, %v1015_v42  ;;  %v920_v10 = vpop.xlane.xlu1 %919  ;;  %1631 = vmatprep.mubr.bf16.mxu0 %v3863_v19 }
 0x274   : > { %v1016_v3 = vmul.f32 0.03125, %v920_v10 }
 0x275   : > { %v3813_v26 = vpop.eup %3812  ;;  %3818 = vrsqrt.f32 %v1079_v34  ;;  %v2617_v34 = vld [vmem:[%s4891_s11 + $0x18] sm:$0xff] }
 0x276   : > { %v1080_v44 = vadd.f32 1e-05, %v1016_v3  ;;  %v1204_v39 = vmul.f32 %v3813_v26, %v4626_v35 }
 0x278   : > { %3820 = vrsqrt.f32 %v1080_v44  ;;  %v923_v2 = vpop.xlane.xlu0 %922  ;;  %v1246_v28 = vpack.c.bf16 %v1204_v39, %v1203_v7  ;;  %v2620_v44 = vld [vmem:[%s4891_s11 + $0x30] sm:$0xff] }
 0x279   : > { %v1017_v16 = vmul.f32 0.03125, %v923_v2 }
 0x27a   : > { %3631 = vmatmul.mubr.msk.bf16.gmra.mxu0 %vm391_vm0, %v1246_v28  ;;  %v3815_v12 = vpop.eup %3814  ;;  %v2619_v28 = vld [vmem:[%s4891_s11 + $0x28] sm:$0xff] }
 0x27b   : > { %v1081_v56 = vadd.f32 1e-05, %v1017_v16  ;;  %v926_v45 = vpop.xlane.xlu1 %925  ;;  %1641 = vmatprep.mubr.bf16.mxu0 %v3863_v19  ;;  %v1205_v9 = vmul.f32 %v3815_v12, %v4640_v54  ;;  %v2622_v16 = vld [vmem:[%s4891_s11 + $0x40] sm:$0xff] }
 0x27c   : > { %v1018_v62 = vmul.f32 0.03125, %v926_v45 }
 0x27d   : > { %v3817_v35 = vpop.eup %3816  ;;  %3822 = vrsqrt.f32 %v1081_v56 }
 0x27e   : > { %v1082_v29 = vadd.f32 1e-05, %v1018_v62  ;;  %v1206_v63 = vmul.f32 %v3817_v35, %v4647_v27  ;;  %v2621_v62 = vld [vmem:[%s4891_s11 + $0x38] sm:$0xff] }
 0x280   : > { %3824 = vrsqrt.f32 %v1082_v29  ;;  %v929_v20 = vpop.xlane.xlu0 %928  ;;  %v1247_v47 = vpack.c.bf16 %v1206_v63, %v1205_v9  ;;  %2808 = vrot.lane.b32.xlu1 %v2615_v5, %s3864_s12  ;;  %v2624_v9 = vld [vmem:[%s4891_s11 + $0x50] sm:$0xff] }
 0x281   : > { %v1019_v49 = vmul.f32 0.03125, %v929_v20  ;;  %2806 = vrot.lane.b32.xlu0 %v2614_v33, %s3864_s12 }
 0x282   : > { %3632 = vmatmul.mubr.msk.bf16.gmra.mxu0 %vm391_vm0, %v1247_v47  ;;  %v3819_v59 = vpop.eup %3818  ;;  %v2623_v47 = vld [vmem:[%s4891_s11 + $0x48] sm:$0xff] }
 0x283   : > { %v1083_v54 = vadd.f32 1e-05, %v1019_v49  ;;  %v932_v42 = vpop.xlane.xlu1 %931  ;;  %1651 = vmatprep.mubr.bf16.mxu0 %v3863_v19  ;;  %v1207_v3 = vmul.f32 %v3819_v59, %v4658_v31  ;;  %v2626_v49 = vld [vmem:[%s4891_s11 + $0x60] sm:$0xff] }
 0x284   : > { %v1020_v27 = vmul.f32 0.03125, %v932_v42  ;;  %2810 = vrot.lane.b32.xlu1 %v2616_v13, %s3864_s12 }
 0x285   : > { %v3821_v43 = vpop.eup %3820  ;;  %2814 = vrot.lane.b32.xlu0 %v2618_v60, %s3864_s12  ;;  %3826 = vrsqrt.f32 %v1083_v54  ;;  %v2625_v54 = vld [vmem:[%s4891_s11 + $0x58] sm:$0xff] }
 0x286   : > { %v1084_v10 = vadd.f32 1e-05, %v1020_v27  ;;  %v1208_v26 = vmul.f32 %v3821_v43, %v4663_v36 }
 0x288   : > { %3828 = vrsqrt.f32 %v1084_v10  ;;  %v935_v7 = vpop.xlane.xlu0 %934  ;;  %v1248_v39 = vpack.c.bf16 %v1208_v26, %v1207_v3  ;;  %2812 = vrot.lane.b32.xlu1 %v2617_v34, %s3864_s12  ;;  %v2628_v34 = vld [vmem:[%s4891_s11 + $0x70] sm:$0xff] }
 0x289   : > { %v1021_v2 = vmul.f32 0.03125, %v935_v7  ;;  %2818 = vrot.lane.b32.xlu0 %v2620_v44, %s3864_s12  ;;  %v2627_v44 = vld [vmem:[%s4891_s11 + $0x68] sm:$0xff]  ;;  %v2630_v7 = vld [vmem:[%s4891_s11 + $0x80] sm:$0xff] }
 0x28a   : > { %3633 = vmatmul.mubr.msk.bf16.gmra.mxu0 %vm391_vm0, %v1248_v39  ;;  %v3823_v12 = vpop.eup %3822 }
 0x28b   : > { %v1085_v56 = vadd.f32 1e-05, %v1021_v2  ;;  %v938_v31 = vpop.xlane.xlu1 %937  ;;  %1661 = vmatprep.mubr.bf16.mxu0 %v3863_v19  ;;  %v1209_v5 = vmul.f32 %v3823_v12, %v4674_v48  ;;  %v2629_v12 = vld [vmem:[%s4891_s11 + $0x78] sm:$0xff] }
 0x28c   : > { %v1022_v36 = vmul.f32 0.03125, %v938_v31  ;;  %2816 = vrot.lane.b32.xlu1 %v2619_v28, %s3864_s12 }
 0x28d   : > { %v3825_v45 = vpop.eup %3824  ;;  %2822 = vrot.lane.b32.xlu0 %v2622_v16, %s3864_s12  ;;  %3830 = vrsqrt.f32 %v1085_v56 }
 0x28e   : > { %v1086_v35 = vadd.f32 1e-05, %v1022_v36  ;;  %v1210_v29 = vmul.f32 %v3825_v45, %v4679_v6  ;;  %v2632_v36 = vld [vmem:[%s4891_s11 + $0x90] sm:$0xff] }
 0x290   : > { %3832 = vrsqrt.f32 %v1086_v35  ;;  %v941_v63 = vpop.xlane.xlu0 %940  ;;  %v1249_v33 = vpack.c.bf16 %v1210_v29, %v1209_v5  ;;  %2820 = vrot.lane.b32.xlu1 %v2621_v62, %s3864_s12 }
 0x291   : > { %v1023_v20 = vmul.f32 0.03125, %v941_v63  ;;  %2826 = vrot.lane.b32.xlu0 %v2624_v9, %s3864_s12 }
 0x292   : > { %3634 = vmatmul.mubr.msk.bf16.gmra.mxu0 %vm391_vm0, %v1249_v33  ;;  %v3827_v13 = vpop.eup %3826 }
 0x293   : > { %v1087_v60 = vadd.f32 1e-05, %v1023_v20  ;;  %v944_v48 = vpop.xlane.xlu1 %943  ;;  %1671 = vmatprep.mubr.bf16.mxu0 %v3863_v19  ;;  %v1211_v27 = vmul.f32 %v3827_v13, %v4690_v57  ;;  %v2634_v20 = vld [vmem:[%s4891_s11 + $0xa0] sm:$0xff] }
 0x294   : > { %v1024_v6 = vmul.f32 0.03125, %v944_v48  ;;  %2824 = vrot.lane.b32.xlu1 %v2623_v47, %s3864_s12 }
 0x295   : > { %v3829_v59 = vpop.eup %3828  ;;  %2830 = vrot.lane.b32.xlu0 %v2626_v49, %s3864_s12  ;;  %3834 = vrsqrt.f32 %v1087_v60 }
 0x296   : > { %v1088_v42 = vadd.f32 1e-05, %v1024_v6  ;;  %v1212_v43 = vmul.f32 %v3829_v59, %v4695_v15 }
 0x298   : > { %3836 = vrsqrt.f32 %v1088_v42  ;;  %v947_v10 = vpop.xlane.xlu0 %946  ;;  %v1250_v3 = vpack.c.bf16 %v1212_v43, %v1211_v27  ;;  %2828 = vrot.lane.b32.xlu1 %v2625_v54, %s3864_s12 }
 0x299   : > { %v1025_v26 = vmul.f32 0.03125, %v947_v10  ;;  %2834 = vrot.lane.b32.xlu0 %v2628_v34, %s3864_s12  ;;  %v2633_v34 = vld [vmem:[%s4891_s11 + $0x98] sm:$0xff] }
 0x29a   : > { %3635 = vmatmul.mubr.msk.bf16.gmra.mxu0 %vm391_vm0, %v1250_v3  ;;  %v3831_v39 = vpop.eup %3830 }
 0x29b   : > { %v1089_v2 = vadd.f32 1e-05, %v1025_v26  ;;  %1681 = vmatprep.mubr.bf16.mxu0 %v3863_v19  ;;  %v950_v57 = vpop.xlane.xlu1 %949  ;;  %v1213_v56 = vmul.f32 %v3831_v39, %v4706_v4  ;;  %v2631_v4 = vld [vmem:[%s4891_s11 + $0x88] sm:$0xff] }
 0x29c   : > { %2832 = vrot.lane.b32.xlu1 %v2627_v44, %s3864_s12  ;;  %v1026_v28 = vmul.f32 0.03125, %v950_v57  ;;  %v2636_v44 = vld [vmem:[%s4891_s11 + $0xb0] sm:$0xff] }
 0x29d   : > { %v3833_v15 = vpop.eup %3832  ;;  %v1523_v16 = vpop.f32.mrf.mxu0  ;;  %2838 = vrot.lane.b32.xlu0 %v2630_v7, %s3864_s12  ;;  %3838 = vrsqrt.f32 %v1089_v2 }
 0x29e   : > { %v1214_v31 = vmul.f32 %v3833_v15, %v4713_v30  ;;  %v1090_v45 = vadd.f32 1e-05, %v1026_v28  ;;  %v1524_v35 = vadd.f32 %v1523_v16, %v4739_v21 }
 0x29f   : > { %v1525_v62 = vpop.f32.mrf.mxu0 }
 0x2a0   : > { %v953_v5 = vpop.xlane.xlu0 %952  ;;  %v1251_v29 = vpack.c.bf16 %v1214_v31, %v1213_v56  ;;  %2836 = vrot.lane.b32.xlu1 %v2629_v12, %s3864_s12  ;;  %3840 = vrsqrt.f32 %v1090_v45  ;;  %v1526_v9 = vadd.f32 %v1525_v62, %v4814_v24  ;;  %v1910_v60 = vmul.f32 0.01, %v1524_v35  ;;  %v2638_v45 = vld [vmem:[%s4891_s11 + $0xc0] sm:$0xff] }
 0x2a1   : > { %v1027_v63 = vmul.f32 0.03125, %v953_v5  ;;  %v1527_v33 = vpop.f32.mrf.mxu0  ;;  %2842 = vrot.lane.b32.xlu0 %v2632_v36, %s3864_s12  ;;  %vm1782_vm8 = vcmp.gt.f32.partialorder %v1524_v35, 0.0 }
 0x2a2   : > { %v1528_v30 = vadd.f32 %v1527_v33, %v4739_v21  ;;  %3636 = vmatmul.mubr.msk.bf16.gmra.mxu0 %vm391_vm0, %v1251_v29  ;;  %v3835_v47 = vpop.eup %3834  ;;  %vm1783_vm5 = vcmp.gt.f32.partialorder %v1526_v9, 0.0  ;;  %v1911_v42 = vmul.f32 0.01, %v1526_v9  ;;  %v2038_v36 = vsel %vm1782_vm8, %v1524_v35, %v1910_v60  ;;  %v2637_v35 = vld [vmem:[%s4891_s11 + $0xb8] sm:$0xff] }
 0x2a3   : > { %v1091_v49 = vadd.f32 1e-05, %v1027_v63  ;;  %v1529_v13 = vpop.f32.mrf.mxu0  ;;  %1691 = vmatprep.mubr.bf16.mxu0 %v3863_v19  ;;  %v956_v6 = vpop.xlane.xlu1 %955  ;;  %v1215_v3 = vmul.f32 %v3835_v47, %v4725_v23 }
 0x2a4   : > { %v1912_v48 = vmul.f32 0.01, %v1528_v30  ;;  %v1530_v59 = vadd.f32 %v1529_v13, %v4814_v24  ;;  %2840 = vrot.lane.b32.xlu1 %v2631_v4, %s3864_s12  ;;  %vm1784_vm6 = vcmp.gt.f32.partialorder %v1528_v30, 0.0  ;;  %v1028_v27 = vmul.f32 0.03125, %v956_v6 }
 0x2a5   : > { %v3837_v54 = vpop.eup %3836  ;;  %v1533_v43 = vpop.f32.mrf.mxu0  ;;  %2846 = vrot.lane.b32.xlu0 %v2634_v20, %s3864_s12  ;;  %3842 = vrsqrt.f32 %v1091_v49  ;;  %v2039_v23 = vsel %vm1783_vm5, %v1526_v9, %v1911_v42  ;;  %v2640_v49 = vld [vmem:[%s4891_s11 + $0xd0] sm:$0xff] }
 0x2a6   : > { %vm1785_vm7 = vcmp.gt.f32.partialorder %v1530_v59, 0.0  ;;  %v1913_v10 = vmul.f32 0.01, %v1530_v59  ;;  %v1216_v26 = vmul.f32 %v3837_v54, %v4735_v17  ;;  %v1092_v7 = vadd.f32 1e-05, %v1028_v27  ;;  %v2635_v17 = vld [vmem:[%s4891_s11 + $0xa8] sm:$0xff] }
 0x2a7   : > { %v1535_v39 = vpop.f32.mrf.mxu0  ;;  %v2040_v15 = vsel %vm1784_vm6, %v1528_v30, %v1912_v48  ;;  %v1534_v12 = vadd.f32 %v1533_v43, %v4739_v21 }
 0x2a8   : > { %v1536_v2 = vadd.f32 %v1535_v39, %v4814_v24  ;;  %v1252_v57 = vpack.c.bf16 %v1216_v26, %v1215_v3  ;;  %2844 = vrot.lane.b32.xlu1 %v2633_v34, %s3864_s12  ;;  %3844 = vrsqrt.f32 %v1092_v7  ;;  %v2041_v16 = vsel %vm1785_vm7, %v1530_v59, %v1913_v10  ;;  %v2639_v10 = vld [vmem:[%s4891_s11 + $0xc8] sm:$0xff]  ;;  %v2642_v26 = vld [vmem:[%s4891_s11 + $0xe0] sm:$0xff] }
 0x2a9   : > { %v1537_v28 = vpop.f32.mrf.mxu0  ;;  %2850 = vrot.lane.b32.xlu0 %v2636_v44, %s3864_s12  ;;  %v2147_v31 = vpack.c.bf16 %v2041_v16, %v2039_v23  ;;  %v2146_v5 = vpack.c.bf16 %v2040_v15, %v2038_v36  ;;  %v1914_v20 = vmul.f32 0.01, %v1534_v12  ;;  %vm1786_vm12 = vcmp.gt.f32.partialorder %v1534_v12, 0.0  ;;  %v2641_v23 = vld [vmem:[%s4891_s11 + $0xd8] sm:$0xff] }
 0x2aa   : > { %v1538_v56 = vadd.f32 %v1537_v28, %v4739_v21  ;;  %3637 = vmatmul.mubr.msk.bf16.gmra.mxu0 %vm391_vm0, %v1252_v57  ;;  %v3839_v29 = vpop.eup %3838  ;;  %v1915_v9 = vmul.f32 0.01, %v1536_v2  ;;  %vm1787_vm9 = vcmp.gt.f32.partialorder %v1536_v2, 0.0 }
 0x2ab   : > { %v1539_v62 = vpop.f32.mrf.mxu0  ;;  %1701 = vmatprep.mubr.bf16.mxu0 %v3863_v19  ;;  %2437 = vmatprep.mubr.bf16.mxu1 %v2147_v31  ;;  %v1217_v60 = vmul.f32 %v3839_v29, %v4749_v1 }
 0x2ac   : > { %v1916_v63 = vmul.f32 0.01, %v1538_v56  ;;  %v1540_v33 = vadd.f32 %v1539_v62, %v4814_v24  ;;  %2848 = vrot.lane.b32.xlu1 %v2635_v17, %s3864_s12  ;;  %vm1788_vm10 = vcmp.gt.f32.partialorder %v1538_v56, 0.0  ;;  %2438 = vmatmul.mubr.bf16.gmra.mxu1 %v2146_v5  ;;  %v2043_v59 = vsel %vm1787_vm9, %v1536_v2, %v1915_v9 }
 0x2ad   : > { %v1543_v4 = vpop.f32.mrf.mxu0  ;;  %2854 = vrot.lane.b32.xlu0 %v2638_v45, %s3864_s12  ;;  %v3841_v30 = vpop.eup %3840 }
 0x2ae   : > { %vm1789_vm11 = vcmp.gt.f32.partialorder %v1540_v33, 0.0  ;;  %v1917_v47 = vmul.f32 0.01, %v1540_v33  ;;  %v1218_v48 = vmul.f32 %v3841_v30, %v4757_v40  ;;  %v2044_v42 = vsel %vm1788_vm10, %v1538_v56, %v1916_v63  ;;  %v2644_v56 = vld [vmem:[%s4891_s11 + $0xf0] sm:$0xff] }
 0x2af   : > { %v1545_v13 = vpop.f32.mrf.mxu0  ;;  %v1544_v3 = vadd.f32 %v1543_v4, %v4739_v21  ;;  %v2042_v40 = vsel %vm1786_vm12, %v1534_v12, %v1914_v20  ;;  %v2646_v20 = vld [vmem:[%s4891_s11 + $0x100] sm:$0xff] }
 0x2b0   : > { %v1546_v6 = vadd.f32 %v1545_v13, %v4814_v24  ;;  %v2045_v54 = vsel %vm1789_vm11, %v1540_v33, %v1917_v47  ;;  %2852 = vrot.lane.b32.xlu1 %v2637_v35, %s3864_s12  ;;  %v1253_v43 = vpack.c.bf16 %v1218_v48, %v1217_v60  ;;  %v2148_v7 = vpack.c.bf16 %v2044_v42, %v2042_v40  ;;  %v2643_v35 = vld [vmem:[%s4891_s11 + $0xe8] sm:$0xff] }
 0x2b1   : > { %v1547_v27 = vpop.f32.mrf.mxu0  ;;  %v2149_v34 = vpack.c.bf16 %v2045_v54, %v2043_v59  ;;  %2858 = vrot.lane.b32.xlu0 %v2640_v49, %s3864_s12  ;;  %v1918_v17 = vmul.f32 0.01, %v1544_v3  ;;  %vm1790_vm1 = vcmp.gt.f32.partialorder %v1544_v3, 0.0  ;;  %v2645_v59 = vld [vmem:[%s4891_s11 + $0xf8] sm:$0xff] }
 0x2b2   : > { %v1548_v1 = vadd.f32 %v1547_v27, %v4739_v21  ;;  %3638 = vmatmul.mubr.msk.bf16.gmra.mxu0 %vm391_vm0, %v1253_v43  ;;  %v3843_v39 = vpop.eup %3842  ;;  %v1919_v2 = vmul.f32 0.01, %v1546_v6  ;;  %vm1791_vm13 = vcmp.gt.f32.partialorder %v1546_v6, 0.0  ;;  %v2648_v27 = vld [vmem:[%s4891_s11 + $0x110] sm:$0xff] }
 0x2b3   : > { %v1549_v44 = vpop.f32.mrf.mxu0  ;;  %2445 = vmatprep.mubr.bf16.mxu1 %v2149_v34  ;;  %1711 = vmatprep.mubr.bf16.mxu0 %v3863_v19  ;;  %v1219_v36 = vmul.f32 %v3843_v39, %v4775_v22 }
 0x2b4   : > { %v1920_v57 = vmul.f32 0.01, %v1548_v1  ;;  %v1550_v15 = vadd.f32 %v1549_v44, %v4814_v24  ;;  %2856 = vrot.lane.b32.xlu1 %v2639_v10, %s3864_s12  ;;  %vm1792_vm14 = vcmp.gt.f32.partialorder %v1548_v1, 0.0  ;;  %2446 = vmatmul.mubr.bf16.gmra.mxu1 %v2148_v7  ;;  %v2047_v5 = vsel %vm1791_vm13, %v1546_v6, %v1919_v2  ;;  %v2647_v44 = vld [vmem:[%s4891_s11 + $0x108] sm:$0xff] }
 0x2b5   : > { %v1553_v28 = vpop.f32.mrf.mxu0  ;;  %2862 = vrot.lane.b32.xlu0 %v2642_v26, %s3864_s12  ;;  %v3845_v16 = vpop.eup %3844 }
 0x2b6   : > { %vm1793_vm15 = vcmp.gt.f32.partialorder %v1550_v15, 0.0  ;;  %v1921_v12 = vmul.f32 0.01, %v1550_v15  ;;  %v1220_v45 = vmul.f32 %v3845_v16, %v4786_v18  ;;  %v2048_v9 = vsel %vm1792_vm14, %v1548_v1, %v1920_v57  ;;  %v2650_v57 = vld [vmem:[%s4891_s11 + $0x120] sm:$0xff] }
 0x2b7   : > { %v1555_v31 = vpop.f32.mrf.mxu0  ;;  %v1554_v30 = vadd.f32 %v1553_v28, %v4739_v21  ;;  %v2046_v18 = vsel %vm1790_vm1, %v1544_v3, %v1918_v17 }
 0x2b8   : > { %v1556_v62 = vadd.f32 %v1555_v31, %v4814_v24  ;;  %v2049_v29 = vsel %vm1793_vm15, %v1550_v15, %v1921_v12  ;;  %2860 = vrot.lane.b32.xlu1 %v2641_v23, %s3864_s12  ;;  %v1254_v33 = vpack.c.bf16 %v1220_v45, %v1219_v36  ;;  %v2150_v49 = vpack.c.bf16 %v2048_v9, %v2046_v18  ;;  %v2652_v45 = vld [vmem:[%s4891_s11 + $0x130] sm:$0xff] }
 0x2b9   : > { %v1557_v63 = vpop.f32.mrf.mxu0  ;;  %v2151_v4 = vpack.c.bf16 %v2049_v29, %v2047_v5  ;;  %2866 = vrot.lane.b32.xlu0 %v2644_v56, %s3864_s12  ;;  %v1922_v54 = vmul.f32 0.01, %v1554_v30  ;;  %vm1794_vm5 = vcmp.gt.f32.partialorder %v1554_v30, 0.0  ;;  %v2649_v56 = vld [vmem:[%s4891_s11 + $0x118] sm:$0xff] }
 0x2ba   : > { %v1558_v22 = vadd.f32 %v1557_v63, %v4739_v21  ;;  %3639 = vmatmul.mubr.msk.bf16.gmra.mxu0 %vm391_vm0, %v1254_v33  ;;  %v1923_v13 = vmul.f32 0.01, %v1556_v62  ;;  %vm1795_vm2 = vcmp.gt.f32.partialorder %v1556_v62, 0.0 }
 0x2bb   : > { %v1559_v47 = vpop.f32.mrf.mxu0  ;;  %2453 = vmatprep.mubr.bf16.mxu1 %v2151_v4  ;;  %1721 = vmatprep.mubr.bf16.mxu0 %v3863_v19  ;;  %v2050_v2 = vsel %vm1794_vm5, %v1554_v30, %v1922_v54 }
 0x2bc   : > { %v1924_v60 = vmul.f32 0.01, %v1558_v22  ;;  %v1560_v48 = vadd.f32 %v1559_v47, %v4814_v24  ;;  %2864 = vrot.lane.b32.xlu1 %v2643_v35, %s3864_s12  ;;  %vm1796_vm3 = vcmp.gt.f32.partialorder %v1558_v22, 0.0  ;;  %2454 = vmatmul.mubr.bf16.gmra.mxu1 %v2150_v49  ;;  %v2051_v10 = vsel %vm1795_vm2, %v1556_v62, %v1923_v13  ;;  %v2651_v35 = vld [vmem:[%s4891_s11 + $0x128] sm:$0xff] }
 0x2bd   : > { %v1563_v6 = vpop.f32.mrf.mxu0  ;;  %2870 = vrot.lane.b32.xlu0 %v2646_v20, %s3864_s12  ;;  %v2654_v20 = vld [vmem:[%s4891_s11 + $0x140] sm:$0xff] }
 0x2be   : > { %vm1797_vm4 = vcmp.gt.f32.partialorder %v1560_v48, 0.0  ;;  %v1925_v42 = vmul.f32 0.01, %v1560_v48  ;;  %v2052_v1 = vsel %vm1796_vm3, %v1558_v22, %v1924_v60  ;;  %v1564_v7 = vadd.f32 %v1563_v6, %v4739_v21  ;;  %v2653_v6 = vld [vmem:[%s4891_s11 + $0x138] sm:$0xff] }
 0x2bf   : > { %v1565_v43 = vpop.f32.mrf.mxu0  ;;  %v2152_v28 = vpack.c.bf16 %v2052_v1, %v2050_v2  ;;  %v2658_v2 = vld [vmem:[%s4891_s11 + $0x160] sm:$0xff] }
 0x2c0   : > { %v1566_v34 = vadd.f32 %v1565_v43, %v4814_v24  ;;  %v2053_v3 = vsel %vm1797_vm4, %v1560_v48, %v1925_v42  ;;  %2868 = vrot.lane.b32.xlu1 %v2645_v59, %s3864_s12  ;;  %v1926_v31 = vmul.f32 0.01, %v1564_v7  ;;  %vm1798_vm9 = vcmp.gt.f32.partialorder %v1564_v7, 0.0 }
 0x2c1   : > { %v1567_v40 = vpop.f32.mrf.mxu0  ;;  %v2153_v26 = vpack.c.bf16 %v2053_v3, %v2051_v10  ;;  %2874 = vrot.lane.b32.xlu0 %v2648_v27, %s3864_s12  ;;  %v2656_v27 = vld [vmem:[%s4891_s11 + $0x150] sm:$0xff] }
 0x2c2   : > { %v1568_v39 = vadd.f32 %v1567_v40, %v4739_v21  ;;  %v1927_v23 = vmul.f32 0.01, %v1566_v34  ;;  %vm1799_vm6 = vcmp.gt.f32.partialorder %v1566_v34, 0.0  ;;  %v2054_v18 = vsel %vm1798_vm9, %v1564_v7, %v1926_v31  ;;  %v2660_v31 = vld [vmem:[%s4891_s11 + $0x170] sm:$0xff] }
 0x2c3   : > { %v1569_v15 = vpop.f32.mrf.mxu0  ;;  %2461 = vmatprep.mubr.bf16.mxu1 %v2153_v26  ;;  %v2655_v26 = vld [vmem:[%s4891_s11 + $0x148] sm:$0xff] }
 0x2c4   : > { %v1928_v16 = vmul.f32 0.01, %v1568_v39  ;;  %v1570_v17 = vadd.f32 %v1569_v15, %v4814_v24  ;;  %2872 = vrot.lane.b32.xlu1 %v2647_v44, %s3864_s12  ;;  %vm1800_vm7 = vcmp.gt.f32.partialorder %v1568_v39, 0.0  ;;  %2462 = vmatmul.mubr.bf16.gmra.mxu1 %v2152_v28  ;;  %v2055_v29 = vsel %vm1799_vm6, %v1566_v34, %v1927_v23 }
 0x2c5   : > { %v1573_v12 = vpop.f32.mrf.mxu0  ;;  %2878 = vrot.lane.b32.xlu0 %v2650_v57, %s3864_s12 }
 0x2c6   : > { %vm1801_vm8 = vcmp.gt.f32.partialorder %v1570_v17, 0.0  ;;  %v1929_v36 = vmul.f32 0.01, %v1570_v17  ;;  %v2056_v63 = vsel %vm1800_vm7, %v1568_v39, %v1928_v16  ;;  %v1574_v30 = vadd.f32 %v1573_v12, %v4739_v21  ;;  %v2657_v12 = vld [vmem:[%s4891_s11 + $0x158] sm:$0xff] }
 0x2c7   : > { %v1575_v62 = vpop.f32.mrf.mxu0  ;;  %v2154_v49 = vpack.c.bf16 %v2056_v63, %v2054_v18 }
 0x2c8   : > { %v1576_v5 = vadd.f32 %v1575_v62, %v4814_v24  ;;  %v2057_v9 = vsel %vm1801_vm8, %v1570_v17, %v1929_v36  ;;  %2876 = vrot.lane.b32.xlu1 %v2649_v56, %s3864_s12  ;;  %v1930_v59 = vmul.f32 0.01, %v1574_v30  ;;  %vm1802_vm13 = vcmp.gt.f32.partialorder %v1574_v30, 0.0 }
 0x2c9   : > { %v1577_v33 = vpop.f32.mrf.mxu0  ;;  %v2155_v4 = vpack.c.bf16 %v2057_v9, %v2055_v29  ;;  %2882 = vrot.lane.b32.xlu0 %v2652_v45, %s3864_s12  ;;  %v2659_v9 = vld [vmem:[%s4891_s11 + $0x168] sm:$0xff] }
 0x2ca   : > { %v1578_v22 = vadd.f32 %v1577_v33, %v4739_v21  ;;  %v1931_v13 = vmul.f32 0.01, %v1576_v5  ;;  %vm1803_vm10 = vcmp.gt.f32.partialorder %v1576_v5, 0.0  ;;  %v2058_v39 = vsel %vm1802_vm13, %v1574_v30, %v1930_v59 }
 0x2cb   : > { %v1579_v47 = vpop.f32.mrf.mxu0  ;;  %2469 = vmatprep.mubr.bf16.mxu1 %v2155_v4 }
 0x2cc   : > { %v1932_v60 = vmul.f32 0.01, %v1578_v22  ;;  %v1580_v48 = vadd.f32 %v1579_v47, %v4814_v24  ;;  %2880 = vrot.lane.b32.xlu1 %v2651_v35, %s3864_s12  ;;  %vm1804_vm11 = vcmp.gt.f32.partialorder %v1578_v22, 0.0  ;;  %2470 = vmatmul.mubr.bf16.gmra.mxu1 %v2154_v49  ;;  %v2059_v34 = vsel %vm1803_vm10, %v1576_v5, %v1931_v13  ;;  %v2662_v35 = vld [vmem:[%s4891_s11 + $0x180] sm:$0xff]  ;;  %v2661_v49 = vld [vmem:[%s4891_s11 + $0x178] sm:$0xff] }
 0x2cd   : > { %2886 = vrot.lane.b32.xlu0 %v2654_v20, %s3864_s12  ;;  %v1583_v42 = vpop.f32.mrf.mxu0 }
 0x2ce   : > { %vm1805_vm12 = vcmp.gt.f32.partialorder %v1580_v48, 0.0  ;;  %v1933_v54 = vmul.f32 0.01, %v1580_v48  ;;  %v2060_v3 = vsel %vm1804_vm11, %v1578_v22, %v1932_v60  ;;  %v1584_v44 = vadd.f32 %v1583_v42, %v4739_v21  ;;  %v2664_v60 = vld [vmem:[%s4891_s11 + $0x190] sm:$0xff] }
 0x2cf   : > { %v1585_v43 = vpop.f32.mrf.mxu0  ;;  %v2156_v15 = vpack.c.bf16 %v2060_v3, %v2058_v39  ;;  %v2666_v3 = vld [vmem:[%s4891_s11 + $0x1a0] sm:$0xff] }
 0x2d0   : > { %v2061_v10 = vsel %vm1805_vm12, %v1580_v48, %v1933_v54  ;;  %2884 = vrot.lane.b32.xlu1 %v2653_v6, %s3864_s12  ;;  %v1586_v1 = vadd.f32 %v1585_v43, %v4814_v24  ;;  %v1934_v56 = vmul.f32 0.01, %v1584_v44  ;;  %vm1806_vm1 = vcmp.gt.f32.partialorder %v1584_v44, 0.0  ;;  %v2663_v43 = vld [vmem:[%s4891_s11 + $0x188] sm:$0xff] }
 0x2d1   : > { %v2157_v40 = vpack.c.bf16 %v2061_v10, %v2059_v34  ;;  %2890 = vrot.lane.b32.xlu0 %v2656_v27, %s3864_s12  ;;  %v1587_v7 = vpop.f32.mrf.mxu0 }
 0x2d2   : > { %v1588_v57 = vadd.f32 %v1587_v7, %v4739_v21  ;;  %v1935_v23 = vmul.f32 0.01, %v1586_v1  ;;  %vm1807_vm15 = vcmp.gt.f32.partialorder %v1586_v1, 0.0  ;;  %v2062_v4 = vsel %vm1806_vm1, %v1584_v44, %v1934_v56 }
 0x2d3   : > { %2477 = vmatprep.mubr.bf16.mxu1 %v2157_v40  ;;  %v1589_v28 = vpop.f32.mrf.mxu0 }
 0x2d4   : > { %2888 = vrot.lane.b32.xlu1 %v2655_v26, %s3864_s12  ;;  %vm1808_vm14 = vcmp.gt.f32.partialorder %v1588_v57, 0.0  ;;  %v1936_v16 = vmul.f32 0.01, %v1588_v57  ;;  %v1590_v17 = vadd.f32 %v1589_v28, %v4814_v24  ;;  %2478 = vmatmul.mubr.bf16.gmra.mxu1 %v2156_v15  ;;  %v2063_v5 = vsel %vm1807_vm15, %v1586_v1, %v1935_v23  ;;  %v2665_v28 = vld [vmem:[%s4891_s11 + $0x198] sm:$0xff] }
 0x2d5   : > { %2894 = vrot.lane.b32.xlu0 %v2658_v2, %s3864_s12 }
 0x2d6   : > { %vm1809_vm2 = vcmp.gt.f32.partialorder %v1590_v17, 0.0  ;;  %v1937_v36 = vmul.f32 0.01, %v1590_v17  ;;  %v1593_v45 = vpop.f32.mrf.mxu0  ;;  %v2064_v62 = vsel %vm1808_vm14, %v1588_v57, %v1936_v16  ;;  %v2668_v16 = vld [vmem:[%s4891_s11 + $0x1b0] sm:$0xff] }
 0x2d7   : > { %v2158_v22 = vpack.c.bf16 %v2064_v62, %v2062_v4  ;;  %v1594_v18 = vadd.f32 %v1593_v45, %v4739_v21  ;;  %v2667_v62 = vld [vmem:[%s4891_s11 + $0x1a8] sm:$0xff] }
 0x2d8   : > { %2892 = vrot.lane.b32.xlu1 %v2657_v12, %s3864_s12  ;;  %v2065_v29 = vsel %vm1809_vm2, %v1590_v17, %v1937_v36  ;;  %v1595_v63 = vpop.f32.mrf.mxu0 }
 0x2d9   : > { %2898 = vrot.lane.b32.xlu0 %v2660_v31, %s3864_s12  ;;  %v2159_v33 = vpack.c.bf16 %v2065_v29, %v2063_v5  ;;  %v1596_v30 = vadd.f32 %v1595_v63, %v4814_v24  ;;  %v1938_v54 = vmul.f32 0.01, %v1594_v18  ;;  %vm1810_vm5 = vcmp.gt.f32.partialorder %v1594_v18, 0.0 }
 0x2da   : > { %v1597_v20 = vpop.f32.mrf.mxu0 }
 0x2db   : > { %2485 = vmatprep.mubr.bf16.mxu1 %v2159_v33  ;;  %v1598_v47 = vadd.f32 %v1597_v20, %v4739_v21  ;;  %v1939_v48 = vmul.f32 0.01, %v1596_v30  ;;  %vm1811_vm4 = vcmp.gt.f32.partialorder %v1596_v30, 0.0  ;;  %v2066_v2 = vsel %vm1810_vm5, %v1594_v18, %v1938_v54 }
 0x2dc   : > { %2896 = vrot.lane.b32.xlu1 %v2659_v9, %s3864_s12  ;;  %2486 = vmatmul.mubr.bf16.gmra.mxu1 %v2158_v22  ;;  %v1599_v13 = vpop.f32.mrf.mxu0  ;;  %v2670_v9 = vld [vmem:[%s4891_s11 + $0x1c0] sm:$0xff] }
 0x2dd   : > { %2902 = vrot.lane.b32.xlu0 %v2662_v35, %s3864_s12  ;;  %vm1812_vm3 = vcmp.gt.f32.partialorder %v1598_v47, 0.0  ;;  %v1940_v6 = vmul.f32 0.01, %v1598_v47  ;;  %v1600_v59 = vadd.f32 %v1599_v13, %v4814_v24  ;;  %v2067_v40 = vsel %vm1811_vm4, %v1596_v30, %v1939_v48 }
 0x2de   : > { %v1603_v42 = vpop.f32.mrf.mxu0 }
 0x2df   : > { %vm1813_vm6 = vcmp.gt.f32.partialorder %v1600_v59, 0.0  ;;  %v1941_v27 = vmul.f32 0.01, %v1600_v59  ;;  %v2068_v10 = vsel %vm1812_vm3, %v1598_v47, %v1940_v6  ;;  %v1604_v44 = vadd.f32 %v1603_v42, %v4739_v21 }
 0x2e0   : > { %2900 = vrot.lane.b32.xlu1 %v2661_v49, %s3864_s12  ;;  %v1605_v34 = vpop.f32.mrf.mxu0  ;;  %v2160_v15 = vpack.c.bf16 %v2068_v10, %v2066_v2 }
 0x2e1   : > { %2906 = vrot.lane.b32.xlu0 %v2664_v60, %s3864_s12  ;;  %v1606_v1 = vadd.f32 %v1605_v34, %v4814_v24  ;;  %v2069_v26 = vsel %vm1813_vm6, %v1600_v59, %v1941_v27  ;;  %v1942_v31 = vmul.f32 0.01, %v1604_v44  ;;  %vm1814_vm9 = vcmp.gt.f32.partialorder %v1604_v44, 0.0  ;;  %v2669_v60 = vld [vmem:[%s4891_s11 + $0x1b8] sm:$0xff]  ;;  %v2672_v59 = vld [vmem:[%s4891_s11 + $0x1d0] sm:$0xff] }
 0x2e2   : > { %v1607_v7 = vpop.f32.mrf.mxu0  ;;  %v2161_v39 = vpack.c.bf16 %v2069_v26, %v2067_v40  ;;  %v2671_v26 = vld [vmem:[%s4891_s11 + $0x1c8] sm:$0xff] }
 0x2e3   : > { %v1608_v57 = vadd.f32 %v1607_v7, %v4739_v21  ;;  %v1943_v17 = vmul.f32 0.01, %v1606_v1  ;;  %vm1815_vm8 = vcmp.gt.f32.partialorder %v1606_v1, 0.0  ;;  %v2070_v18 = vsel %vm1814_vm9, %v1604_v44, %v1942_v31  ;;  %v2674_v7 = vld [vmem:[%s4891_s11 + $0x1e0] sm:$0xff]  ;;  %v2673_v31 = vld [vmem:[%s4891_s11 + $0x1d8] sm:$0xff] }
 0x2e4   : > { %2904 = vrot.lane.b32.xlu1 %v2663_v43, %s3864_s12  ;;  %v1609_v23 = vpop.f32.mrf.mxu0  ;;  %2493 = vmatprep.mubr.bf16.mxu1 %v2161_v39 }
 0x2e5   : > { %2910 = vrot.lane.b32.xlu0 %v2666_v3, %s3864_s12  ;;  %vm1816_vm7 = vcmp.gt.f32.partialorder %v1608_v57, 0.0  ;;  %v1944_v12 = vmul.f32 0.01, %v1608_v57  ;;  %v1610_v56 = vadd.f32 %v1609_v23, %v4814_v24  ;;  %2494 = vmatmul.mubr.bf16.gmra.mxu1 %v2160_v15  ;;  %v2071_v33 = vsel %vm1815_vm8, %v1606_v1, %v1943_v17 }
 0x2e6   : > { %v1613_v36 = vpop.f32.mrf.mxu0 }
 0x2e7   : > { %vm1817_vm10 = vcmp.gt.f32.partialorder %v1610_v56, 0.0  ;;  %v1945_v45 = vmul.f32 0.01, %v1610_v56  ;;  %v2072_v29 = vsel %vm1816_vm7, %v1608_v57, %v1944_v12  ;;  %v1614_v35 = vadd.f32 %v1613_v36, %v4739_v21  ;;  %v2676_v36 = vld [vmem:[%s4891_s11 + $0x1f0] sm:$0xff] }
 0x2e8   : > { %2908 = vrot.lane.b32.xlu1 %v2665_v28, %s3864_s12  ;;  %v1615_v5 = vpop.f32.mrf.mxu0  ;;  %v2162_v49 = vpack.c.bf16 %v2072_v29, %v2070_v18 }
 0x2e9   : > { %2914 = vrot.lane.b32.xlu0 %v2668_v16, %s3864_s12  ;;  %v1616_v63 = vadd.f32 %v1615_v5, %v4814_v24  ;;  %v2073_v4 = vsel %vm1817_vm10, %v1610_v56, %v1945_v45  ;;  %v1946_v34 = vmul.f32 0.01, %v1614_v35  ;;  %vm1818_vm13 = vcmp.gt.f32.partialorder %v1614_v35, 0.0 }
 0x2ea   : > { %v1617_v30 = vpop.f32.mrf.mxu0  ;;  %v2163_v22 = vpack.c.bf16 %v2073_v4, %v2071_v33  ;;  %v2675_v33 = vld [vmem:[%s4891_s11 + $0x1e8] sm:$0xff]  ;;  %v2678_v4 = vld [vmem:[%s5108_s15] sm:$0xff] }
 0x2eb   : > { %v1618_v47 = vadd.f32 %v1617_v30, %v4739_v21  ;;  %v1947_v48 = vmul.f32 0.01, %v1616_v63  ;;  %vm1819_vm12 = vcmp.gt.f32.partialorder %v1616_v63, 0.0  ;;  %v2074_v23 = vsel %vm1818_vm13, %v1614_v35, %v1946_v34 }
 0x2ec   : > { %v959_v20 = vpop.xlane.xlu0 %958  ;;  %2912 = vrot.lane.b32.xlu1 %v2667_v62, %s3864_s12  ;;  %v1619_v6 = vpop.f32.mrf.mxu0  ;;  %2501 = vmatprep.mubr.bf16.mxu1 %v2163_v22  ;;  %v1430_v34 = vadd.f32 %v4761_v14, %v4814_v24  ;;  %v2681_v14 = vld [vmem:[%s5108_s15 + $0x18] sm:$0xff] }
 0x2ed   : > { %v1029_v13 = vmul.f32 0.03125, %v959_v20  ;;  %2918 = vrot.lane.b32.xlu0 %v2670_v9, %s3864_s12  ;;  %vm1820_vm11 = vcmp.gt.f32.partialorder %v1618_v47, 0.0  ;;  %v1948_v54 = vmul.f32 0.01, %v1618_v47  ;;  %v1620_v42 = vadd.f32 %v1619_v6, %v4814_v24  ;;  %2502 = vmatmul.mubr.bf16.gmra.mxu1 %v2162_v49  ;;  %v2680_v49 = vld [vmem:[%s5108_s15 + $0x10] sm:$0xff] }
 0x2ee   : > { %v2075_v57 = vsel %vm1819_vm12, %v1616_v63, %v1947_v48  ;;  %vm1745_vm15 = vcmp.gt.f32.partialorder %v1430_v34, 0.0 }
 0x2ef   : > { %v1093_v27 = vadd.f32 1e-05, %v1029_v13  ;;  %v5089_v43 = vpop.f32.mrf.mxu1  ;;  %vm1821_vm14 = vcmp.gt.f32.partialorder %v1620_v42, 0.0  ;;  %v1949_v3 = vmul.f32 0.01, %v1620_v42  ;;  %v2076_v44 = vsel %vm1820_vm11, %v1618_v47, %v1948_v54  ;;  %v2677_v47 = vld [vmem:[%s4891_s11 + $0x1f8] sm:$0xff] }
 0x2f0   : > { %v962_v10 = vpop.xlane.xlu1 %961  ;;  %2916 = vrot.lane.b32.xlu1 %v2669_v60, %s3864_s12  ;;  %v2164_v17 = vpack.c.bf16 %v2076_v44, %v2074_v23  ;;  %v2679_v54 = vld [vmem:[%s5108_s15 + $0x8] sm:$0xff]  ;;  %v1426_v44 = vadd.f32 %v4751_v53, %v4814_v24 }
 0x2f1   : > { %v1030_v1 = vmul.f32 0.03125, %v962_v10  ;;  %v2385_v40 = vpop.f32.mrf.mxu1  ;;  %2922 = vrot.lane.b32.xlu0 %v2672_v59, %s3864_s12  ;;  %3846 = vrsqrt.f32 %v1093_v27  ;;  %v2077_v15 = vsel %vm1821_vm14, %v1620_v42, %v1949_v3  ;;  %v2682_v27 = vld [vmem:[%s5108_s15 + $0x20] sm:$0xff] }
 0x2f2   : > { %v2165_v28 = vpack.c.bf16 %v2077_v15, %v2075_v57  ;;  %v2684_v57 = vld [vmem:[%s5108_s15 + $0x30] sm:$0xff]  ;;  %v1871_v53 = vmul.f32 0.01, %v1426_v44  ;;  %vm1743_vm1 = vcmp.gt.f32.partialorder %v1426_v44, 0.0 }
 0x2f3   : > { %v1094_v39 = vadd.f32 1e-05, %v1030_v1  ;;  %v5096_v2 = vpop.f32.mrf.mxu1 }
 0x2f4   : > { %v965_v16 = vpop.xlane.xlu0 %964  ;;  %2920 = vrot.lane.b32.xlu1 %v2671_v26, %s3864_s12  ;;  %2509 = vmatprep.mubr.bf16.mxu1 %v2165_v28 }
 0x2f5   : > { %3848 = vrsqrt.f32 %v1094_v39  ;;  %v1031_v12 = vmul.f32 0.03125, %v965_v16  ;;  %v2388_v56 = vpop.f32.mrf.mxu1  ;;  %2926 = vrot.lane.b32.xlu0 %v2674_v7, %s3864_s12  ;;  %2510 = vmatmul.mubr.bf16.gmra.mxu1 %v2164_v17  ;;  %v2683_v17 = vld [vmem:[%s5108_s15 + $0x28] sm:$0xff] }
 0x2f6   : > { %v2686_v56 = vld [vmem:[%s5108_s15 + $0x40] sm:$0xff] }
 0x2f7   : > { %v1095_v45 = vadd.f32 1e-05, %v1031_v12  ;;  %v5102_v62 = vpop.f32.mrf.mxu1 }
 0x2f8   : > { %v968_v5 = vpop.xlane.xlu1 %967  ;;  %v5110_v29 = vpop.permute.xlu0 %2806  ;;  %2924 = vrot.lane.b32.xlu1 %v2673_v31, %s3864_s12  ;;  %v1440_v31 = vadd.f32 %v4789_v37, %v4814_v24  ;;  %v1999_v37 = vsel %vm1743_vm1, %v1426_v44, %v1871_v53 }
 0x2f9   : > { %5975 = vst [vmem:[#allocation2_spill] sm:$0xff] %v5110_v29  ;;  %v1032_v9 = vmul.f32 0.03125, %v968_v5  ;;  %v2393_v63 = vpop.f32.mrf.mxu1  ;;  %2930 = vrot.lane.b32.xlu0 %v2676_v36, %s3864_s12  ;;  %3850 = vrsqrt.f32 %v1095_v45 }
 0x2fa   : > { %vm1749_vm2 = vcmp.gt.f32.partialorder %v1440_v31, 0.0 }
 0x2fb   : > { %v1096_v35 = vadd.f32 1e-05, %v1032_v9  ;;  %v5116_v30 = vpop.f32.mrf.mxu1 }
 0x2fc   : > { %v5118_v22 = vpop.permute.xlu1 %2808  ;;  %v5120_v18 = vpop.permute.xlu0 %2814  ;;  %2928 = vrot.lane.b32.xlu1 %v2675_v33, %s3864_s12  ;;  %v1436_v33 = vadd.f32 %v4779_v50, %v4814_v24 }
 0x2fd   : > { %5976 = vst [vmem:[#allocation3_spill] sm:$0xff] %v5118_v22  ;;  %5977 = vst [vmem:[#allocation4_spill] sm:$0xff] %v5120_v18  ;;  %3852 = vrsqrt.f32 %v1096_v35  ;;  %v2396_v20 = vpop.f32.mrf.mxu1  ;;  %3062 = vrot.lane.b32.xlu0 %v2678_v4, %s3865_s16 }
 0x2fe   : > { %v3847_v60 = vpop.eup %3846  ;;  %v2688_v20 = vld [vmem:[%s5108_s15 + $0x50] sm:$0xff]  ;;  %vm1747_vm3 = vcmp.gt.f32.partialorder %v1436_v33, 0.0 }
 0x2ff   : > { %v5126_v13 = vpop.f32.mrf.mxu1  ;;  %v1221_v3 = vmul.f32 %v3847_v60, %v4856_v41  ;;  %v1873_v41 = vmul.f32 0.01, %v1430_v34 }
 0x300   : > { %v5128_v48 = vpop.permute.xlu1 %2810  ;;  %v5130_v6 = vpop.permute.xlu0 %2818  ;;  %2932 = vrot.lane.b32.xlu1 %v2677_v47, %s3864_s12  ;;  %v1877_v47 = vmul.f32 0.01, %v1440_v31 }
 0x301   : > { %5978 = vst [vmem:[#allocation5_spill] sm:$0xff] %v5128_v48  ;;  %v2401_v59 = vpop.f32.mrf.mxu1  ;;  %3066 = vrot.lane.b32.xlu0 %v2680_v49, %s3865_s16  ;;  %v2001_v5 = vsel %vm1745_vm15, %v1430_v34, %v1873_v41  ;;  %v1450_v34 = vadd.f32 %v4810_v61, %v4814_v24  ;;  %v2689_v41 = vld [vmem:[%s5108_s15 + $0x58] sm:$0xff] }
 0x302   : > { %v3849_v42 = vpop.eup %3848  ;;  %v1875_v59 = vmul.f32 0.01, %v1436_v33  ;;  %v2709_v48 = vld [vmem:[%s5108_s15 + $0xf8] sm:$0xff] }
 0x303   : > { %v5138_v10 = vpop.f32.mrf.mxu1  ;;  %v1222_v1 = vmul.f32 %v3849_v42, %v4861_v46  ;;  %v2687_v42 = vld [vmem:[%s5108_s15 + $0x48] sm:$0xff]  ;;  %v1881_v53 = vmul.f32 0.01, %v1450_v34 }
 0x304   : > { %v5142_v40 = vpop.permute.xlu1 %2812  ;;  %v5144_v26 = vpop.permute.xlu0 %2822  ;;  %3064 = vrot.lane.b32.xlu1 %v2679_v54, %s3865_s16 }
 0x305   : > { %5979 = vst [vmem:[#allocation6_spill] sm:$0xff] %v5142_v40  ;;  %v2404_v7 = vpop.f32.mrf.mxu1  ;;  %v1255_v39 = vpack.c.bf16 %v1222_v1, %v1221_v3  ;;  %3070 = vrot.lane.b32.xlu0 %v2682_v27, %s3865_s16  ;;  %v2690_v27 = vld [vmem:[%s5108_s15 + $0x60] sm:$0xff]  ;;  %v2005_v1 = vsel %vm1749_vm2, %v1440_v31, %v1877_v47  ;;  %v2691_v31 = vld [vmem:[%s5108_s15 + $0x68] sm:$0xff] }
 0x306   : > { %v3851_v15 = vpop.eup %3850 }
 0x307   : > { %3640 = vmatmul.mubr.msk.bf16.gmra.mxu0 %vm391_vm0, %v1255_v39  ;;  %v5153_v46 = vpop.f32.mrf.mxu1  ;;  %v1223_v45 = vmul.f32 %v3851_v15, %v4867_v0  ;;  %v2685_v0 = vld [vmem:[%s5108_s15 + $0x38] sm:$0xff]  ;;  %v1446_v39 = vadd.f32 %v4804_v25, %v4814_v24  ;;  %v2692_v15 = vld [vmem:[%s5108_s15 + $0x70] sm:$0xff] }
 0x308   : > { %v5155_v28 = vpop.permute.xlu1 %2816  ;;  %v5157_v23 = vpop.permute.xlu0 %2826  ;;  %1731 = vmatprep.mubr.bf16.mxu0 %v3863_v19  ;;  %3068 = vrot.lane.b32.xlu1 %v2681_v14, %s3865_s16 }
 0x309   : > { %5980 = vst [vmem:[#allocation7_spill] sm:$0xff] %v5155_v28  ;;  %v2409_v16 = vpop.f32.mrf.mxu1  ;;  %3074 = vrot.lane.b32.xlu0 %v2684_v57, %s3865_s16  ;;  %v2003_v57 = vsel %vm1747_vm3, %v1436_v33, %v1875_v59  ;;  %vm1751_vm4 = vcmp.gt.f32.partialorder %v1446_v39, 0.0 }
 0x30a   : > { %v3853_v12 = vpop.eup %3852  ;;  %v2129_v61 = vpack.c.bf16 %v2005_v1, %v2003_v57  ;;  %v2697_v1 = vld [vmem:[%s5108_s15 + $0x98] sm:$0xff] }
 0x30b   : > { %v5166_v36 = vpop.f32.mrf.mxu1  ;;  %v1224_v19 = vmul.f32 %v3853_v12, %v4873_v11  ;;  %v2127_v11 = vpack.c.bf16 %v2001_v5, %v1999_v37  ;;  %v1879_v12 = vmul.f32 0.01, %v1446_v39  ;;  %v2696_v37 = vld [vmem:[%s5108_s15 + $0x90] sm:$0xff] }
 0x30c   : > { %v5171_v9 = vpop.permute.xlu1 %2820  ;;  %v5173_v63 = vpop.permute.xlu0 %2830  ;;  %3072 = vrot.lane.b32.xlu1 %v2683_v17, %s3865_s16 }
 0x30d   : > { %v2412_v4 = vpop.f32.mrf.mxu1  ;;  %v1256_v35 = vpack.c.bf16 %v1224_v19, %v1223_v45  ;;  %3078 = vrot.lane.b32.xlu0 %v2686_v56, %s3865_s16  ;;  %v2007_v33 = vsel %vm1751_vm4, %v1446_v39, %v1879_v12  ;;  %v2700_v39 = vld [vmem:[%s5108_s15 + $0xb0] sm:$0xff] }
 0x30e   : > { %v2693_v4 = vld [vmem:[%s5108_s15 + $0x78] sm:$0xff] }
 0x30f   : > { %3641 = vmatmul.mubr.msk.bf16.gmra.mxu0 %vm391_vm0, %v1256_v35  ;;  %v5182_v49 = vpop.f32.mrf.mxu1  ;;  %vm1753_vm0 = vcmp.gt.f32.partialorder %v1450_v34, 0.0 }
 0x310   : > { %v5184_v60 = vpop.permute.xlu1 %2824  ;;  %2357 = vmatprep.mubr.bf16.mxu0 %v2127_v11  ;;  %v5186_v50 = vpop.permute.xlu0 %2834  ;;  %3076 = vrot.lane.b32.xlu1 %v2685_v0, %s3865_s16  ;;  %v5981_v0 = vpack.c.bf16 %v4797_v55, %v4795_v38 }
 0x311   : > { %v2417_v54 = vpop.f32.mrf.mxu1  ;;  %3082 = vrot.lane.b32.xlu0 %v2688_v20, %s3865_s16 }
 0x312   : > { %v2695_v54 = vld [vmem:[%s5108_s15 + $0x88] sm:$0xff] }
 0x313   : > { %v5194_v3 = vpop.f32.mrf.mxu1 }
 0x314   : > { %v5196_v44 = vpop.permute.xlu1 %2828  ;;  %v5198_v7 = vpop.permute.xlu0 %2838  ;;  %3080 = vrot.lane.b32.xlu1 %v2687_v42, %s3865_s16  ;;  %v2698_v42 = vld [vmem:[%s5108_s15 + $0xa0] sm:$0xff] }
 0x315   : > { %v2420_v14 = vpop.f32.mrf.mxu1  ;;  %3086 = vrot.lane.b32.xlu0 %v2690_v27, %s3865_s16 }
 0x316   : > { %v5982_v14 = vpack.c.bf16 %v4818_v52, %v4816_v8  ;;  %v2701_v8 = vld [vmem:[%s5108_s15 + $0xb8] sm:$0xff]  ;;  %v2704_v52 = vld [vmem:[%s5108_s15 + $0xd0] sm:$0xff] }
 0x317   : > { %2358 = vmatmul.mubr.bf16.vlgmr.msra.gmra.mxu0 %v2126_v58  ;;  %v5209_v16 = vpop.f32.mrf.mxu1  ;;  %v2009_v58 = vsel %vm1753_vm0, %v1450_v34, %v1881_v53 }
 0x318   : > { %v5211_v17 = vpop.permute.xlu1 %2832  ;;  %2365 = vmatprep.mubr.bf16.mxu0 %v2129_v61  ;;  %v5213_v25 = vpop.permute.xlu0 %2842  ;;  %3084 = vrot.lane.b32.xlu1 %v2689_v41, %s3865_s16  ;;  %v2131_v35 = vpack.c.bf16 %v2009_v58, %v2007_v33  ;;  %v2699_v61 = vld [vmem:[%s5108_s15 + $0xa8] sm:$0xff] }
 0x319   : > { %v2425_v56 = vpop.f32.mrf.mxu1  ;;  %3090 = vrot.lane.b32.xlu0 %v2692_v15, %s3865_s16  ;;  %v2702_v15 = vld [vmem:[%s5108_s15 + $0xc0] sm:$0xff] }
 0x31b   : > { %v5219_v51 = vpop.f32.mrf.mxu1 }
 0x31c   : > { %v5221_v45 = vpop.permute.xlu1 %2836  ;;  %v5223_v19 = vpop.permute.xlu0 %2846  ;;  %3088 = vrot.lane.b32.xlu1 %v2691_v31, %s3865_s16 }
 0x31d   : > { %v2428_v5 = vpop.f32.mrf.mxu1  ;;  %3094 = vrot.lane.b32.xlu0 %v2694_v32, %s3865_s16  ;;  %v2703_v32 = vld [vmem:[%s5108_s15 + $0xc8] sm:$0xff] }
 0x31e   : > { %v2706_v5 = vld [vmem:[%s5108_s15 + $0xe0] sm:$0xff] }
 0x31f   : > { %2366 = vmatmul.mubr.bf16.gmra.mxu0 %v5981_v0  ;;  %v5232_v11 = vpop.f32.mrf.mxu1  ;;  %v2705_v0 = vld [vmem:[%s5108_s15 + $0xd8] sm:$0xff] }
 0x320   : > { %v5234_v20 = vpop.permute.xlu1 %2840  ;;  %2373 = vmatprep.mubr.bf16.mxu0 %v2131_v35  ;;  %v5236_v47 = vpop.permute.xlu0 %2850  ;;  %3092 = vrot.lane.b32.xlu1 %v2693_v4, %s3865_s16 }
 0x321   : > { %v2433_v59 = vpop.f32.mrf.mxu1  ;;  %3098 = vrot.lane.b32.xlu0 %v2696_v37, %s3865_s16 }
 0x323   : > { %v5242_v38 = vpop.f32.mrf.mxu1 }
 0x324   : > { %v5244_v55 = vpop.permute.xlu1 %2844  ;;  %v5246_v27 = vpop.permute.xlu0 %2854  ;;  %3096 = vrot.lane.b32.xlu1 %v2695_v54, %s3865_s16 }
 0x325   : > { %v2436_v34 = vpop.f32.mrf.mxu1  ;;  %3102 = vrot.lane.b32.xlu0 %v2698_v42, %s3865_s16  ;;  %v2708_v42 = vld [vmem:[%s5108_s15 + $0xf0] sm:$0xff] }
 0x327   : > { %2374 = vmatmul.mubr.bf16.gmra.mxu0 %v5982_v14 }
 0x328   : > { %v5255_v57 = vpop.permute.xlu1 %2848  ;;  %v5257_v41 = vpop.permute.xlu0 %2858  ;;  %3100 = vrot.lane.b32.xlu1 %v2697_v1, %s3865_s16 }
 0x329   : > { %3106 = vrot.lane.b32.xlu0 %v2700_v39, %s3865_s16 }
 0x32c   : > { %v5263_v53 = vpop.permute.xlu1 %2852  ;;  %v5265_v12 = vpop.permute.xlu0 %2862  ;;  %3104 = vrot.lane.b32.xlu1 %v2699_v61, %s3865_s16 }
 0x32d   : > { %5983 = vst [vmem:[#allocation8_spill] sm:$0xff] %v5265_v12  ;;  %3110 = vrot.lane.b32.xlu0 %v2702_v15, %s3865_s16 }
 0x330   : > { %v5271_v56 = vpop.permute.xlu1 %2856  ;;  %v5273_v31 = vpop.permute.xlu0 %2866  ;;  %3108 = vrot.lane.b32.xlu1 %v2701_v8, %s3865_s16 }
 0x331   : > { %5984 = vst [vmem:[#allocation9_spill] sm:$0xff] %v5271_v56  ;;  %5985 = vst [vmem:[#allocation10_spill] sm:$0xff] %v5273_v31  ;;  %3114 = vrot.lane.b32.xlu0 %v2704_v52, %s3865_s16  ;;  %v2707_v52 = vld [vmem:[%s5108_s15 + $0xe8] sm:$0xff] }
 0x332   : > { %v1623_v58 = vpop.f32.mrf.mxu0 }
 0x333   : > { %v1624_v59 = vadd.f32 %v1623_v58, %v4739_v21 }
 0x334   : > { %v5279_v33 = vpop.permute.xlu1 %2860  ;;  %v1625_v4 = vpop.f32.mrf.mxu0  ;;  %3112 = vrot.lane.b32.xlu1 %v2703_v32, %s3865_s16 }
 0x335   : > { %5986 = vst [vmem:[#allocation11_spill] sm:$0xff] %v5279_v33  ;;  %v1626_v35 = vadd.f32 %v1625_v4, %v4814_v24  ;;  %v5283_v37 = vpop.permute.xlu0 %2870  ;;  %3118 = vrot.lane.b32.xlu0 %v2706_v5, %s3865_s16  ;;  %v1950_v32 = vmul.f32 0.01, %v1624_v59  ;;  %v2710_v5 = vld [vmem:[%s5108_s15 + $0x100] sm:$0xff]  ;;  %vm1822_vm7 = vcmp.gt.f32.partialorder %v1624_v59, 0.0 }
 0x336   : > { %5987 = vst [vmem:[#allocation12_spill] sm:$0xff] %v5283_v37  ;;  %v1627_v54 = vpop.f32.mrf.mxu0 }
 0x337   : > { %v1628_v34 = vadd.f32 %v1627_v54, %v4739_v21  ;;  %v1951_v14 = vmul.f32 0.01, %v1626_v35  ;;  %vm1823_vm6 = vcmp.gt.f32.partialorder %v1626_v35, 0.0 }
 0x338   : > { %v5290_v1 = vpop.permute.xlu1 %2864  ;;  %v1629_v39 = vpop.f32.mrf.mxu0  ;;  %3116 = vrot.lane.b32.xlu1 %v2705_v0, %s3865_s16 }
 0x339   : > { %5988 = vst [vmem:[#allocation13_spill] sm:$0xff] %v5290_v1  ;;  %vm1824_vm5 = vcmp.gt.f32.partialorder %v1628_v34, 0.0  ;;  %v1952_v61 = vmul.f32 0.01, %v1628_v34  ;;  %v1630_v15 = vadd.f32 %v1629_v39, %v4814_v24  ;;  %v5294_v8 = vpop.permute.xlu0 %2874  ;;  %3122 = vrot.lane.b32.xlu0 %v2708_v42, %s3865_s16  ;;  %v2079_v42 = vsel %vm1823_vm6, %v1626_v35, %v1951_v14  ;;  %v2712_v1 = vld [vmem:[%s5108_s15 + $0x110] sm:$0xff] }
 0x33a   : > { %5989 = vst [vmem:[#allocation14_spill] sm:$0xff] %v5294_v8  ;;  %v1633_v58 = vpop.f32.mrf.mxu0 }
 0x33b   : > { %vm1825_vm8 = vcmp.gt.f32.partialorder %v1630_v15, 0.0  ;;  %v1953_v4 = vmul.f32 0.01, %v1630_v15  ;;  %v2080_v28 = vsel %vm1824_vm5, %v1628_v34, %v1952_v61  ;;  %v1634_v22 = vadd.f32 %v1633_v58, %v4739_v21 }
 0x33c   : > { %v5299_v0 = vpop.permute.xlu1 %2868  ;;  %v1635_v54 = vpop.f32.mrf.mxu0  ;;  %3120 = vrot.lane.b32.xlu1 %v2707_v52, %s3865_s16 }
 0x33d   : > { %5990 = vst [vmem:[#allocation15_spill] sm:$0xff] %v5299_v0  ;;  %v1636_v39 = vadd.f32 %v1635_v54, %v4814_v24  ;;  %v5303_v18 = vpop.permute.xlu0 %2878  ;;  %v2081_v40 = vsel %vm1825_vm8, %v1630_v15, %v1953_v4  ;;  %3126 = vrot.lane.b32.xlu0 %v2710_v5, %s3865_s16  ;;  %v2078_v0 = vsel %vm1822_vm7, %v1624_v59, %v1950_v32  ;;  %v2711_v59 = vld [vmem:[%s5108_s15 + $0x108] sm:$0xff]  ;;  %v2714_v32 = vld [vmem:[%s5108_s15 + $0x120] sm:$0xff]  ;;  %vm1826_vm11 = vcmp.gt.f32.partialorder %v1634_v22, 0.0 }
 0x33e   : > { %5991 = vst [vmem:[#allocation16_spill] sm:$0xff] %v5303_v18  ;;  %v1637_v29 = vpop.f32.mrf.mxu0  ;;  %v2167_v8 = vpack.c.bf16 %v2081_v40, %v2079_v42  ;;  %v2166_v61 = vpack.c.bf16 %v2080_v28, %v2078_v0  ;;  %v2716_v18 = vld [vmem:[%s5108_s15 + $0x130] sm:$0xff] }
 0x33f   : > { %v1638_v34 = vadd.f32 %v1637_v29, %v4739_v21  ;;  %v1955_v35 = vmul.f32 0.01, %v1636_v39  ;;  %v1954_v29 = vmul.f32 0.01, %v1634_v22  ;;  %vm1827_vm10 = vcmp.gt.f32.partialorder %v1636_v39, 0.0 }
 0x340   : > { %v5311_v52 = vpop.permute.xlu1 %2872  ;;  %v1639_v54 = vpop.f32.mrf.mxu0  ;;  %2517 = vmatprep.mubr.bf16.mxu1 %v2167_v8  ;;  %3124 = vrot.lane.b32.xlu1 %v2709_v48, %s3865_s16 }
 0x341   : > { %5992 = vst [vmem:[#allocation17_spill] sm:$0xff] %v5311_v52  ;;  %vm1828_vm9 = vcmp.gt.f32.partialorder %v1638_v34, 0.0  ;;  %v1956_v14 = vmul.f32 0.01, %v1638_v34  ;;  %v1640_v15 = vadd.f32 %v1639_v54, %v4814_v24  ;;  %v5315_v40 = vpop.permute.xlu0 %2882  ;;  %2518 = vmatmul.mubr.bf16.gmra.mxu1 %v2166_v61  ;;  %3130 = vrot.lane.b32.xlu0 %v2712_v1, %s3865_s16  ;;  %v2083_v0 = vsel %vm1827_vm10, %v1636_v39, %v1955_v35  ;;  %v2713_v61 = vld [vmem:[%s5108_s15 + $0x118] sm:$0xff] }
 0x342   : > { %5993 = vst [vmem:[#allocation18_spill] sm:$0xff] %v5315_v40  ;;  %v1643_v28 = vpop.f32.mrf.mxu0 }
 0x343   : > { %vm1829_vm12 = vcmp.gt.f32.partialorder %v1640_v15, 0.0  ;;  %v1957_v48 = vmul.f32 0.01, %v1640_v15  ;;  %v2084_v5 = vsel %vm1828_vm9, %v1638_v34, %v1956_v14  ;;  %v1644_v54 = vadd.f32 %v1643_v28, %v4739_v21 }
 0x344   : > { %v5320_v8 = vpop.permute.xlu1 %2876  ;;  %v1645_v58 = vpop.f32.mrf.mxu0  ;;  %3128 = vrot.lane.b32.xlu1 %v2711_v59, %s3865_s16 }
 0x345   : > { %5994 = vst [vmem:[#allocation19_spill] sm:$0xff] %v5320_v8  ;;  %v1646_v4 = vadd.f32 %v1645_v58, %v4814_v24  ;;  %v5325_v1 = vpop.permute.xlu0 %2886  ;;  %v2085_v42 = vsel %vm1829_vm12, %v1640_v15, %v1957_v48  ;;  %3134 = vrot.lane.b32.xlu0 %v2714_v32, %s3865_s16  ;;  %v2082_v8 = vsel %vm1826_vm11, %v1634_v22, %v1954_v29  ;;  %v2715_v22 = vld [vmem:[%s5108_s15 + $0x128] sm:$0xff]  ;;  %v2718_v32 = vld [vmem:[%s5108_s15 + $0x140] sm:$0xff]  ;;  %vm1830_vm15 = vcmp.gt.f32.partialorder %v1644_v54, 0.0 }
 0x346   : > { %5995 = vst [vmem:[#allocation20_spill] sm:$0xff] %v5325_v1  ;;  %v1647_v40 = vpop.f32.mrf.mxu0  ;;  %v2169_v52 = vpack.c.bf16 %v2085_v42, %v2083_v0  ;;  %v2168_v14 = vpack.c.bf16 %v2084_v5, %v2082_v8 }
 0x347   : > { %v1648_v34 = vadd.f32 %v1647_v40, %v4739_v21  ;;  %v1959_v39 = vmul.f32 0.01, %v1646_v4  ;;  %v1958_v40 = vmul.f32 0.01, %v1644_v54  ;;  %vm1831_vm14 = vcmp.gt.f32.partialorder %v1646_v4, 0.0 }
 0x348   : > { %v5333_v59 = vpop.permute.xlu1 %2880  ;;  %v1649_v58 = vpop.f32.mrf.mxu0  ;;  %2525 = vmatprep.mubr.bf16.mxu1 %v2169_v52  ;;  %3132 = vrot.lane.b32.xlu1 %v2713_v61, %s3865_s16 }
 0x349   : > { %5996 = vst [vmem:[#allocation21_spill] sm:$0xff] %v5333_v59  ;;  %vm1832_vm13 = vcmp.gt.f32.partialorder %v1648_v34, 0.0  ;;  %v1960_v35 = vmul.f32 0.01, %v1648_v34  ;;  %v1650_v15 = vadd.f32 %v1649_v58, %v4814_v24  ;;  %v5337_v28 = vpop.permute.xlu0 %2890  ;;  %2526 = vmatmul.mubr.bf16.gmra.mxu1 %v2168_v14  ;;  %3138 = vrot.lane.b32.xlu0 %v2716_v18, %s3865_s16  ;;  %v2087_v42 = vsel %vm1831_vm14, %v1646_v4, %v1959_v39  ;;  %v2717_v14 = vld [vmem:[%s5108_s15 + $0x138] sm:$0xff]  ;;  %v2720_v59 = vld [vmem:[%s5108_s15 + $0x150] sm:$0xff] }
 0x34a   : > { %5997 = vst [vmem:[#allocation22_spill] sm:$0xff] %v5337_v28  ;;  %v1653_v29 = vpop.f32.mrf.mxu0 }
 0x34b   : > { %vm1833_vm1 = vcmp.gt.f32.partialorder %v1650_v15, 0.0  ;;  %v1961_v52 = vmul.f32 0.01, %v1650_v15  ;;  %v2088_v5 = vsel %vm1832_vm13, %v1648_v34, %v1960_v35  ;;  %v1654_v58 = vadd.f32 %v1653_v29, %v4739_v21 }
 0x34c   : > { %v5342_v48 = vpop.permute.xlu1 %2884  ;;  %v1655_v8 = vpop.f32.mrf.mxu0  ;;  %3136 = vrot.lane.b32.xlu1 %v2715_v22, %s3865_s16 }
 0x34d   : > { %5998 = vst [vmem:[#allocation23_spill] sm:$0xff] %v5342_v48  ;;  %v1656_v0 = vadd.f32 %v1655_v8, %v4814_v24  ;;  %v5347_v18 = vpop.permute.xlu0 %2894  ;;  %v2089_v61 = vsel %vm1833_vm1, %v1650_v15, %v1961_v52  ;;  %3142 = vrot.lane.b32.xlu0 %v2718_v32, %s3865_s16  ;;  %v2086_v48 = vsel %vm1830_vm15, %v1644_v54, %v1958_v40  ;;  %v2719_v54 = vld [vmem:[%s5108_s15 + $0x148] sm:$0xff]  ;;  %v2722_v32 = vld [vmem:[%s5108_s15 + $0x160] sm:$0xff]  ;;  %vm1834_vm0 = vcmp.gt.f32.partialorder %v1654_v58, 0.0 }
 0x34e   : > { %5999 = vst [vmem:[#allocation24_spill] sm:$0xff] %v5347_v18  ;;  %v1657_v28 = vpop.f32.mrf.mxu0  ;;  %v2171_v1 = vpack.c.bf16 %v2089_v61, %v2087_v42  ;;  %v2170_v35 = vpack.c.bf16 %v2088_v5, %v2086_v48 }
 0x34f   : > { %v1658_v34 = vadd.f32 %v1657_v28, %v4739_v21  ;;  %v1963_v4 = vmul.f32 0.01, %v1656_v0  ;;  %v1962_v28 = vmul.f32 0.01, %v1654_v58  ;;  %vm1835_vm3 = vcmp.gt.f32.partialorder %v1656_v0, 0.0 }
 0x350   : > { %v5355_v22 = vpop.permute.xlu1 %2888  ;;  %v1659_v8 = vpop.f32.mrf.mxu0  ;;  %2533 = vmatprep.mubr.bf16.mxu1 %v2171_v1  ;;  %3140 = vrot.lane.b32.xlu1 %v2717_v14, %s3865_s16 }
 0x351   : > { %6000 = vst [vmem:[#allocation25_spill] sm:$0xff] %v5355_v22  ;;  %vm1836_vm2 = vcmp.gt.f32.partialorder %v1658_v34, 0.0  ;;  %v1964_v39 = vmul.f32 0.01, %v1658_v34  ;;  %v1660_v15 = vadd.f32 %v1659_v8, %v4814_v24  ;;  %v5359_v29 = vpop.permute.xlu0 %2898  ;;  %2534 = vmatmul.mubr.bf16.gmra.mxu1 %v2170_v35  ;;  %3146 = vrot.lane.b32.xlu0 %v2720_v59, %s3865_s16  ;;  %v2091_v59 = vsel %vm1835_vm3, %v1656_v0, %v1963_v4  ;;  %v2721_v35 = vld [vmem:[%s5108_s15 + $0x158] sm:$0xff]  ;;  %v2724_v22 = vld [vmem:[%s5108_s15 + $0x170] sm:$0xff] }
 0x352   : > { %6001 = vst [vmem:[#allocation26_spill] sm:$0xff] %v5359_v29  ;;  %v1663_v40 = vpop.f32.mrf.mxu0 }
 0x353   : > { %vm1837_vm4 = vcmp.gt.f32.partialorder %v1660_v15, 0.0  ;;  %v1965_v1 = vmul.f32 0.01, %v1660_v15  ;;  %v2092_v5 = vsel %vm1836_vm2, %v1658_v34, %v1964_v39  ;;  %v1664_v8 = vadd.f32 %v1663_v40, %v4739_v21 }
 0x354   : > { %v5364_v52 = vpop.permute.xlu1 %2892  ;;  %v1665_v48 = vpop.f32.mrf.mxu0  ;;  %3144 = vrot.lane.b32.xlu1 %v2719_v54, %s3865_s16 }
 0x355   : > { %6002 = vst [vmem:[#allocation27_spill] sm:$0xff] %v5364_v52  ;;  %v1666_v42 = vadd.f32 %v1665_v48, %v4814_v24  ;;  %v5369_v61 = vpop.permute.xlu0 %2902  ;;  %v2093_v14 = vsel %vm1837_vm4, %v1660_v15, %v1965_v1  ;;  %3150 = vrot.lane.b32.xlu0 %v2722_v32, %s3865_s16  ;;  %v2090_v52 = vsel %vm1834_vm0, %v1654_v58, %v1962_v28  ;;  %v2723_v58 = vld [vmem:[%s5108_s15 + $0x168] sm:$0xff]  ;;  %v2726_v32 = vld [vmem:[%s5108_s15 + $0x180] sm:$0xff]  ;;  %vm1838_vm7 = vcmp.gt.f32.partialorder %v1664_v8, 0.0 }
 0x356   : > { %6003 = vst [vmem:[#allocation28_spill] sm:$0xff] %v5369_v61  ;;  %v1667_v29 = vpop.f32.mrf.mxu0  ;;  %v2173_v18 = vpack.c.bf16 %v2093_v14, %v2091_v59  ;;  %v2172_v39 = vpack.c.bf16 %v2092_v5, %v2090_v52 }
 0x357   : > { %v1668_v34 = vadd.f32 %v1667_v29, %v4739_v21  ;;  %v1967_v0 = vmul.f32 0.01, %v1666_v42  ;;  %v1966_v29 = vmul.f32 0.01, %v1664_v8  ;;  %vm1839_vm6 = vcmp.gt.f32.partialorder %v1666_v42, 0.0 }
 0x358   : > { %v5377_v54 = vpop.permute.xlu1 %2896  ;;  %v1669_v48 = vpop.f32.mrf.mxu0  ;;  %2541 = vmatprep.mubr.bf16.mxu1 %v2173_v18  ;;  %3148 = vrot.lane.b32.xlu1 %v2721_v35, %s3865_s16 }
 0x359   : > { %6004 = vst [vmem:[#allocation29_spill] sm:$0xff] %v5377_v54  ;;  %vm1840_vm5 = vcmp.gt.f32.partialorder %v1668_v34, 0.0  ;;  %v1968_v4 = vmul.f32 0.01, %v1668_v34  ;;  %v1670_v15 = vadd.f32 %v1669_v48, %v4814_v24  ;;  %v5381_v40 = vpop.permute.xlu0 %2906  ;;  %2542 = vmatmul.mubr.bf16.gmra.mxu1 %v2172_v39  ;;  %3154 = vrot.lane.b32.xlu0 %v2724_v22, %s3865_s16  ;;  %v2095_v22 = vsel %vm1839_vm6, %v1666_v42, %v1967_v0  ;;  %v2725_v39 = vld [vmem:[%s5108_s15 + $0x178] sm:$0xff]  ;;  %v2728_v54 = vld [vmem:[%s5108_s15 + $0x190] sm:$0xff] }
 0x35a   : > { %6005 = vst [vmem:[#allocation30_spill] sm:$0xff] %v5381_v40  ;;  %v1673_v28 = vpop.f32.mrf.mxu0 }
 0x35b   : > { %vm1841_vm8 = vcmp.gt.f32.partialorder %v1670_v15, 0.0  ;;  %v1969_v18 = vmul.f32 0.01, %v1670_v15  ;;  %v2096_v5 = vsel %vm1840_vm5, %v1668_v34, %v1968_v4  ;;  %v1674_v48 = vadd.f32 %v1673_v28, %v4739_v21 }
 0x35c   : > { %v5386_v1 = vpop.permute.xlu1 %2900  ;;  %v1675_v52 = vpop.f32.mrf.mxu0  ;;  %3152 = vrot.lane.b32.xlu1 %v2723_v58, %s3865_s16 }
 0x35d   : > { %6006 = vst [vmem:[#allocation31_spill] sm:$0xff] %v5386_v1  ;;  %v1676_v59 = vadd.f32 %v1675_v52, %v4814_v24  ;;  %v5391_v14 = vpop.permute.xlu0 %2910  ;;  %v2097_v35 = vsel %vm1841_vm8, %v1670_v15, %v1969_v18  ;;  %3158 = vrot.lane.b32.xlu0 %v2726_v32, %s3865_s16  ;;  %v2094_v1 = vsel %vm1838_vm7, %v1664_v8, %v1966_v29  ;;  %v2727_v8 = vld [vmem:[%s5108_s15 + $0x188] sm:$0xff]  ;;  %v2730_v32 = vld [vmem:[%s5108_s15 + $0x1a0] sm:$0xff]  ;;  %vm1842_vm11 = vcmp.gt.f32.partialorder %v1674_v48, 0.0 }
 0x35e   : > { %6007 = vst [vmem:[#allocation32_spill] sm:$0xff] %v5391_v14  ;;  %v1677_v40 = vpop.f32.mrf.mxu0  ;;  %v2175_v61 = vpack.c.bf16 %v2097_v35, %v2095_v22  ;;  %v2174_v4 = vpack.c.bf16 %v2096_v5, %v2094_v1 }
 0x35f   : > { %v1678_v34 = vadd.f32 %v1677_v40, %v4739_v21  ;;  %v1971_v42 = vmul.f32 0.01, %v1676_v59  ;;  %v1970_v40 = vmul.f32 0.01, %v1674_v48  ;;  %vm1843_vm10 = vcmp.gt.f32.partialorder %v1676_v59, 0.0 }
 0x360   : > { %v5399_v58 = vpop.permute.xlu1 %2904  ;;  %v1679_v52 = vpop.f32.mrf.mxu0  ;;  %2549 = vmatprep.mubr.bf16.mxu1 %v2175_v61  ;;  %3156 = vrot.lane.b32.xlu1 %v2725_v39, %s3865_s16 }
 0x361   : > { %6008 = vst [vmem:[#allocation33_spill] sm:$0xff] %v5399_v58  ;;  %vm1844_vm9 = vcmp.gt.f32.partialorder %v1678_v34, 0.0  ;;  %v1972_v0 = vmul.f32 0.01, %v1678_v34  ;;  %v1680_v15 = vadd.f32 %v1679_v52, %v4814_v24  ;;  %v5403_v28 = vpop.permute.xlu0 %2914  ;;  %2550 = vmatmul.mubr.bf16.gmra.mxu1 %v2174_v4  ;;  %3162 = vrot.lane.b32.xlu0 %v2728_v54, %s3865_s16  ;;  %v2099_v54 = vsel %vm1843_vm10, %v1676_v59, %v1971_v42  ;;  %v2729_v4 = vld [vmem:[%s5108_s15 + $0x198] sm:$0xff]  ;;  %v2732_v58 = vld [vmem:[%s5108_s15 + $0x1b0] sm:$0xff] }
 0x362   : > { %6009 = vst [vmem:[#allocation34_spill] sm:$0xff] %v5403_v28  ;;  %v1683_v29 = vpop.f32.mrf.mxu0  ;;  %vm3319_vm10 = vcmask 23552  }
 0x363   : > { %vm1845_vm12 = vcmp.gt.f32.partialorder %v1680_v15, 0.0  ;;  %v1973_v61 = vmul.f32 0.01, %v1680_v15  ;;  %v2100_v5 = vsel %vm1844_vm9, %v1678_v34, %v1972_v0  ;;  %v1684_v52 = vadd.f32 %v1683_v29, %v4739_v21 }
 0x364   : > { %v5408_v18 = vpop.permute.xlu1 %2908  ;;  %v1685_v1 = vpop.f32.mrf.mxu0  ;;  %3160 = vrot.lane.b32.xlu1 %v2727_v8, %s3865_s16  ;;  %vm3254_vm9 = vcmask 7168  }
 0x365   : > { %6010 = vst [vmem:[#allocation35_spill] sm:$0xff] %v5408_v18  ;;  %v1686_v22 = vadd.f32 %v1685_v1, %v4814_v24  ;;  %v5413_v35 = vpop.permute.xlu0 %2918  ;;  %v2101_v39 = vsel %vm1845_vm12, %v1680_v15, %v1973_v61  ;;  %3166 = vrot.lane.b32.xlu0 %v2730_v32, %s3865_s16  ;;  %v2098_v18 = vsel %vm1842_vm11, %v1674_v48, %v1970_v40  ;;  %v2731_v48 = vld [vmem:[%s5108_s15 + $0x1a8] sm:$0xff]  ;;  %v2734_v32 = vld [vmem:[%s5108_s15 + $0x1c0] sm:$0xff]  ;;  %vm1846_vm15 = vcmp.gt.f32.partialorder %v1684_v52, 0.0 }
 0x366   : > { %6011 = vst [vmem:[#allocation36_spill] sm:$0xff] %v5413_v35  ;;  %v1687_v28 = vpop.f32.mrf.mxu0  ;;  %v2177_v14 = vpack.c.bf16 %v2101_v39, %v2099_v54  ;;  %v2176_v0 = vpack.c.bf16 %v2100_v5, %v2098_v18  ;;  %vm3448_vm12 = vcmask 64512  }
 0x367   : > { %v1688_v34 = vadd.f32 %v1687_v28, %v4739_v21  ;;  %v1975_v59 = vmul.f32 0.01, %v1686_v22  ;;  %v1974_v28 = vmul.f32 0.01, %v1684_v52  ;;  %vm1847_vm14 = vcmp.gt.f32.partialorder %v1686_v22, 0.0 }
 0x368   : > { %v5421_v8 = vpop.permute.xlu1 %2912  ;;  %v1689_v1 = vpop.f32.mrf.mxu0  ;;  %2557 = vmatprep.mubr.bf16.mxu1 %v2177_v14  ;;  %3164 = vrot.lane.b32.xlu1 %v2729_v4, %s3865_s16 }
 0x369   : > { %6012 = vst [vmem:[#allocation37_spill] sm:$0xff] %v5421_v8  ;;  %vm1848_vm13 = vcmp.gt.f32.partialorder %v1688_v34, 0.0  ;;  %v1976_v42 = vmul.f32 0.01, %v1688_v34  ;;  %v1690_v15 = vadd.f32 %v1689_v1, %v4814_v24  ;;  %v5425_v29 = vpop.permute.xlu0 %2922  ;;  %2558 = vmatmul.mubr.bf16.gmra.mxu1 %v2176_v0  ;;  %3170 = vrot.lane.b32.xlu0 %v2732_v58, %s3865_s16  ;;  %v2103_v58 = vsel %vm1847_vm14, %v1686_v22, %v1975_v59  ;;  %v2733_v0 = vld [vmem:[%s5108_s15 + $0x1b8] sm:$0xff]  ;;  %v2736_v8 = vld [vmem:[%s5108_s15 + $0x1d0] sm:$0xff] }
 0x36a   : > { %6013 = vst [vmem:[#allocation38_spill] sm:$0xff] %v5425_v29  ;;  %v1693_v40 = vpop.f32.mrf.mxu0 }
 0x36b   : > { %vm1849_vm1 = vcmp.gt.f32.partialorder %v1690_v15, 0.0  ;;  %v1977_v14 = vmul.f32 0.01, %v1690_v15  ;;  %v2104_v5 = vsel %vm1848_vm13, %v1688_v34, %v1976_v42  ;;  %v1694_v34 = vadd.f32 %v1693_v40, %v4739_v21  ;;  %v2738_v40 = vld [vmem:[%s5108_s15 + $0x1e0] sm:$0xff] }
 0x36c   : > { %v5430_v61 = vpop.permute.xlu1 %2916  ;;  %v1695_v18 = vpop.f32.mrf.mxu0  ;;  %3168 = vrot.lane.b32.xlu1 %v2731_v48, %s3865_s16 }
 0x36d   : > { %6014 = vst [vmem:[#allocation39_spill] sm:$0xff] %v5430_v61  ;;  %v5434_v54 = vpop.f32.mrf.mxu1  ;;  %v5436_v39 = vpop.permute.xlu0 %2926  ;;  %v2105_v4 = vsel %vm1849_vm1, %v1690_v15, %v1977_v14  ;;  %3174 = vrot.lane.b32.xlu0 %v2734_v32, %s3865_s16  ;;  %v1696_v1 = vadd.f32 %v1695_v18, %v4814_v24  ;;  %v2102_v61 = vsel %vm1846_vm15, %v1684_v52, %v1974_v28  ;;  %v2735_v28 = vld [vmem:[%s5108_s15 + $0x1c8] sm:$0xff]  ;;  %vm1850_vm4 = vcmp.gt.f32.partialorder %v1694_v34, 0.0 }
 0x36e   : > { %6015 = vst [vmem:[#allocation40_spill] sm:$0xff] %v5436_v39  ;;  %v1697_v29 = vpop.f32.mrf.mxu0  ;;  %v2179_v35 = vpack.c.bf16 %v2105_v4, %v2103_v58  ;;  %v2178_v39 = vpack.c.bf16 %v2104_v5, %v2102_v61  ;;  %v1978_v61 = vmul.f32 0.01, %v1694_v34 }
 0x36f   : > { %v1698_v42 = vadd.f32 %v1697_v29, %v4739_v21  ;;  %v2441_v48 = vpop.f32.mrf.mxu1  ;;  %v1979_v29 = vmul.f32 0.01, %v1696_v1  ;;  %vm1851_vm3 = vcmp.gt.f32.partialorder %v1696_v1, 0.0 }
 0x370   : > { %v5445_v22 = vpop.permute.xlu1 %2920  ;;  %v1699_v59 = vpop.f32.mrf.mxu0  ;;  %2565 = vmatprep.mubr.bf16.mxu1 %v2179_v35  ;;  %3172 = vrot.lane.b32.xlu1 %v2733_v0, %s3865_s16  ;;  %v2737_v48 = vld [vmem:[%s5108_s15 + $0x1d8] sm:$0xff]  ;;  %v2106_v31 = vsel %vm1850_vm4, %v1694_v34, %v1978_v61 }
 0x371   : > { %6016 = vst [vmem:[#allocation41_spill] sm:$0xff] %v5445_v22  ;;  %v1980_v15 = vmul.f32 0.01, %v1698_v42  ;;  %v1700_v32 = vadd.f32 %v1699_v59, %v4814_v24  ;;  %v5449_v14 = vpop.f32.mrf.mxu1  ;;  %v5451_v52 = vpop.permute.xlu0 %2930  ;;  %2566 = vmatmul.mubr.bf16.gmra.mxu1 %v2178_v39  ;;  %3178 = vrot.lane.b32.xlu0 %v2736_v8, %s3865_s16  ;;  %vm1852_vm2 = vcmp.gt.f32.partialorder %v1698_v42, 0.0  ;;  %v2740_v22 = vld [vmem:[%s5108_s15 + $0x1f0] sm:$0xff] }
 0x372   : > { %6017 = vst [vmem:[#allocation42_spill] sm:$0xff] %v5451_v52  ;;  %v1703_v18 = vpop.f32.mrf.mxu0  ;;  %v2107_v52 = vsel %vm1851_vm3, %v1696_v1, %v1979_v29  ;;  %v2739_v1 = vld [vmem:[%s5108_s15 + $0x1e8] sm:$0xff] }
 0x373   : > { %vm1853_vm0 = vcmp.gt.f32.partialorder %v1700_v32, 0.0  ;;  %v1981_v35 = vmul.f32 0.01, %v1700_v32  ;;  %v2444_v5 = vpop.f32.mrf.mxu1  ;;  %v2108_v0 = vsel %vm1852_vm2, %v1698_v42, %v1980_v15  ;;  %v1704_v42 = vadd.f32 %v1703_v18, %v4739_v21 }
 0x374   : > { %v5456_v58 = vpop.permute.xlu1 %2924  ;;  %3176 = vrot.lane.b32.xlu1 %v2735_v28, %s3865_s16  ;;  %v1705_v39 = vpop.f32.mrf.mxu0 }
 0x375   : > { %6018 = vst [vmem:[#allocation43_spill] sm:$0xff] %v5456_v58  ;;  %v5459_v4 = vpop.f32.mrf.mxu1  ;;  %v2109_v8 = vsel %vm1853_vm0, %v1700_v32, %v1981_v35  ;;  %3182 = vrot.lane.b32.xlu0 %v2738_v40, %s3865_s16  ;;  %v5463_v59 = vpop.permute.xlu0 %3062  ;;  %v1706_v58 = vadd.f32 %v1705_v39, %v4814_v24  ;;  %v2180_v32 = vpack.c.bf16 %v2108_v0, %v2106_v31  ;;  %vm1854_vm8 = vcmp.gt.f32.partialorder %v1704_v42, 0.0 }
 0x376   : > { %6019 = vst [vmem:[#allocation44_spill] sm:$0xff] %v5463_v59  ;;  %v1707_v37 = vpop.f32.mrf.mxu0  ;;  %v2181_v33 = vpack.c.bf16 %v2109_v8, %v2107_v52  ;;  %v2741_v8 = vld [vmem:[%s5108_s15 + $0x1f8] sm:$0xff] }
 0x377   : > { %v2449_v5 = vpop.f32.mrf.mxu1  ;;  %v1708_v28 = vadd.f32 %v1707_v37, %v4739_v21  ;;  %v1983_v61 = vmul.f32 0.01, %v1706_v58  ;;  %vm1855_vm7 = vcmp.gt.f32.partialorder %v1706_v58, 0.0 }
 0x378   : > { %v5468_v56 = vpop.permute.xlu1 %2928  ;;  %3180 = vrot.lane.b32.xlu1 %v2737_v48, %s3865_s16  ;;  %v1709_v15 = vpop.f32.mrf.mxu0  ;;  %2573 = vmatprep.mubr.bf16.mxu1 %v2181_v33  ;;  %v1982_v33 = vmul.f32 0.01, %v1704_v42  ;;  %v5491_v5 = vld [vmem:[%s5973_s6] ss:$0 sm:$0xff] }
 0x379   : > { %6020 = vst [vmem:[#allocation45_spill] sm:$0xff] %v5468_v56  ;;  %v5472_v40 = vpop.f32.mrf.mxu1  ;;  %3186 = vrot.lane.b32.xlu0 %v2740_v22, %s3865_s16  ;;  %v1710_v34 = vadd.f32 %v1709_v15, %v4814_v24  ;;  %v5477_v52 = vpop.permute.xlu0 %3066  ;;  %2574 = vmatmul.mubr.bf16.gmra.mxu1 %v2180_v32  ;;  %v1984_v37 = vmul.f32 0.01, %v1708_v28  ;;  %vm1856_vm5 = vcmp.gt.f32.partialorder %v1708_v28, 0.0 }
 0x37a   : > { %6021 = vst [vmem:[#allocation46_spill] sm:$0xff] %v5477_v52  ;;  %v1713_v29 = vpop.f32.mrf.mxu0  ;;  %v2111_v52 = vsel %vm1855_vm7, %v1706_v58, %v1983_v61 }
 0x37b   : > { %v2452_v31 = vpop.f32.mrf.mxu1  ;;  %vm1857_vm6 = vcmp.gt.f32.partialorder %v1710_v34, 0.0  ;;  %v1985_v35 = vmul.f32 0.01, %v1710_v34 }
 0x37c   : > { %v5479_v18 = vpop.permute.xlu1 %2932  ;;  %3184 = vrot.lane.b32.xlu1 %v2739_v1, %s3865_s16  ;;  %v1715_v22 = vpop.f32.mrf.mxu0  ;;  %v2112_v1 = vsel %vm1856_vm5, %v1708_v28, %v1984_v37  ;;  %v2384_v28 = vadd.f32 %v5491_v5, %v5089_v43 }
 0x37d   : > { %6022 = vst [vmem:[#allocation47_spill] sm:$0xff] %v5479_v18  ;;  %v5482_v39 = vpop.f32.mrf.mxu1  ;;  %v1716_v0 = vadd.f32 %v1715_v22, %v4814_v24  ;;  %v5486_v48 = vpop.permute.xlu0 %3070  ;;  %v2113_v31 = vsel %vm1857_vm6, %v1710_v34, %v1985_v35  ;;  %v1714_v22 = vadd.f32 %v1713_v29, %v4739_v21  ;;  %v2110_v34 = vsel %vm1854_vm8, %v1704_v42, %v1982_v33 }
 0x37e   : > { %6023 = vst [vmem:[#allocation48_spill] sm:$0xff] %v5486_v48  ;;  %v1717_v32 = vpop.f32.mrf.mxu0  ;;  %v2183_v12 = vpack.c.bf16 %v2113_v31, %v2111_v52  ;;  %v2182_v58 = vpack.c.bf16 %v2112_v1, %v2110_v34  ;;  %v2392_v1 = vadd.f32 %v5491_v5, %v5102_v62 }
 0x37f   : > { %v2457_v15 = vpop.f32.mrf.mxu1  ;;  %v1718_v18 = vadd.f32 %v1717_v32, %v4739_v21  ;;  %v1987_v37 = vmul.f32 0.01, %v1716_v0  ;;  %vm1859_vm11 = vcmp.gt.f32.partialorder %v1716_v0, 0.0  ;;  %vm1858_vm15 = vcmp.gt.f32.partialorder %v1714_v22, 0.0 }
 0x380   : > { %v5495_v56 = vpop.permute.xlu1 %3064  ;;  %3188 = vrot.lane.b32.xlu1 %v2741_v8, %s3865_s16  ;;  %v1719_v48 = vpop.f32.mrf.mxu0  ;;  %2581 = vmatprep.mubr.bf16.mxu1 %v2183_v12  ;;  %v1986_v12 = vmul.f32 0.01, %v1714_v22 }
 0x381   : > { %v5499_v59 = vpop.f32.mrf.mxu1  ;;  %v1720_v35 = vadd.f32 %v1719_v48, %v4814_v24  ;;  %v3075_v32 = vpop.permute.xlu0 %3074  ;;  %v1988_v61 = vmul.f32 0.01, %v1718_v18  ;;  %vm1860_vm13 = vcmp.gt.f32.partialorder %v1718_v18, 0.0  ;;  %2582 = vmatmul.mubr.bf16.gmra.mxu1 %v2182_v58  ;;  %v2115_v15 = vsel %vm1859_vm11, %v1716_v0, %v1987_v37 }
 0x382   : > { %v3261_v29 = vsel %vm3254_vm9, %v5130_v6, %v3075_v32  ;;  %v2114_v37 = vsel %vm1858_vm15, %v1714_v22, %v1986_v12  ;;  %v2387_v22 = vadd.f32 %v5491_v5, %v5096_v2 }
 0x383   : > { %v2460_v8 = vpop.f32.mrf.mxu1  ;;  %vm1861_vm14 = vcmp.gt.f32.partialorder %v1720_v35, 0.0  ;;  %v1989_v52 = vmul.f32 0.01, %v1720_v35  ;;  %v3326_v43 = vsel %vm3319_vm10, %v3261_v29, 0.0 }
 0x384   : > { %v5514_v42 = vpop.permute.xlu1 %3068  ;;  %v3390_v33 = vadd.f32 %v3326_v43, %v2384_v28  ;;  %v2116_v28 = vsel %vm1860_vm13, %v1718_v18, %v1988_v61 }
 0x385   : > { %v5516_v48 = vpop.f32.mrf.mxu1  ;;  %v3079_v6 = vpop.permute.xlu0 %3078  ;;  %v2117_v31 = vsel %vm1861_vm14, %v1720_v35, %v1989_v52  ;;  %v2184_v62 = vpack.c.bf16 %v2116_v28, %v2114_v37  ;;  %v2400_v52 = vadd.f32 %v5491_v5, %v5126_v13 }
 0x386   : > { %3455 = vst.msk [vmem:[%s5511_s21 + $0x30] sm:$0xff] %vm3448_vm12, %v3390_v33  ;;  %v3263_v34 = vsel %vm3254_vm9, %v5144_v26, %v3079_v6  ;;  %v2185_v58 = vpack.c.bf16 %v2117_v31, %v2115_v15 }
 0x387   : > { %v2465_v32 = vpop.f32.mrf.mxu1  ;;  %v3328_v29 = vsel %vm3319_vm10, %v3263_v34, 0.0 }
 0x388   : > { %v5527_v8 = vpop.permute.xlu1 %3072  ;;  %v3392_v43 = vadd.f32 %v3328_v29, %v2392_v1  ;;  %2589 = vmatprep.mubr.bf16.mxu1 %v2185_v58 }
 0x389   : > { %v5529_v0 = vpop.f32.mrf.mxu1  ;;  %v3083_v35 = vpop.permute.xlu0 %3082  ;;  %2590 = vmatmul.mubr.bf16.gmra.mxu1 %v2184_v62 }
 0x38a   : > { %3457 = vst.msk [vmem:[%s5511_s21 + $0x40] sm:$0xff] %vm3448_vm12, %v3392_v43  ;;  %v3265_v26 = vsel %vm3254_vm9, %v5157_v23, %v3083_v35  ;;  %v2408_v23 = vadd.f32 %v5491_v5, %v5153_v46 }
 0x38b   : > { %v2468_v18 = vpop.f32.mrf.mxu1  ;;  %v3330_v61 = vsel %vm3319_vm10, %v3265_v26, 0.0 }
 0x38c   : > { %v3077_v33 = vpop.permute.xlu1 %3076  ;;  %v3394_v12 = vadd.f32 %v3330_v61, %v2400_v52 }
 0x38d   : > { %v3262_v6 = vsel %vm3254_vm9, %v5171_v9, %v3077_v33  ;;  %v5542_v15 = vpop.f32.mrf.mxu1  ;;  %v3087_v31 = vpop.permute.xlu0 %3086  ;;  %v2395_v9 = vadd.f32 %v5491_v5, %v5116_v30 }
 0x38e   : > { %v3327_v13 = vsel %vm3319_vm10, %v3262_v6, 0.0  ;;  %3459 = vst.msk [vmem:[%s5511_s21 + $0x50] sm:$0xff] %vm3448_vm12, %v3394_v12  ;;  %v3267_v34 = vsel %vm3254_vm9, %v5173_v63, %v3087_v31  ;;  %v2416_v63 = vadd.f32 %v5491_v5, %v5182_v49 }
 0x38f   : > { %v3391_v1 = vadd.f32 %v3327_v13, %v2387_v22  ;;  %v2473_v2 = vpop.f32.mrf.mxu1  ;;  %v3332_v32 = vsel %vm3319_vm10, %v3267_v34, 0.0 }
 0x390   : > { %v3081_v58 = vpop.permute.xlu1 %3080  ;;  %v3396_v28 = vadd.f32 %v3332_v32, %v2408_v23 }
 0x391   : > { %3456 = vst.msk [vmem:[%s5511_s21 + $0x38] sm:$0xff] %vm3448_vm12, %v3391_v1  ;;  %v3264_v46 = vsel %vm3254_vm9, %v5184_v60, %v3081_v58  ;;  %v5558_v29 = vpop.f32.mrf.mxu1  ;;  %v3091_v37 = vpop.permute.xlu0 %3090  ;;  %v2403_v60 = vadd.f32 %v5491_v5, %v5138_v10 }
 0x392   : > { %v3329_v43 = vsel %vm3319_vm10, %v3264_v46, 0.0  ;;  %3461 = vst.msk [vmem:[%s5511_s21 + $0x60] sm:$0xff] %vm3448_vm12, %v3396_v28  ;;  %v3269_v30 = vsel %vm3254_vm9, %v5186_v50, %v3091_v37  ;;  %v2424_v50 = vadd.f32 %v5491_v5, %v5209_v16 }
 0x393   : > { %v3393_v35 = vadd.f32 %v3329_v43, %v2395_v9  ;;  %v2476_v62 = vpop.f32.mrf.mxu1  ;;  %v3334_v52 = vsel %vm3319_vm10, %v3269_v30, 0.0 }
 0x394   : > { %v3085_v26 = vpop.permute.xlu1 %3084  ;;  %v3398_v18 = vadd.f32 %v3334_v52, %v2416_v63 }
 0x395   : > { %3458 = vst.msk [vmem:[%s5511_s21 + $0x48] sm:$0xff] %vm3448_vm12, %v3393_v35  ;;  %v3266_v49 = vsel %vm3254_vm9, %v5196_v44, %v3085_v26  ;;  %v5574_v61 = vpop.f32.mrf.mxu1  ;;  %v3095_v22 = vpop.permute.xlu0 %3094  ;;  %v2411_v44 = vadd.f32 %v5491_v5, %v5166_v36 }
 0x396   : > { %v3331_v33 = vsel %vm3319_vm10, %v3266_v49, 0.0  ;;  %3463 = vst.msk [vmem:[%s5511_s21 + $0x70] sm:$0xff] %vm3448_vm12, %v3398_v18  ;;  %v3271_v10 = vsel %vm3254_vm9, %v5198_v7, %v3095_v22  ;;  %v2432_v7 = vadd.f32 %v5491_v5, %v5232_v11  ;;  %v2448_v49 = vadd.f32 %v5491_v5, %v5459_v4 }
 0x397   : > { %v3395_v12 = vadd.f32 %v3331_v33, %v2403_v60  ;;  %v2481_v6 = vpop.f32.mrf.mxu1  ;;  %v3336_v13 = vsel %vm3319_vm10, %v3271_v10, 0.0 }
 0x398   : > { %v3089_v31 = vpop.permute.xlu1 %3088  ;;  %v3400_v23 = vadd.f32 %v3336_v13, %v2424_v50 }
 0x399   : > { %3460 = vst.msk [vmem:[%s5511_s21 + $0x58] sm:$0xff] %vm3448_vm12, %v3395_v12  ;;  %v3268_v16 = vsel %vm3254_vm9, %v5211_v17, %v3089_v31  ;;  %v5590_v1 = vpop.f32.mrf.mxu1  ;;  %v3099_v2 = vpop.permute.xlu0 %3098  ;;  %v2419_v17 = vadd.f32 %v5491_v5, %v5194_v3  ;;  %v2435_v12 = vadd.f32 %v5491_v5, %v5242_v38 }
 0x39a   : > { %v3333_v34 = vsel %vm3319_vm10, %v3268_v16, 0.0  ;;  %3465 = vst.msk [vmem:[%s5511_s21 + $0x80] sm:$0xff] %vm3448_vm12, %v3400_v23  ;;  %v3273_v36 = vsel %vm3254_vm9, %v5213_v25, %v3099_v2  ;;  %v2440_v25 = vadd.f32 %v5491_v5, %v5434_v54 }
 0x39b   : > { %v3397_v32 = vadd.f32 %v3333_v34, %v2411_v44  ;;  %v2484_v58 = vpop.f32.mrf.mxu1  ;;  %v3338_v9 = vsel %vm3319_vm10, %v3273_v36, 0.0 }
 0x39c   : > { %v3093_v28 = vpop.permute.xlu1 %3092  ;;  %v3402_v46 = vadd.f32 %v3338_v9, %v2432_v7 }
 0x39d   : > { %3462 = vst.msk [vmem:[%s5511_s21 + $0x68] sm:$0xff] %vm3448_vm12, %v3397_v32  ;;  %v3270_v11 = vsel %vm3254_vm9, %v5221_v45, %v3093_v28  ;;  %v5606_v43 = vpop.f32.mrf.mxu1  ;;  %v3103_v63 = vpop.permute.xlu0 %3102  ;;  %v2427_v45 = vadd.f32 %v5491_v5, %v5219_v51 }
 0x39e   : > { %v3335_v37 = vsel %vm3319_vm10, %v3270_v11, 0.0  ;;  %3467 = vst.msk [vmem:[%s5511_s21 + $0x90] sm:$0xff] %vm3448_vm12, %v3402_v46  ;;  %v3275_v3 = vsel %vm3254_vm9, %v5223_v19, %v3103_v63 }
 0x39f   : > { %v3399_v35 = vadd.f32 %v3335_v37, %v2419_v17  ;;  %v2489_v30 = vpop.f32.mrf.mxu1  ;;  %v3340_v62 = vsel %vm3319_vm10, %v3275_v3, 0.0 }
 0x3a0   : > { %v3097_v52 = vpop.permute.xlu1 %3096  ;;  %v3404_v26 = vadd.f32 %v3340_v62, %v2440_v25 }
 0x3a1   : > { %3464 = vst.msk [vmem:[%s5511_s21 + $0x78] sm:$0xff] %vm3448_vm12, %v3399_v35  ;;  %v3272_v54 = vsel %vm3254_vm9, %v5234_v20, %v3097_v52  ;;  %v5622_v60 = vpop.f32.mrf.mxu1  ;;  %v3107_v19 = vpop.permute.xlu0 %3106  ;;  %v6024_v35 = vld [vmem:[#allocation8_spill] sm:$0xff] }
 0x3a2   : > { %v3337_v18 = vsel %vm3319_vm10, %v3272_v54, 0.0  ;;  %3469 = vst.msk [vmem:[%s5511_s21 + $0xa0] sm:$0xff] %vm3448_vm12, %v3404_v26  ;;  %v3277_v51 = vsel %vm3254_vm9, %v5236_v47, %v3107_v19  ;;  %v2456_v47 = vadd.f32 %v5491_v5, %v5482_v39 }
 0x3a3   : > { %v3401_v33 = vadd.f32 %v3337_v18, %v2427_v45  ;;  %v2492_v22 = vpop.f32.mrf.mxu1  ;;  %v3342_v50 = vsel %vm3319_vm10, %v3277_v51, 0.0  ;;  %v6025_v45 = vld [vmem:[#allocation9_spill] sm:$0xff]  ;;  %v2480_v18 = vadd.f32 %v5491_v5, %v5574_v61  ;;  %v6027_v61 = vld [vmem:[#allocation11_spill] sm:$0xff] }
 0x3a4   : > { %v3101_v20 = vpop.permute.xlu1 %3100  ;;  %v3406_v10 = vadd.f32 %v3342_v50, %v2448_v49  ;;  %v2467_v50 = vadd.f32 %v5491_v5, %v5529_v0 }
 0x3a5   : > { %3466 = vst.msk [vmem:[%s5511_s21 + $0x88] sm:$0xff] %vm3448_vm12, %v3401_v33  ;;  %v3274_v4 = vsel %vm3254_vm9, %v5244_v55, %v3101_v20  ;;  %v3111_v13 = vpop.permute.xlu0 %3110  ;;  %v5643_v44 = vpop.f32.mrf.mxu1  ;;  %v2443_v55 = vadd.f32 %v5491_v5, %v5449_v14 }
 0x3a6   : > { %v3339_v6 = vsel %vm3319_vm10, %v3274_v4, 0.0  ;;  %3471 = vst.msk [vmem:[%s5511_s21 + $0xb0] sm:$0xff] %vm3448_vm12, %v3406_v10  ;;  %v3279_v38 = vsel %vm3254_vm9, %v5246_v27, %v3111_v13  ;;  %v2464_v27 = vadd.f32 %v5491_v5, %v5516_v48  ;;  %v2488_v13 = vadd.f32 %v5491_v5, %v5606_v43 }
 0x3a7   : > { %v3403_v31 = vadd.f32 %v3339_v6, %v2435_v12  ;;  %v3344_v23 = vsel %vm3319_vm10, %v3279_v38, 0.0  ;;  %v2497_v2 = vpop.f32.mrf.mxu1  ;;  %v6028_v38 = vld [vmem:[#allocation12_spill] sm:$0xff] }
 0x3a8   : > { %v3105_v16 = vpop.permute.xlu1 %3104  ;;  %v3408_v34 = vadd.f32 %v3344_v23, %v2456_v47 }
 0x3a9   : > { %3468 = vst.msk [vmem:[%s5511_s21 + $0x98] sm:$0xff] %vm3448_vm12, %v3403_v31  ;;  %v3276_v39 = vsel %vm3254_vm9, %v5255_v57, %v3105_v16  ;;  %v3115_v32 = vpop.permute.xlu0 %3114  ;;  %v5659_v58 = vpop.f32.mrf.mxu1  ;;  %v2451_v57 = vadd.f32 %v5491_v5, %v5472_v40 }
 0x3aa   : > { %v3341_v7 = vsel %vm3319_vm10, %v3276_v39, 0.0  ;;  %3473 = vst.msk [vmem:[%s5511_s21 + $0xc0] sm:$0xff] %vm3448_vm12, %v3408_v34  ;;  %v3281_v14 = vsel %vm3254_vm9, %v5257_v41, %v3115_v32  ;;  %v2472_v41 = vadd.f32 %v5491_v5, %v5542_v15  ;;  %v6029_v39 = vld [vmem:[#allocation13_spill] sm:$0xff] }
 0x3ab   : > { %v3405_v36 = vadd.f32 %v3341_v7, %v2443_v55  ;;  %v3346_v9 = vsel %vm3319_vm10, %v3281_v14, 0.0  ;;  %v2500_v46 = vpop.f32.mrf.mxu1  ;;  %v2475_v55 = vadd.f32 %v5491_v5, %v5558_v29 }
 0x3ac   : > { %v3109_v28 = vpop.permute.xlu1 %3108  ;;  %v3410_v17 = vadd.f32 %v3346_v9, %v2464_v27  ;;  %v2496_v27 = vadd.f32 %v5491_v5, %v5643_v44  ;;  %v6030_v9 = vld [vmem:[#allocation14_spill] sm:$0xff] }
 0x3ad   : > { %3470 = vst.msk [vmem:[%s5511_s21 + $0xa8] sm:$0xff] %vm3448_vm12, %v3405_v36  ;;  %v3278_v48 = vsel %vm3254_vm9, %v5263_v53, %v3109_v28  ;;  %v3119_v37 = vpop.permute.xlu0 %3118  ;;  %v2503_v25 = vpop.f32.mrf.mxu1  ;;  %v2459_v53 = vadd.f32 %v5491_v5, %v5499_v59  ;;  %v6026_v59 = vld [vmem:[#allocation10_spill] sm:$0xff] }
 0x3ae   : > { %v3343_v11 = vsel %vm3319_vm10, %v3278_v48, 0.0  ;;  %3475 = vst.msk [vmem:[%s5511_s21 + $0xd0] sm:$0xff] %vm3448_vm12, %v3410_v17  ;;  %v3283_v40 = vsel %vm3254_vm9, %v6024_v35, %v3119_v37  ;;  %v2483_v17 = vadd.f32 %v5491_v5, %v5590_v1 }
 0x3af   : > { %v3407_v63 = vadd.f32 %v3343_v11, %v2451_v57  ;;  %v3348_v3 = vsel %vm3319_vm10, %v3283_v40, 0.0  ;;  %v2505_v52 = vpop.f32.mrf.mxu1  ;;  %v6031_v11 = vld [vmem:[#allocation15_spill] sm:$0xff]  ;;  %v6032_v40 = vld [vmem:[#allocation16_spill] sm:$0xff] }
 0x3b0   : > { %v3113_v30 = vpop.permute.xlu1 %3112  ;;  %v3412_v62 = vadd.f32 %v3348_v3, %v2472_v41  ;;  %v6033_v52 = vld [vmem:[#allocation17_spill] sm:$0xff] }
 0x3b1   : > { %3472 = vst.msk [vmem:[%s5511_s21 + $0xb8] sm:$0xff] %vm3448_vm12, %v3407_v63  ;;  %v3280_v15 = vsel %vm3254_vm9, %v6025_v45, %v3113_v30  ;;  %v3123_v54 = vpop.permute.xlu0 %3122  ;;  %v5689_v49 = vpop.f32.mrf.mxu1  ;;  %v2504_v63 = vadd.f32 %v5491_v5, %v2503_v25 }
 0x3b2   : > { %v3345_v26 = vsel %vm3319_vm10, %v3280_v15, 0.0  ;;  %3477 = vst.msk [vmem:[%s5511_s21 + $0xe0] sm:$0xff] %vm3448_vm12, %v3412_v62  ;;  %v3285_v33 = vsel %vm3254_vm9, %v6026_v59, %v3123_v54 }
 0x3b3   : > { %v3409_v19 = vadd.f32 %v3345_v26, %v2459_v53  ;;  %v3350_v51 = vsel %vm3319_vm10, %v3285_v33, 0.0  ;;  %v2508_v12 = vpop.f32.mrf.mxu1  ;;  %v2491_v53 = vadd.f32 %v5491_v5, %v5622_v60  ;;  %v2499_v33 = vadd.f32 %v5491_v5, %v5659_v58  ;;  %v6036_v58 = vld [vmem:[#allocation21_spill] sm:$0xff] }
 0x3b4   : > { %v3117_v22 = vpop.permute.xlu1 %3116  ;;  %v3414_v20 = vadd.f32 %v3350_v51, %v2480_v18  ;;  %v6034_v18 = vld [vmem:[#allocation18_spill] sm:$0xff] }
 0x3b5   : > { %3474 = vst.msk [vmem:[%s5511_s21 + $0xc8] sm:$0xff] %vm3448_vm12, %v3409_v19  ;;  %v3282_v10 = vsel %vm3254_vm9, %v6027_v61, %v3117_v22  ;;  %v3127_v6 = vpop.permute.xlu0 %3126  ;;  %v2511_v31 = vpop.f32.mrf.mxu1  ;;  %v6035_v22 = vld [vmem:[#allocation19_spill] sm:$0xff] }
 0x3b6   : > { %v3347_v4 = vsel %vm3319_vm10, %v3282_v10, 0.0  ;;  %3479 = vst.msk [vmem:[%s5511_s21 + $0xf0] sm:$0xff] %vm3448_vm12, %v3414_v20  ;;  %v3287_v0 = vsel %vm3254_vm9, %v6028_v38, %v3127_v6  ;;  %v2512_v26 = vadd.f32 %v5491_v5, %v2511_v31 }
 0x3b7   : > { %v3411_v47 = vadd.f32 %v3347_v4, %v2467_v50  ;;  %v3352_v23 = vsel %vm3319_vm10, %v3287_v0, 0.0  ;;  %v2513_v2 = vpop.f32.mrf.mxu1  ;;  %v2507_v4 = vadd.f32 %v5491_v5, %v5689_v49 }
 0x3b8   : > { %v3121_v16 = vpop.permute.xlu1 %3120  ;;  %v3416_v34 = vadd.f32 %v3352_v23, %v2488_v13  ;;  %v6037_v2 = vld [vmem:[#allocation23_spill] sm:$0xff] }
 0x3b9   : > { %3476 = vst.msk [vmem:[%s5511_s21 + $0xd8] sm:$0xff] %vm3448_vm12, %v3411_v47  ;;  %v3284_v43 = vsel %vm3254_vm9, %v6029_v39, %v3121_v16  ;;  %v3131_v32 = vpop.permute.xlu0 %3130  ;;  %v2514_v14 = vpop.f32.mrf.mxu1 }
 0x3ba   : > { %v3349_v7 = vsel %vm3319_vm10, %v3284_v43, 0.0  ;;  %3481 = vst.msk [vmem:[%s5511_s21 + $0x100] sm:$0xff] %vm3448_vm12, %v3416_v34  ;;  %v3289_v29 = vsel %vm3254_vm9, %v6030_v9, %v3131_v32  ;;  %v2515_v34 = vadd.f32 %v5491_v5, %v2514_v14 }
 0x3bb   : > { %v3413_v36 = vadd.f32 %v3349_v7, %v2475_v55  ;;  %v3354_v28 = vsel %vm3319_vm10, %v3289_v29, 0.0  ;;  %v2516_v48 = vpop.f32.mrf.mxu1 }
 0x3bc   : > { %v3125_v57 = vpop.permute.xlu1 %3124  ;;  %v3418_v46 = vadd.f32 %v3354_v28, %v2496_v27 }
 0x3bd   : > { %3478 = vst.msk [vmem:[%s5511_s21 + $0xe8] sm:$0xff] %vm3448_vm12, %v3413_v36  ;;  %v3286_v44 = vsel %vm3254_vm9, %v6031_v11, %v3125_v57  ;;  %v3135_v41 = vpop.permute.xlu0 %3134 }
 0x3be   : > { %v3351_v37 = vsel %vm3319_vm10, %v3286_v44, 0.0  ;;  %3483 = vst.msk [vmem:[%s5511_s21 + $0x110] sm:$0xff] %vm3448_vm12, %v3418_v46  ;;  %v3291_v3 = vsel %vm3254_vm9, %v6032_v40, %v3135_v41  ;;  %v6038_v40 = vld [vmem:[#allocation44_spill] sm:$0xff] }
 0x3bf   : > { %v3415_v35 = vadd.f32 %v3351_v37, %v2483_v17  ;;  %v3356_v1 = vsel %vm3319_vm10, %v3291_v3, 0.0  ;;  %v6039_v3 = vld [vmem:[#allocation2_spill] sm:$0xff] }
 0x3c0   : > { %v3129_v30 = vpop.permute.xlu1 %3128  ;;  %v3420_v62 = vadd.f32 %v3356_v1, %v2504_v63  ;;  %v3255_v1 = vsel %vm3254_vm9, %v6039_v3, %v6038_v40 }
 0x3c1   : > { %3480 = vst.msk [vmem:[%s5511_s21 + $0xf8] sm:$0xff] %vm3448_vm12, %v3415_v35  ;;  %v3288_v25 = vsel %vm3254_vm9, %v6033_v52, %v3129_v30  ;;  %v3139_v15 = vpop.permute.xlu0 %3138 }
 0x3c2   : > { %v3353_v45 = vsel %vm3319_vm10, %v3288_v25, 0.0  ;;  %3485 = vst.msk [vmem:[%s5511_s21 + $0x120] sm:$0xff] %vm3448_vm12, %v3420_v62  ;;  %v3293_v19 = vsel %vm3254_vm9, %v6034_v18, %v3139_v15 }
 0x3c3   : > { %v3417_v54 = vadd.f32 %v3353_v45, %v2491_v53  ;;  %v3358_v60 = vsel %vm3319_vm10, %v3293_v19, 0.0  ;;  %v6040_v19 = vld [vmem:[#allocation3_spill] sm:$0xff] }
 0x3c4   : > { %v3133_v59 = vpop.permute.xlu1 %3132  ;;  %v3422_v51 = vadd.f32 %v3358_v60, %v2512_v26  ;;  %v3320_v26 = vsel %vm3319_vm10, %v3255_v1, 0.0  ;;  %v3256_v60 = vsel %vm3254_vm9, %v6040_v19, %v5495_v56  ;;  %v6048_v1 = vld [vmem:[#allocation25_spill] sm:$0xff] }
 0x3c5   : > { %3482 = vst.msk [vmem:[%s5511_s21 + $0x108] sm:$0xff] %vm3448_vm12, %v3417_v54  ;;  %v3290_v50 = vsel %vm3254_vm9, %v6035_v22, %v3133_v59 }
 0x3c6   : > { %v3355_v20 = vsel %vm3319_vm10, %v3290_v50, 0.0  ;;  %3487 = vst.msk [vmem:[%s5511_s21 + $0x130] sm:$0xff] %vm3448_vm12, %v3422_v51 }
 0x3c7   : > { %v3419_v12 = vadd.f32 %v3355_v20, %v2499_v33  ;;  %v1723_v61 = vpop.f32.mrf.mxu0 }
 0x3c8   : > { %v3137_v10 = vpop.permute.xlu1 %3136  ;;  %v1724_v38 = vadd.f32 %v1723_v61, %v4739_v21  ;;  %v3321_v61 = vsel %vm3319_vm10, %v3256_v60, 0.0 }
 0x3c9   : > { %3484 = vst.msk [vmem:[%s5511_s21 + $0x118] sm:$0xff] %vm3448_vm12, %v3419_v12  ;;  %v3292_v6 = vsel %vm3254_vm9, %v6036_v58, %v3137_v10  ;;  %v1725_v13 = vpop.f32.mrf.mxu0  ;;  %v6042_v58 = vld [vmem:[#allocation5_spill] sm:$0xff] }
 0x3ca   : > { %v3357_v47 = vsel %vm3319_vm10, %v3292_v6, 0.0  ;;  %v1726_v31 = vadd.f32 %v1725_v13, %v4814_v24  ;;  %v1990_v36 = vmul.f32 0.01, %v1724_v38  ;;  %vm1862_vm3 = vcmp.gt.f32.partialorder %v1724_v38, 0.0 }
 0x3cb   : > { %v3421_v0 = vadd.f32 %v3357_v47, %v2507_v4  ;;  %v1727_v23 = vpop.f32.mrf.mxu0  ;;  %v6041_v4 = vld [vmem:[#allocation46_spill] sm:$0xff] }
 0x3cc   : > { %v1728_v16 = vadd.f32 %v1727_v23, %v4739_v21  ;;  %v3141_v55 = vpop.permute.xlu1 %3140  ;;  %v1991_v49 = vmul.f32 0.01, %v1726_v31  ;;  %vm1863_vm2 = vcmp.gt.f32.partialorder %v1726_v31, 0.0  ;;  %v2118_v41 = vsel %vm1862_vm3, %v1724_v38, %v1990_v36 }
 0x3cd   : > { %3486 = vst.msk [vmem:[%s5511_s21 + $0x128] sm:$0xff] %vm3448_vm12, %v3421_v0  ;;  %v3294_v39 = vsel %vm3254_vm9, %v6037_v2, %v3141_v55  ;;  %v1729_v43 = vpop.f32.mrf.mxu0  ;;  %v3257_v56 = vsel %vm3254_vm9, %v6042_v58, %v6041_v4  ;;  %v6043_v0 = vld [vmem:[#allocation6_spill] sm:$0xff]  ;;  %v6051_v4 = vld [vmem:[#allocation24_spill] sm:$0xff] }
 0x3ce   : > { %vm1864_vm1 = vcmp.gt.f32.partialorder %v1728_v16, 0.0  ;;  %v1992_v7 = vmul.f32 0.01, %v1728_v16  ;;  %v3359_v32 = vsel %vm3319_vm10, %v3294_v39, 0.0  ;;  %v1730_v27 = vadd.f32 %v1729_v43, %v4814_v24  ;;  %v6044_v39 = vld [vmem:[#allocation48_spill] sm:$0xff] }
 0x3cf   : > { %v3423_v9 = vadd.f32 %v3359_v32, %v2515_v34  ;;  %v1733_v29 = vpop.f32.mrf.mxu0  ;;  %v2119_v46 = vsel %vm1863_vm2, %v1726_v31, %v1991_v49  ;;  %v3322_v31 = vsel %vm3319_vm10, %v3257_v56, 0.0  ;;  %v3258_v23 = vsel %vm3254_vm9, %v6043_v0, %v5514_v42  ;;  %v6045_v43 = vld [vmem:[#allocation4_spill] sm:$0xff]  ;;  %v6052_v0 = vld [vmem:[#allocation29_spill] sm:$0xff] }
 0x3d0   : > { %vm1865_vm0 = vcmp.gt.f32.partialorder %v1730_v27, 0.0  ;;  %v1993_v14 = vmul.f32 0.01, %v1730_v27  ;;  %v2120_v57 = vsel %vm1864_vm1, %v1728_v16, %v1992_v7  ;;  %v1734_v11 = vadd.f32 %v1733_v29, %v4739_v21  ;;  %v6046_v29 = vld [vmem:[#allocation7_spill] sm:$0xff] }
 0x3d1   : > { %3488 = vst.msk [vmem:[%s5511_s21 + $0x138] sm:$0xff] %vm3448_vm12, %v3423_v9  ;;  %v1735_v28 = vpop.f32.mrf.mxu0  ;;  %v2186_v35 = vpack.c.bf16 %v2120_v57, %v2118_v41  ;;  %v3323_v49 = vsel %vm3319_vm10, %v3258_v23, 0.0  ;;  %v3259_v7 = vsel %vm3254_vm9, %v6045_v43, %v6044_v39  ;;  %v6053_v43 = vld [vmem:[#allocation26_spill] sm:$0xff] }
 0x3d2   : > { %v1736_v17 = vadd.f32 %v1735_v28, %v4814_v24  ;;  %v2121_v48 = vsel %vm1865_vm0, %v1730_v27, %v1993_v14  ;;  %v1994_v25 = vmul.f32 0.01, %v1734_v11  ;;  %vm1866_vm6 = vcmp.gt.f32.partialorder %v1734_v11, 0.0 }
 0x3d3   : > { %v1737_v44 = vpop.f32.mrf.mxu0  ;;  %v2187_v37 = vpack.c.bf16 %v2121_v48, %v2119_v46  ;;  %v3324_v36 = vsel %vm3319_vm10, %v3259_v7, 0.0  ;;  %v3260_v14 = vsel %vm3254_vm9, %v6046_v29, %v5527_v8 }
 0x3d4   : > { %v1738_v63 = vadd.f32 %v1737_v44, %v4739_v21  ;;  %v1995_v53 = vmul.f32 0.01, %v1736_v17  ;;  %vm1867_vm5 = vcmp.gt.f32.partialorder %v1736_v17, 0.0  ;;  %v2122_v51 = vsel %vm1866_vm6, %v1734_v11, %v1994_v25  ;;  %v3143_v44 = vpop.permute.xlu0 %3142 }
 0x3d5   : > { %v1739_v30 = vpop.f32.mrf.mxu0  ;;  %2597 = vmatprep.mubr.bf16.mxu1 %v2187_v37  ;;  %v3325_v46 = vsel %vm3319_vm10, %v3260_v14, 0.0  ;;  %v6047_v37 = vld [vmem:[#allocation20_spill] sm:$0xff]  ;;  %v6054_v14 = vld [vmem:[#allocation31_spill] sm:$0xff] }
 0x3d6   : > { %vm1868_vm4 = vcmp.gt.f32.partialorder %v1738_v63, 0.0  ;;  %v1996_v62 = vmul.f32 0.01, %v1738_v63  ;;  %v1740_v52 = vadd.f32 %v1739_v30, %v4814_v24  ;;  %2598 = vmatmul.mubr.bf16.gmra.mxu1 %v2186_v35  ;;  %v2123_v24 = vsel %vm1867_vm5, %v1736_v17, %v1995_v53 }
 0x3d7   : > { %v2359_v45 = vpop.f32.mrf.mxu0  ;;  %v3295_v41 = vsel %vm3254_vm9, %v6047_v37, %v3143_v44  ;;  %v6055_v37 = vld [vmem:[#allocation28_spill] sm:$0xff] }
 0x3d8   : > { %vm1869_vm7 = vcmp.gt.f32.partialorder %v1740_v52, 0.0  ;;  %v1997_v21 = vmul.f32 0.01, %v1740_v52  ;;  %v2360_v15 = vadd.f32 %v5491_v5, %v2359_v45  ;;  %v2124_v54 = vsel %vm1868_vm4, %v1738_v63, %v1996_v62  ;;  %v3145_v63 = vpop.permute.xlu1 %3144  ;;  %v3147_v62 = vpop.permute.xlu0 %3146 }
 0x3d9   : > { %v2361_v18 = vpop.f32.mrf.mxu0  ;;  %v2188_v20 = vpack.c.bf16 %v2124_v54, %v2122_v51  ;;  %v3360_v40 = vsel %vm3319_vm10, %v3295_v41, 0.0  ;;  %v3296_v30 = vsel %vm3254_vm9, %v6048_v1, %v3145_v63 }
 0x3da   : > { %v3384_v59 = vadd.f32 %v3320_v26, %v2360_v15  ;;  %v2125_v33 = vsel %vm1869_vm7, %v1740_v52, %v1997_v21  ;;  %v3361_v45 = vsel %vm3319_vm10, %v3296_v30, 0.0  ;;  %v6049_v15 = vld [vmem:[#allocation22_spill] sm:$0xff]  ;;  %v6056_v30 = vld [vmem:[#allocation33_spill] sm:$0xff] }
 0x3db   : > { %v2362_v22 = vpop.f32.mrf.mxu0  ;;  %v2189_v50 = vpack.c.bf16 %v2125_v33, %v2123_v24  ;;  %v3297_v26 = vsel %vm3254_vm9, %v6049_v15, %v3147_v62  ;;  %v6050_v33 = vld [vmem:[#allocation27_spill] sm:$0xff] }
 0x3dc   : > { %3449 = vst.msk [vmem:[%s5511_s21] sm:$0xff] %vm3448_vm12, %v3384_v59  ;;  %v2363_v12 = vadd.f32 %v5491_v5, %v2362_v22  ;;  %v3149_v18 = vpop.permute.xlu1 %3148  ;;  %v3362_v59 = vsel %vm3319_vm10, %v3297_v26, 0.0  ;;  %v6057_v26 = vld [vmem:[#allocation30_spill] sm:$0xff] }
 0x3dd   : > { %v2364_v10 = vpop.f32.mrf.mxu0  ;;  %2605 = vmatprep.mubr.bf16.mxu1 %v2189_v50  ;;  %v3298_v51 = vsel %vm3254_vm9, %v6050_v33, %v3149_v18  ;;  %v3151_v50 = vpop.permute.xlu0 %3150 }
 0x3de   : > { %v3385_v6 = vadd.f32 %v3321_v61, %v2363_v12  ;;  %2606 = vmatmul.mubr.bf16.gmra.mxu1 %v2188_v20  ;;  %v3363_v61 = vsel %vm3319_vm10, %v3298_v51, 0.0  ;;  %v3299_v58 = vsel %vm3254_vm9, %v6051_v4, %v3151_v50  ;;  %v6058_v51 = vld [vmem:[#allocation35_spill] sm:$0xff] }
 0x3df   : > { %v2367_v13 = vpop.f32.mrf.mxu0 }
 0x3e0   : > { %3450 = vst.msk [vmem:[%s5511_s21 + $0x8] sm:$0xff] %vm3448_vm12, %v3385_v6  ;;  %v2368_v47 = vadd.f32 %v5491_v5, %v2367_v13  ;;  %v3153_v6 = vpop.permute.xlu1 %3152 }
 0x3e1   : > { %v2369_v38 = vpop.f32.mrf.mxu0  ;;  %v3300_v23 = vsel %vm3254_vm9, %v6052_v0, %v3153_v6 }
 0x3e2   : > { %v3386_v16 = vadd.f32 %v3322_v31, %v2368_v47  ;;  %v3364_v31 = vsel %vm3319_vm10, %v3299_v58, 0.0  ;;  %v6059_v58 = vld [vmem:[#allocation32_spill] sm:$0xff] }
 0x3e3   : > { %v2370_v55 = vpop.f32.mrf.mxu0 }
 0x3e4   : > { %3451 = vst.msk [vmem:[%s5511_s21 + $0x10] sm:$0xff] %vm3448_vm12, %v3386_v16  ;;  %v2371_v34 = vadd.f32 %v5491_v5, %v2370_v55  ;;  %v3155_v55 = vpop.permute.xlu0 %3154 }
 0x3e5   : > { %v2372_v2 = vpop.f32.mrf.mxu0  ;;  %v3301_v7 = vsel %vm3254_vm9, %v6053_v43, %v3155_v55 }
 0x3e6   : > { %v3387_v32 = vadd.f32 %v3323_v49, %v2371_v34  ;;  %v3365_v2 = vsel %vm3319_vm10, %v3300_v23, 0.0  ;;  %v6060_v23 = vld [vmem:[#allocation37_spill] sm:$0xff] }
 0x3e7   : > { %v2375_v27 = vpop.f32.mrf.mxu0 }
 0x3e8   : > { %3452 = vst.msk [vmem:[%s5511_s21 + $0x18] sm:$0xff] %vm3448_vm12, %v3387_v32  ;;  %v2376_v42 = vadd.f32 %v5491_v5, %v2375_v27  ;;  %v3157_v27 = vpop.permute.xlu1 %3156 }
 0x3e9   : > { %v2377_v9 = vpop.f32.mrf.mxu0 }
 0x3ea   : > { %v3388_v28 = vadd.f32 %v3324_v36, %v2376_v42  ;;  %v3366_v9 = vsel %vm3319_vm10, %v3301_v7, 0.0 }
 0x3eb   : > { %v2378_v57 = vpop.f32.mrf.mxu0 }
 0x3ec   : > { %3453 = vst.msk [vmem:[%s5511_s21 + $0x20] sm:$0xff] %vm3448_vm12, %v3388_v28  ;;  %v2379_v17 = vadd.f32 %v5491_v5, %v2378_v57  ;;  %v3302_v28 = vsel %vm3254_vm9, %v6054_v14, %v3157_v27 }
 0x3ed   : > { %v2380_v48 = vpop.f32.mrf.mxu0 }
 0x3ee   : > { %v3389_v11 = vadd.f32 %v3325_v46, %v2379_v17  ;;  %v3159_v17 = vpop.permute.xlu0 %3158 }
 0x3ef   : > { %v3303_v41 = vsel %vm3254_vm9, %v6055_v37, %v3159_v17 }
 0x3f0   : > { %3454 = vst.msk [vmem:[%s5511_s21 + $0x28] sm:$0xff] %vm3448_vm12, %v3389_v11  ;;  %v3367_v11 = vsel %vm3319_vm10, %v3302_v28, 0.0  ;;  %v6062_v28 = vld [vmem:[#allocation39_spill] sm:$0xff] }
 0x401   : > { %v2519_v35 = vpop.f32.mrf.mxu1 }
 0x402   : > { %v2520_v8 = vadd.f32 %v5491_v5, %v2519_v35  ;;  %v3161_v35 = vpop.permute.xlu1 %3160 }
 0x403   : > { %v2521_v3 = vpop.f32.mrf.mxu1 }
 0x404   : > { %v3424_v53 = vadd.f32 %v3360_v40, %v2520_v8  ;;  %v3368_v3 = vsel %vm3319_vm10, %v3303_v41, 0.0 }
 0x405   : > { %v2522_v52 = vpop.f32.mrf.mxu1 }
 0x406   : > { %3489 = vst.msk [vmem:[%s5511_s21 + $0x140] sm:$0xff] %vm3448_vm12, %v3424_v53  ;;  %v2523_v25 = vadd.f32 %v5491_v5, %v2522_v52  ;;  %v3304_v53 = vsel %vm3254_vm9, %v6056_v30, %v3161_v35  ;;  %v3163_v52 = vpop.permute.xlu0 %3162 }
 0x407   : > { %v2524_v21 = vpop.f32.mrf.mxu1 }
 0x408   : > { %v3425_v54 = vadd.f32 %v3361_v45, %v2523_v25  ;;  %v3369_v21 = vsel %vm3319_vm10, %v3304_v53, 0.0  ;;  %v6064_v53 = vld [vmem:[#allocation41_spill] sm:$0xff] }
 0x409   : > { %v2527_v19 = vpop.f32.mrf.mxu1 }
 0x40a   : > { %3490 = vst.msk [vmem:[%s5511_s21 + $0x148] sm:$0xff] %vm3448_vm12, %v3425_v54  ;;  %v2528_v60 = vadd.f32 %v5491_v5, %v2527_v19  ;;  %v3305_v54 = vsel %vm3254_vm9, %v6057_v26, %v3163_v52  ;;  %v3165_v19 = vpop.permute.xlu1 %3164 }
 0x40b   : > { %v2529_v24 = vpop.f32.mrf.mxu1 }
 0x40c   : > { %v3426_v22 = vadd.f32 %v3362_v59, %v2528_v60  ;;  %v3370_v24 = vsel %vm3319_vm10, %v3305_v54, 0.0  ;;  %v6065_v54 = vld [vmem:[#allocation38_spill] sm:$0xff] }
 0x40d   : > { %v2530_v20 = vpop.f32.mrf.mxu1 }
 0x40e   : > { %3491 = vst.msk [vmem:[%s5511_s21 + $0x150] sm:$0xff] %vm3448_vm12, %v3426_v22  ;;  %v2531_v12 = vadd.f32 %v5491_v5, %v2530_v20  ;;  %v3306_v22 = vsel %vm3254_vm9, %v6058_v51, %v3165_v19  ;;  %v3167_v20 = vpop.permute.xlu0 %3166 }
 0x40f   : > { %v2532_v10 = vpop.f32.mrf.mxu1 }
 0x410   : > { %v3427_v56 = vadd.f32 %v3363_v61, %v2531_v12  ;;  %v3371_v10 = vsel %vm3319_vm10, %v3306_v22, 0.0  ;;  %v6066_v22 = vld [vmem:[#allocation43_spill] sm:$0xff] }
 0x411   : > { %v2535_v13 = vpop.f32.mrf.mxu1 }
 0x412   : > { %3492 = vst.msk [vmem:[%s5511_s21 + $0x158] sm:$0xff] %vm3448_vm12, %v3427_v56  ;;  %v2536_v47 = vadd.f32 %v5491_v5, %v2535_v13  ;;  %v3307_v56 = vsel %vm3254_vm9, %v6059_v58, %v3167_v20  ;;  %v3169_v13 = vpop.permute.xlu1 %3168 }
 0x413   : > { %v2537_v38 = vpop.f32.mrf.mxu1 }
 0x414   : > { %v3428_v16 = vadd.f32 %v3364_v31, %v2536_v47  ;;  %v3372_v38 = vsel %vm3319_vm10, %v3307_v56, 0.0 }
 0x415   : > { %v2538_v34 = vpop.f32.mrf.mxu1 }
 0x416   : > { %3493 = vst.msk [vmem:[%s5511_s21 + $0x160] sm:$0xff] %vm3448_vm12, %v3428_v16  ;;  %v2539_v49 = vadd.f32 %v5491_v5, %v2538_v34  ;;  %v3308_v16 = vsel %vm3254_vm9, %v6060_v23, %v3169_v13 }
 0x417   : > { %v2540_v39 = vpop.f32.mrf.mxu1 }
 0x418   : > { %v3429_v32 = vadd.f32 %v3365_v2, %v2539_v49  ;;  %v3171_v49 = vpop.permute.xlu0 %3170  ;;  %v3373_v39 = vsel %vm3319_vm10, %v3308_v16, 0.0  ;;  %v6068_v16 = vld [vmem:[#allocation45_spill] sm:$0xff] }
 0x419   : > { %v2543_v42 = vpop.f32.mrf.mxu1 }
 0x41a   : > { %3494 = vst.msk [vmem:[%s5511_s21 + $0x168] sm:$0xff] %vm3448_vm12, %v3429_v32  ;;  %v2544_v36 = vadd.f32 %v5491_v5, %v2543_v42  ;;  %v6061_v32 = vld [vmem:[#allocation34_spill] sm:$0xff]  ;;  %v3173_v42 = vpop.permute.xlu1 %3172 }
 0x41b   : > { %v2545_v29 = vpop.f32.mrf.mxu1  ;;  %v3309_v27 = vsel %vm3254_vm9, %v6061_v32, %v3171_v49  ;;  %v6069_v32 = vld [vmem:[#allocation42_spill] sm:$0xff] }
 0x41c   : > { %v3430_v57 = vadd.f32 %v3366_v9, %v2544_v36  ;;  %v3374_v29 = vsel %vm3319_vm10, %v3309_v27, 0.0 }
 0x41d   : > { %v2546_v46 = vpop.f32.mrf.mxu1 }
 0x41e   : > { %3495 = vst.msk [vmem:[%s5511_s21 + $0x170] sm:$0xff] %vm3448_vm12, %v3430_v57  ;;  %v2547_v48 = vadd.f32 %v5491_v5, %v2546_v46  ;;  %v3310_v57 = vsel %vm3254_vm9, %v6062_v28, %v3173_v42 }
 0x41f   : > { %v2548_v44 = vpop.f32.mrf.mxu1 }
 0x420   : > { %v3431_v63 = vadd.f32 %v3367_v11, %v2547_v48  ;;  %v3375_v11 = vsel %vm3319_vm10, %v3310_v57, 0.0  ;;  %v3175_v44 = vpop.permute.xlu0 %3174  ;;  %v6070_v57 = vld [vmem:[#allocation47_spill] sm:$0xff] }
 0x421   : > { %v2551_v8 = vpop.f32.mrf.mxu1 }
 0x422   : > { %3496 = vst.msk [vmem:[%s5511_s21 + $0x178] sm:$0xff] %vm3448_vm12, %v3431_v63  ;;  %v2552_v40 = vadd.f32 %v5491_v5, %v2551_v8  ;;  %v6063_v63 = vld [vmem:[#allocation36_spill] sm:$0xff]  ;;  %v3177_v8 = vpop.permute.xlu1 %3176 }
 0x423   : > { %v2553_v1 = vpop.f32.mrf.mxu1  ;;  %v3311_v35 = vsel %vm3254_vm9, %v6063_v63, %v3175_v44 }
 0x424   : > { %v3432_v62 = vadd.f32 %v3368_v3, %v2552_v40  ;;  %v3376_v1 = vsel %vm3319_vm10, %v3311_v35, 0.0 }
 0x425   : > { %v2554_v25 = vpop.f32.mrf.mxu1 }
 0x426   : > { %3497 = vst.msk [vmem:[%s5511_s21 + $0x180] sm:$0xff] %vm3448_vm12, %v3432_v62  ;;  %v2555_v45 = vadd.f32 %v5491_v5, %v2554_v25  ;;  %v3312_v62 = vsel %vm3254_vm9, %v6064_v53, %v3177_v8  ;;  %v3179_v25 = vpop.permute.xlu0 %3178 }
 0x427   : > { %v2556_v15 = vpop.f32.mrf.mxu1 }
 0x428   : > { %v3433_v18 = vadd.f32 %v3369_v21, %v2555_v45  ;;  %v3377_v15 = vsel %vm3319_vm10, %v3312_v62, 0.0 }
 0x429   : > { %v2559_v60 = vpop.f32.mrf.mxu1 }
 0x42a   : > { %3498 = vst.msk [vmem:[%s5511_s21 + $0x188] sm:$0xff] %vm3448_vm12, %v3433_v18  ;;  %v2560_v59 = vadd.f32 %v5491_v5, %v2559_v60  ;;  %v3313_v18 = vsel %vm3254_vm9, %v6065_v54, %v3179_v25  ;;  %v3181_v60 = vpop.permute.xlu1 %3180  ;;  %v3183_v56 = vpop.permute.xlu0 %3182 }
 0x42b   : > { %v2561_v33 = vpop.f32.mrf.mxu1 }
 0x42c   : > { %v3434_v50 = vadd.f32 %v3370_v24, %v2560_v59  ;;  %v3378_v33 = vsel %vm3319_vm10, %v3313_v18, 0.0 }
 0x42d   : > { %v2562_v12 = vpop.f32.mrf.mxu1 }
 0x42e   : > { %3499 = vst.msk [vmem:[%s5511_s21 + $0x190] sm:$0xff] %vm3448_vm12, %v3434_v50  ;;  %v2563_v61 = vadd.f32 %v5491_v5, %v2562_v12  ;;  %v3314_v50 = vsel %vm3254_vm9, %v6066_v22, %v3181_v60  ;;  %v3187_v49 = vpop.permute.xlu0 %3186 }
 0x42f   : > { %v2564_v4 = vpop.f32.mrf.mxu1  ;;  %v3317_v27 = vsel %vm3254_vm9, %v6069_v32, %v3187_v49 }
 0x430   : > { %v3435_v6 = vadd.f32 %v3371_v10, %v2563_v61  ;;  %v3854_v61 = vld [vmem:[%s5973_s6] ss:$0 sm:$0xff]  ;;  %v3379_v4 = vsel %vm3319_vm10, %v3314_v50, 0.0 }
 0x431   : > { %v2567_v47 = vpop.f32.mrf.mxu1 }
 0x432   : > { %3500 = vst.msk [vmem:[%s5511_s21 + $0x198] sm:$0xff] %vm3448_vm12, %v3435_v6  ;;  %v2568_v31 = vadd.f32 %v5491_v5, %v2567_v47  ;;  %v6067_v6 = vld [vmem:[#allocation40_spill] sm:$0xff]  ;;  %v3185_v47 = vpop.permute.xlu1 %3184 }
 0x433   : > { %v2569_v0 = vpop.f32.mrf.mxu1  ;;  %v3315_v13 = vsel %vm3254_vm9, %v6067_v6, %v3183_v56 }
 0x434   : > { %v3436_v55 = vadd.f32 %v3372_v38, %v2568_v31  ;;  %v3380_v0 = vsel %vm3319_vm10, %v3315_v13, 0.0 }
 0x435   : > { %v2570_v34 = vpop.f32.mrf.mxu1 }
 0x436   : > { %3501 = vst.msk [vmem:[%s5511_s21 + $0x1a0] sm:$0xff] %vm3448_vm12, %v3436_v55  ;;  %v2571_v2 = vadd.f32 %v5491_v5, %v2570_v34  ;;  %v3316_v55 = vsel %vm3254_vm9, %v6068_v16, %v3185_v47 }
 0x437   : > { %v2572_v43 = vpop.f32.mrf.mxu1 }
 0x438   : > { %v3437_v7 = vadd.f32 %v3373_v39, %v2571_v2  ;;  %v3381_v43 = vsel %vm3319_vm10, %v3316_v55, 0.0 }
 0x439   : > { %v2575_v36 = vpop.f32.mrf.mxu1 }
 0x43a   : > { %3502 = vst.msk [vmem:[%s5511_s21 + $0x1a8] sm:$0xff] %vm3448_vm12, %v3437_v7  ;;  %v2576_v9 = vadd.f32 %v5491_v5, %v2575_v36  ;;  %v3189_v36 = vpop.permute.xlu1 %3188 }
 0x43b   : > { %v2577_v14 = vpop.f32.mrf.mxu1 }
 0x43c   : > { %v3438_v17 = vadd.f32 %v3374_v29, %v2576_v9  ;;  %v3382_v14 = vsel %vm3319_vm10, %v3317_v27, 0.0 }
 0x43d   : > { %v2578_v46 = vpop.f32.mrf.mxu1 }
 0x43e   : > { %3503 = vst.msk [vmem:[%s5511_s21 + $0x1b0] sm:$0xff] %vm3448_vm12, %v3438_v17  ;;  %v2579_v48 = vadd.f32 %v5491_v5, %v2578_v46  ;;  %v3318_v17 = vsel %vm3254_vm9, %v6070_v57, %v3189_v36 }
 0x43f   : > { %v2580_v37 = vpop.f32.mrf.mxu1  ;;  %v3383_v44 = vsel %vm3319_vm10, %v3318_v17, 0.0 }
 0x440   : > { %v3439_v41 = vadd.f32 %v3375_v11, %v2579_v48 }
 0x441   : > { %v2583_v40 = vpop.f32.mrf.mxu1 }
 0x442   : > { %3504 = vst.msk [vmem:[%s5511_s21 + $0x1b8] sm:$0xff] %vm3448_vm12, %v3439_v41  ;;  %v2584_v3 = vadd.f32 %v5491_v5, %v2583_v40 }
 0x443   : > { %v2585_v30 = vpop.f32.mrf.mxu1 }
 0x444   : > { %v3440_v52 = vadd.f32 %v3376_v1, %v2584_v3 }
 0x445   : > { %v2586_v45 = vpop.f32.mrf.mxu1 }
 0x446   : > { %3505 = vst.msk [vmem:[%s5511_s21 + $0x1c0] sm:$0xff] %vm3448_vm12, %v3440_v52  ;;  %v2587_v21 = vadd.f32 %v5491_v5, %v2586_v45 }
 0x447   : > { %v2588_v26 = vpop.f32.mrf.mxu1 }
 0x448   : > { %v3441_v19 = vadd.f32 %v3377_v15, %v2587_v21 }
 0x449   : > { %v2591_v59 = vpop.f32.mrf.mxu1 }
 0x44a   : > { %3506 = vst.msk [vmem:[%s5511_s21 + $0x1c8] sm:$0xff] %vm3448_vm12, %v3441_v19  ;;  %v2592_v24 = vadd.f32 %v5491_v5, %v2591_v59 }
 0x44b   : > { %v2593_v51 = vpop.f32.mrf.mxu1 }
 0x44c   : > { %v3442_v20 = vadd.f32 %v3378_v33, %v2592_v24 }
 0x44d   : > { %v2594_v12 = vpop.f32.mrf.mxu1 }
 0x44e   : > { %3507 = vst.msk [vmem:[%s5511_s21 + $0x1d0] sm:$0xff] %vm3448_vm12, %v3442_v20  ;;  %v2595_v10 = vadd.f32 %v3854_v61, %v2594_v12 }
 0x44f   : > { %v2596_v58 = vpop.f32.mrf.mxu1 }
 0x450   : > { %v3443_v5 = vadd.f32 %v3379_v4, %v2595_v10 }
 0x452   : > { %3508 = vst.msk [vmem:[%s5511_s21 + $0x1d8] sm:$0xff] %vm3448_vm12, %v3443_v5 }
 0x496   : > { %v2599_v31 = vpop.f32.mrf.mxu1 }
 0x497   : > { %v2600_v38 = vadd.f32 %v3854_v61, %v2599_v31 }
 0x498   : > { %v2601_v23 = vpop.f32.mrf.mxu1 }
 0x499   : > { %v3444_v34 = vadd.f32 %v3380_v0, %v2600_v38 }
 0x49a   : > { %v2602_v2 = vpop.f32.mrf.mxu1 }
 0x49b   : > { %3509 = vst.msk [vmem:[%s5511_s21 + $0x1e0] sm:$0xff] %vm3448_vm12, %v3444_v34  ;;  %v2603_v39 = vadd.f32 %v3854_v61, %v2602_v2 }
 0x49c   : > { %v2604_v7 = vpop.f32.mrf.mxu1 }
 0x49d   : > { %v3445_v42 = vadd.f32 %v3381_v43, %v2603_v39 }
 0x49e   : > { %v2607_v9 = vpop.f32.mrf.mxu1 }
 0x49f   : > { %3510 = vst.msk [vmem:[%s5511_s21 + $0x1e8] sm:$0xff] %vm3448_vm12, %v3445_v42  ;;  %v2608_v29 = vadd.f32 %v3854_v61, %v2607_v9 }
 0x4a0   : > { %v2609_v28 = vpop.f32.mrf.mxu1 }
 0x4a1   : > { %v3446_v46 = vadd.f32 %v3382_v14, %v2608_v29 }
 0x4a2   : > { %v2610_v48 = vpop.f32.mrf.mxu1 }
 0x4a3   : > { %3511 = vst.msk [vmem:[%s5511_s21 + $0x1f0] sm:$0xff] %vm3448_vm12, %v3446_v46  ;;  %v2611_v11 = vadd.f32 %v3854_v61, %v2610_v48 }
 0x4a4   : > { %v2612_v37 = vpop.f32.mrf.mxu1 }
 0x4a5   : > { %v3447_v41 = vadd.f32 %v3383_v44, %v2611_v11 }
 0x4a7   : > { %3512 = vst.msk [vmem:[%s5511_s21 + $0x1f8] sm:$0xff] %vm3448_vm12, %v3447_v41 }
 0x4a8 PF: > { %s17_s24 = sadd.s32 1, %s3861_s24  }
 0x4a9   : > { %p14_p4 = scmp.ge.s32.totalorder %s17_s24, 4  }
 0x4ab   :  { %16 = sbr.rel (!%p14_p4) target bundleno = 1 (0x1), region = 84 }

</bundles_post_ra>
